<compile_context>
chip_gen: v7x
topology: tpu7x:2x2x1
jax: 0.10.0
libtpu: 0.0.40
codegen_flags: <defaults>
</compile_context>

<pallas_src>
import math
from functools import partial

import jax
import jax.numpy as jnp
from jax.experimental import pallas as pl
from jax.experimental.pallas import tpu as pltpu


def _layernorm(x, gamma, beta, eps=1e-5):
    # PyTorch LayerNorm: biased variance, eps inside sqrt.
    mean = jnp.mean(x, axis=-1, keepdims=True)
    var = jnp.mean((x - mean) ** 2, axis=-1, keepdims=True)
    return (x - mean) * jax.lax.rsqrt(var + eps) * gamma + beta


def cmt_block_kernel(n_heads, need_weights, has_mask, ffn_chunk, head_via_transpose,
                     *refs):
    # ---- unpack refs (inputs..., outputs...) ----
    idx = 0
    q_ref = refs[idx]; idx += 1
    kv_ref = refs[idx]; idx += 1
    mask_ref = None
    if has_mask:
        mask_ref = refs[idx]; idx += 1
    (wq_ref, wkv_ref, wo_ref, w1_ref, w2_ref,
     bpack_ref, bkv_ref, bf1_ref) = refs[idx:idx + 8]
    idx += 8
    out_ref = refs[idx]; idx += 1
    attn_ref = refs[idx] if need_weights else None

    Bt, Lq, E = q_ref.shape
    Lk = kv_ref.shape[1]
    H = n_heads
    hd = E // H
    G = Bt * H
    cdt = wq_ref.dtype                          # bf16 MXU operand dtype

    q2 = q_ref[...].reshape(Bt * Lq, E)         # bf16 activations
    kv2 = kv_ref[...].reshape(Bt * Lk, E)

    bp = bpack_ref[...]                         # (8, E) packed 1-D params (f32)
    bq, bo = bp[0:1], bp[1:2]                   # bq already scaled by 1/sqrt(hd)
    g1, be1 = bp[2:3], bp[3:4]
    bfo2 = bp[4:5]
    g2, be2 = bp[5:6], bp[6:7]
    bkv = bkv_ref[...]                          # (1, 2E)
    bf1 = bf1_ref[...]                          # (1, 4E)

    # ---- in_proj: Q, and packed [K|V] in a single matmul (weights pre-transposed) ----
    Q = jnp.dot(q2, wq_ref[...], preferred_element_type=jnp.float32) + bq
    KV = jnp.dot(kv2, wkv_ref[...], preferred_element_type=jnp.float32) + bkv
    K, V = KV[:, :E], KV[:, E:]

    # ---- head-major stacks: one strided reshape+transpose per tensor ----
    if head_via_transpose:
        def to_heads(x, L):
            x4 = x.astype(cdt).reshape(Bt, L, H, hd)
            return jnp.transpose(x4, (0, 2, 1, 3)).reshape(G, L, hd)
    else:
        # Fallback path (older Mosaic without 4-D transpose support).
        def to_heads(x, L):
            xc = x.astype(cdt)
            return jnp.stack(
                [xc[b * L:(b + 1) * L, h * hd:(h + 1) * hd]
                 for b in range(Bt) for h in range(H)], axis=0)

    Qh, Kh, Vh = to_heads(Q, Lq), to_heads(K, Lk), to_heads(V, Lk)

    # ---- scores + softmax (single-batch-dim einsum: documented-fast Mosaic pattern) ----
    s = jnp.einsum('gqd,gkd->gqk', Qh, Kh,
                   preferred_element_type=jnp.float32)              # (G, Lq, Lk) f32
    if has_mask:
        mask = mask_ref[...]                                        # (Bt, 1, Lk) additive
        mask_g = jnp.broadcast_to(mask[:, None, :, :], (Bt, H, 1, Lk)).reshape(G, 1, Lk)
        s = s + mask_g
    s = s - jnp.max(s, axis=-1, keepdims=True)
    p = jnp.exp(s)
    denom = jnp.sum(p, axis=-1, keepdims=True)
    # Exact reciprocal when attn weights are externally visible; EUP approx otherwise.
    p = p * pl.reciprocal(denom, approx=not need_weights)

    ctx_h = jnp.einsum('gqk,gkd->gqd', p.astype(cdt), Vh,
                       preferred_element_type=jnp.float32)          # (G, Lq, hd)

    if head_via_transpose:
        ctx = jnp.transpose(ctx_h.reshape(Bt, H, Lq, hd), (0, 2, 1, 3)).reshape(Bt * Lq, E)
    else:
        ctx = jnp.concatenate(
            [jnp.concatenate([ctx_h[b * H + h] for h in range(H)], axis=-1)
             for b in range(Bt)], axis=0)

    attn_out = jnp.dot(ctx.astype(cdt), wo_ref[...],
                       preferred_element_type=jnp.float32) + bo

    # ---- residual + LayerNorm 1 (f32 math) ----
    x = _layernorm(q2.astype(jnp.float32) + attn_out, g1, be1)

    # ---- FFN: Linear(E, 4E) -> ReLU -> (Dropout = identity) -> Linear(4E, E) ----
    # Hidden dim processed in lane-aligned chunks to bound the activation slab.
    xc = x.astype(cdt)
    Hdim = 4 * E
    y = jnp.zeros((Bt * Lq, E), jnp.float32)
    for c0 in range(0, Hdim, ffn_chunk):
        c1 = c0 + ffn_chunk
        h1c = jnp.maximum(
            jnp.dot(xc, w1_ref[:, c0:c1], preferred_element_type=jnp.float32)
            + bf1[:, c0:c1], 0.0)
        y = y + jnp.dot(h1c.astype(cdt), w2_ref[c0:c1, :],
                        preferred_element_type=jnp.float32)
    y = y + bfo2

    # ---- residual + LayerNorm 2 ----
    out = _layernorm(x + y, g2, be2)
    out_ref[...] = out.reshape(Bt, Lq, E).astype(out_ref.dtype)

    if need_weights:
        # need_weights=True, average_attn_weights=True -> mean over heads
        attn = jnp.mean(p.reshape(Bt, H, Lq, Lk), axis=1)
        attn_ref[...] = attn.astype(attn_ref.dtype)


def _pick_batch_block(B, Lq, row_cap=256):
    # Fold batch into one block up to ~row_cap MXU rows (256-wide MXU on v6e/v7x).
    # TODO(synk): per-chip retune — 128 rows suffice on v5e; keep the grid a multiple
    # of 2 on v7x once FFN/Lk tiling frees more of the 64 MiB VMEM.
    best = 1
    for cand in range(1, B + 1):
        if B % cand == 0 and cand * Lq <= row_cap:
            best = cand
    return best


def _pick_ffn_chunk(hidden, cap=2048):
    if hidden <= cap:
        return hidden
    c = (cap // 128) * 128
    while c >= 128:
        if hidden % c == 0:
            return c
        c -= 128
    return hidden


def cross_modal_transformer_block(q, kv, params, kv_mask=None, *, n_heads,
                                  need_weights=True, batch_block=None):
    B, Lq, E = q.shape
    Bk, Lk, Ek = kv.shape
    assert Bk == B and Ek == E, "kv must share batch and embed dim with q"
    assert E % n_heads == 0, "embed dim must be divisible by n_heads"
    hd = E // n_heads
    scale = 1.0 / math.sqrt(hd)

    Bt = batch_block if batch_block is not None else _pick_batch_block(B, Lq)
    assert B % Bt == 0
    has_mask = kv_mask is not None
    ffn_chunk = _pick_ffn_chunk(4 * E)

    cdt = jnp.bfloat16  # MXU operand dtype (f32 accumulation inside the kernel)

    # ---- wrapper-side parameter packing (pre-transposed, scale folded) ----
    wq, wk, wv = jnp.split(params["in_proj_weight"], 3, axis=0)
    bq, bk, bv = jnp.split(params["in_proj_bias"], 3, axis=0)

    wq_t = (wq.T.astype(jnp.float32) * scale).astype(cdt)            # (E, E)
    wkv_t = jnp.concatenate([wk.T, wv.T], axis=1).astype(cdt)        # (E, 2E) packed K|V
    wo_t = params["out_proj_w"].T.astype(cdt)                        # (E, E)
    w1_t = params["ffn_w1"].T.astype(cdt)                            # (E, 4E)
    w2_t = params["ffn_w2"].T.astype(cdt)                            # (4E, E)

    bias_pack = jnp.stack([
        bq.astype(jnp.float32) * scale,                              # row 0: bq (scaled)
        params["out_proj_b"],                                        # row 1: bo
        params["ln1_g"], params["ln1_b"],                            # rows 2-3
        params["ffn_b2"],                                            # row 4
        params["ln2_g"], params["ln2_b"],                            # rows 5-6
        jnp.zeros((E,), jnp.float32),                                # row 7: pad to 8 sublanes
    ], axis=0).astype(jnp.float32)                                   # (8, E)
    bkv = jnp.concatenate([bk, bv]).reshape(1, 2 * E).astype(jnp.float32)
    bf1 = params["ffn_b1"].reshape(1, 4 * E).astype(jnp.float32)

    weights = [wq_t, wkv_t, wo_t, w1_t, w2_t, bias_pack, bkv, bf1]

    inputs = [q.astype(cdt), kv.astype(cdt)]
    in_specs_act = [
        pl.BlockSpec((Bt, Lq, E), lambda b: (b, 0, 0)),   # q (bf16)
        pl.BlockSpec((Bt, Lk, E), lambda b: (b, 0, 0)),   # kv (bf16)
    ]
    if has_mask:
        # key_padding_mask: True => ignore that key (additive -inf-ish, stays in f32)
        mask_bias = jnp.where(kv_mask, -1e30, 0.0).astype(jnp.float32)[:, None, :]
        inputs.append(mask_bias)
        in_specs_act.append(pl.BlockSpec((Bt, 1, Lk), lambda b: (b, 0, 0)))
    inputs += weights

    if need_weights:
        # TODO(synk): Lk not a multiple of 128 -> masked partial stores for attn weights;
        # prefer need_weights=False in production hot paths.
        out_shape = (jax.ShapeDtypeStruct((B, Lq, E), jnp.float32),
                     jax.ShapeDtypeStruct((B, Lq, Lk), jnp.float32))
        out_specs = (pl.BlockSpec((Bt, Lq, E), lambda b: (b, 0, 0)),
                     pl.BlockSpec((Bt, Lq, Lk), lambda b: (b, 0, 0)))
    else:
        out_shape = jax.ShapeDtypeStruct((B, Lq, E), jnp.float32)
        out_specs = pl.BlockSpec((Bt, Lq, E), lambda b: (b, 0, 0))

    # ---- cost estimate (advisory) ----
    flops = (2 * B * Lq * E * E            # Q proj
             + 4 * B * Lk * E * E          # packed KV proj
             + 4 * B * Lq * Lk * E         # scores + context
             + 2 * B * Lq * E * E          # out proj
             + 16 * B * Lq * E * E)        # FFN
    transcendentals = B * n_heads * Lq * Lk
    bytes_accessed = (2 * B * (Lq + Lk) * E + 2 * 12 * E * E
                      + 4 * (14 * E) + 4 * B * Lq * E
                      + (4 * B * Lq * Lk if need_weights else 0)
                      + (4 * B * Lk if has_mask else 0))
    cost = pl.CostEstimate(flops=int(flops), transcendentals=int(transcendentals),
                           bytes_accessed=int(bytes_accessed))

    def _vmem_limit(single_buffer):
        rows_q, rows_k, G = Bt * Lq, Bt * Lk, Bt * n_heads
        wbuf = 1 if single_buffer else 2
        w_bytes = (2 * 12 * E * E + 4 * 14 * E) * wbuf
        io_bytes = 2 * (2 * (rows_q + rows_k) * E) + 2 * 4 * rows_q * E
        if need_weights:
            io_bytes += 2 * 4 * Bt * Lq * Lk
        act_bytes = 4 * (8 * rows_q * E + 2 * G * Lq * Lk + rows_q * ffn_chunk)
        est = w_bytes + io_bytes + act_bytes
        return int(min(max(2 * est, 32 * 2 ** 20), 100 * 2 ** 20))

    def _run(head_via_transpose, single_buffer_weights):
        if single_buffer_weights:
            # constant index map -> no pipelining benefit from 2 buffers; halve weight VMEM
            w_specs = [pl.BlockSpec(w.shape, lambda b: (0, 0),
                                    pipeline_mode=pl.Buffered(1)) for w in weights]
        else:
            w_specs = [pl.BlockSpec(w.shape, lambda b: (0, 0)) for w in weights]

        return pl.pallas_call(
            partial(cmt_block_kernel, n_heads, need_weights, has_mask,
                    ffn_chunk, head_via_transpose),
            out_shape=out_shape,
            grid_spec=pltpu.PrefetchScalarGridSpec(
                num_scalar_prefetch=0,
                grid=(B // Bt,),
                in_specs=in_specs_act + w_specs,
                out_specs=out_specs,
            ),
            compiler_params=pltpu.CompilerParams(
                dimension_semantics=("parallel",),
                vmem_limit_bytes=_vmem_limit(single_buffer_weights)),
            cost_estimate=cost,
        )(*inputs)

    # Preferred config first; graceful fallback if the installed Mosaic rejects
    # single-buffered BlockSpecs or the 4-D head transpose.
    last_err = None
    for cfg in ((True, True), (True, False), (False, False)):
        try:
            return _run(*cfg)
        except Exception as e:  # lowering/compile fallback only
            last_err = e
    raise last_err


if __name__ == "__main__":
    B, Lq, Lk, E, H = 2, 8, 8, 32, 4  # dim_q = dim_kv(effective) = 32, n_heads = 4

    key = jax.random.PRNGKey(0)
    keys = jax.random.split(key, 8)

    params = {
        # nn.MultiheadAttention
        "in_proj_weight": 0.05 * jax.random.normal(keys[0], (3 * E, E), jnp.float32),
        "in_proj_bias":   0.01 * jax.random.normal(keys[1], (3 * E,), jnp.float32),
        "out_proj_w":     0.05 * jax.random.normal(keys[2], (E, E), jnp.float32),
        "out_proj_b":     jnp.zeros((E,), jnp.float32),
        # nn.LayerNorm(dim_q) x2 (default affine init: gamma=1, beta=0)
        "ln1_g": jnp.ones((E,), jnp.float32),
        "ln1_b": jnp.zeros((E,), jnp.float32),
        "ln2_g": jnp.ones((E,), jnp.float32),
        "ln2_b": jnp.zeros((E,), jnp.float32),
        # FFN: Linear(E, 4E), Linear(4E, E)
        "ffn_w1": 0.05 * jax.random.normal(keys[3], (4 * E, E), jnp.float32),
        "ffn_b1": 0.01 * jax.random.normal(keys[4], (4 * E,), jnp.float32),
        "ffn_w2": 0.05 * jax.random.normal(keys[5], (E, 4 * E), jnp.float32),
        "ffn_b2": 0.01 * jax.random.normal(keys[6], (E,), jnp.float32),
    }

    q = jax.random.normal(keys[7], (B, Lq, E), jnp.float32)
    kv = jax.random.normal(jax.random.fold_in(key, 99), (B, Lk, E), jnp.float32)
    # key_padding_mask: mask out the last two keys of batch element 1
    kv_mask = jnp.zeros((B, Lk), dtype=bool).at[1, -2:].set(True)

    out, attn_weights = cross_modal_transformer_block(q, kv, params,
                                                      kv_mask=kv_mask, n_heads=H,
                                                      need_weights=True)
    jax.block_until_ready((out, attn_weights))
    assert out.shape == (B, Lq, E) and attn_weights.shape == (B, Lq, Lk)
    assert bool(jnp.all(jnp.isfinite(out))) and bool(jnp.all(jnp.isfinite(attn_weights)))
    print("KERNEL_OK")
</pallas_src>

<mosaic_0001>
module attributes {stable_mosaic.version = 11 : i64} {
  func.func @cmt_block_kernel(%arg0: i32, %arg1: memref<2x8x32xbf16, #tpu.memory_space<vmem>>, %arg2: memref<2x8x32xbf16, #tpu.memory_space<vmem>>, %arg3: memref<2x1x8xf32, #tpu.memory_space<vmem>>, %arg4: memref<32x32xbf16, #tpu.memory_space<vmem>>, %arg5: memref<32x64xbf16, #tpu.memory_space<vmem>>, %arg6: memref<32x32xbf16, #tpu.memory_space<vmem>>, %arg7: memref<32x128xbf16, #tpu.memory_space<vmem>>, %arg8: memref<128x32xbf16, #tpu.memory_space<vmem>>, %arg9: memref<8x32xf32, #tpu.memory_space<vmem>>, %arg10: memref<1x64xf32, #tpu.memory_space<vmem>>, %arg11: memref<1x128xf32, #tpu.memory_space<vmem>>, %arg12: memref<2x8x32xf32, #tpu.memory_space<vmem>>, %arg13: memref<2x8x8xf32, #tpu.memory_space<vmem>>) attributes {dimension_semantics = [#tpu.dimension_semantics<parallel>], iteration_bounds = array<i64: 1>, scalar_prefetch = 0 : i64, scratch_operands = 0 : i64, tpu.core_type = #tpu.core_type<tc>, window_params = [{transform_indices = @transform_0, window_bounds = array<i64: 2, 8, 32>}, {transform_indices = @transform_1, window_bounds = array<i64: 2, 8, 32>}, {transform_indices = @transform_2, window_bounds = array<i64: 2, 1, 8>}, {pipeline_mode = #tpu.pipeline_mode<synchronous>, transform_indices = @transform_3, window_bounds = array<i64: 32, 32>}, {pipeline_mode = #tpu.pipeline_mode<synchronous>, transform_indices = @transform_4, window_bounds = array<i64: 32, 64>}, {pipeline_mode = #tpu.pipeline_mode<synchronous>, transform_indices = @transform_5, window_bounds = array<i64: 32, 32>}, {pipeline_mode = #tpu.pipeline_mode<synchronous>, transform_indices = @transform_6, window_bounds = array<i64: 32, 128>}, {pipeline_mode = #tpu.pipeline_mode<synchronous>, transform_indices = @transform_7, window_bounds = array<i64: 128, 32>}, {pipeline_mode = #tpu.pipeline_mode<synchronous>, transform_indices = @transform_8, window_bounds = array<i64: 8, 32>}, {pipeline_mode = #tpu.pipeline_mode<synchronous>, transform_indices = @transform_9, window_bounds = array<i64: 1, 64>}, {pipeline_mode = #tpu.pipeline_mode<synchronous>, transform_indices = @transform_10, window_bounds = array<i64: 1, 128>}, {transform_indices = @transform_11, window_bounds = array<i64: 2, 8, 32>}, {transform_indices = @transform_12, window_bounds = array<i64: 2, 8, 8>}]} {
    %c0 = arith.constant 0 : index
    %c0_0 = arith.constant 0 : index
    %c0_1 = arith.constant 0 : index
    %0 = vector.load %arg1[%c0, %c0_0, %c0_1] : memref<2x8x32xbf16, #tpu.memory_space<vmem>>, vector<2x8x32xbf16>
    %1 = vector.shape_cast %0 : vector<2x8x32xbf16> to vector<16x32xbf16>
    %c0_2 = arith.constant 0 : index
    %c0_3 = arith.constant 0 : index
    %c0_4 = arith.constant 0 : index
    %2 = vector.load %arg2[%c0_2, %c0_3, %c0_4] : memref<2x8x32xbf16, #tpu.memory_space<vmem>>, vector<2x8x32xbf16>
    %3 = vector.shape_cast %2 : vector<2x8x32xbf16> to vector<16x32xbf16>
    %c0_5 = arith.constant 0 : index
    %c0_6 = arith.constant 0 : index
    %4 = vector.load %arg9[%c0_5, %c0_6] : memref<8x32xf32, #tpu.memory_space<vmem>>, vector<8x32xf32>
    %5 = vector.extract_strided_slice %4 {offsets = [0, 0], sizes = [1, 32], strides = [1, 1]} : vector<8x32xf32> to vector<1x32xf32>
    %6 = vector.extract_strided_slice %4 {offsets = [1, 0], sizes = [1, 32], strides = [1, 1]} : vector<8x32xf32> to vector<1x32xf32>
    %7 = vector.extract_strided_slice %4 {offsets = [2, 0], sizes = [1, 32], strides = [1, 1]} : vector<8x32xf32> to vector<1x32xf32>
    %8 = vector.extract_strided_slice %4 {offsets = [3, 0], sizes = [1, 32], strides = [1, 1]} : vector<8x32xf32> to vector<1x32xf32>
    %9 = vector.extract_strided_slice %4 {offsets = [4, 0], sizes = [1, 32], strides = [1, 1]} : vector<8x32xf32> to vector<1x32xf32>
    %10 = vector.extract_strided_slice %4 {offsets = [5, 0], sizes = [1, 32], strides = [1, 1]} : vector<8x32xf32> to vector<1x32xf32>
    %11 = vector.extract_strided_slice %4 {offsets = [6, 0], sizes = [1, 32], strides = [1, 1]} : vector<8x32xf32> to vector<1x32xf32>
    %c0_7 = arith.constant 0 : index
    %c0_8 = arith.constant 0 : index
    %12 = vector.load %arg10[%c0_7, %c0_8] : memref<1x64xf32, #tpu.memory_space<vmem>>, vector<1x64xf32>
    %c0_9 = arith.constant 0 : index
    %c0_10 = arith.constant 0 : index
    %13 = vector.load %arg11[%c0_9, %c0_10] : memref<1x128xf32, #tpu.memory_space<vmem>>, vector<1x128xf32>
    %c0_11 = arith.constant 0 : index
    %c0_12 = arith.constant 0 : index
    %14 = vector.load %arg4[%c0_11, %c0_12] : memref<32x32xbf16, #tpu.memory_space<vmem>>, vector<32x32xbf16>
    %cst = arith.constant dense<0.000000e+00> : vector<16x32xf32>
    %15 = tpu.matmul %1, %14, %cst {dimension_numbers = #tpu.dot_dimension_numbers<[1], [0], [0], [1], [0, 0, 1, 1], [], []>} : vector<16x32xbf16>, vector<32x32xbf16>, vector<16x32xf32> -> vector<16x32xf32>
    %16 = vector.broadcast %5 : vector<1x32xf32> to vector<16x32xf32>
    %17 = arith.addf %15, %16 : vector<16x32xf32>
    %c0_13 = arith.constant 0 : index
    %c0_14 = arith.constant 0 : index
    %18 = vector.load %arg5[%c0_13, %c0_14] : memref<32x64xbf16, #tpu.memory_space<vmem>>, vector<32x64xbf16>
    %cst_15 = arith.constant dense<0.000000e+00> : vector<16x64xf32>
    %19 = tpu.matmul %3, %18, %cst_15 {dimension_numbers = #tpu.dot_dimension_numbers<[1], [0], [0], [1], [0, 0, 1, 1], [], []>} : vector<16x32xbf16>, vector<32x64xbf16>, vector<16x64xf32> -> vector<16x64xf32>
    %20 = vector.broadcast %12 : vector<1x64xf32> to vector<16x64xf32>
    %21 = arith.addf %19, %20 : vector<16x64xf32>
    %22 = vector.extract_strided_slice %21 {offsets = [0, 0], sizes = [16, 32], strides = [1, 1]} : vector<16x64xf32> to vector<16x32xf32>
    %23 = vector.extract_strided_slice %21 {offsets = [0, 32], sizes = [16, 32], strides = [1, 1]} : vector<16x64xf32> to vector<16x32xf32>
    %24 = arith.truncf %17 : vector<16x32xf32> to vector<16x32xbf16>
    %25 = vector.shape_cast %24 : vector<16x32xbf16> to vector<2x8x4x8xbf16>
    %26 = tpu.transpose %25, [0, 2, 1, 3] : vector<2x8x4x8xbf16> -> vector<2x4x8x8xbf16>
    %27 = vector.shape_cast %26 : vector<2x4x8x8xbf16> to vector<8x8x8xbf16>
    %28 = arith.truncf %22 : vector<16x32xf32> to vector<16x32xbf16>
    %29 = vector.shape_cast %28 : vector<16x32xbf16> to vector<2x8x4x8xbf16>
    %30 = tpu.transpose %29, [0, 2, 1, 3] : vector<2x8x4x8xbf16> -> vector<2x4x8x8xbf16>
    %31 = vector.shape_cast %30 : vector<2x4x8x8xbf16> to vector<8x8x8xbf16>
    %32 = arith.truncf %23 : vector<16x32xf32> to vector<16x32xbf16>
    %33 = vector.shape_cast %32 : vector<16x32xbf16> to vector<2x8x4x8xbf16>
    %34 = tpu.transpose %33, [0, 2, 1, 3] : vector<2x8x4x8xbf16> -> vector<2x4x8x8xbf16>
    %35 = vector.shape_cast %34 : vector<2x4x8x8xbf16> to vector<8x8x8xbf16>
    "tpu.trace_start"() <{level = 10 : i32, message = "gqd,gkd->gqk"}> : () -> ()
    %cst_16 = arith.constant dense<0.000000e+00> : vector<8x8x8xf32>
    %36 = tpu.matmul %27, %31, %cst_16 {dimension_numbers = #tpu.dot_dimension_numbers<[2], [2], [1], [1], [0, 0, 0, 1, 1, 1], [0], [0]>} : vector<8x8x8xbf16>, vector<8x8x8xbf16>, vector<8x8x8xf32> -> vector<8x8x8xf32>
    "tpu.trace_stop"() : () -> ()
    %c0_17 = arith.constant 0 : index
    %c0_18 = arith.constant 0 : index
    %c0_19 = arith.constant 0 : index
    %37 = vector.load %arg3[%c0_17, %c0_18, %c0_19] : memref<2x1x8xf32, #tpu.memory_space<vmem>>, vector<2x1x8xf32>
    %38 = vector.shape_cast %37 : vector<2x1x8xf32> to vector<2x1x1x8xf32>
    %39 = vector.shape_cast %38 : vector<2x1x1x8xf32> to vector<2x1x1x8xf32>
    %40 = vector.broadcast %39 : vector<2x1x1x8xf32> to vector<2x4x1x8xf32>
    %41 = vector.shape_cast %40 : vector<2x4x1x8xf32> to vector<8x1x8xf32>
    %42 = vector.broadcast %41 : vector<8x1x8xf32> to vector<8x8x8xf32>
    %43 = arith.addf %36, %42 : vector<8x8x8xf32>
    %cst_20 = arith.constant dense<0xFF800000> : vector<8x8xf32>
    %44 = vector.multi_reduction <maximumf>, %43, %cst_20 [2] : vector<8x8x8xf32> to vector<8x8xf32>
    %45 = vector.shape_cast %44 : vector<8x8xf32> to vector<8x8x1xf32>
    %46 = vector.broadcast %45 : vector<8x8x1xf32> to vector<8x8x8xf32>
    %47 = arith.subf %43, %46 : vector<8x8x8xf32>
    %48 = math.exp %47 : vector<8x8x8xf32>
    %cst_21 = arith.constant dense<0.000000e+00> : vector<8x8xf32>
    %49 = vector.multi_reduction <add>, %48, %cst_21 [2] : vector<8x8x8xf32> to vector<8x8xf32>
    %50 = vector.shape_cast %49 : vector<8x8xf32> to vector<8x8x1xf32>
    %51 = tpu.reciprocal %50 : vector<8x8x1xf32> -> vector<8x8x1xf32>
    %52 = vector.broadcast %51 : vector<8x8x1xf32> to vector<8x8x8xf32>
    %53 = arith.mulf %48, %52 : vector<8x8x8xf32>
    %54 = arith.truncf %53 : vector<8x8x8xf32> to vector<8x8x8xbf16>
    "tpu.trace_start"() <{level = 10 : i32, message = "gqk,gkd->gqd"}> : () -> ()
    %cst_22 = arith.constant dense<0.000000e+00> : vector<8x8x8xf32>
    %55 = tpu.matmul %54, %35, %cst_22 {dimension_numbers = #tpu.dot_dimension_numbers<[2], [1], [1], [2], [0, 0, 0, 1, 1, 2], [0], [0]>} : vector<8x8x8xbf16>, vector<8x8x8xbf16>, vector<8x8x8xf32> -> vector<8x8x8xf32>
    "tpu.trace_stop"() : () -> ()
    %56 = vector.shape_cast %55 : vector<8x8x8xf32> to vector<2x4x8x8xf32>
    %57 = tpu.transpose %56, [0, 2, 1, 3] : vector<2x4x8x8xf32> -> vector<2x8x4x8xf32>
    %58 = vector.shape_cast %57 : vector<2x8x4x8xf32> to vector<16x32xf32>
    %59 = arith.truncf %58 : vector<16x32xf32> to vector<16x32xbf16>
    %c0_23 = arith.constant 0 : index
    %c0_24 = arith.constant 0 : index
    %60 = vector.load %arg6[%c0_23, %c0_24] : memref<32x32xbf16, #tpu.memory_space<vmem>>, vector<32x32xbf16>
    %cst_25 = arith.constant dense<0.000000e+00> : vector<16x32xf32>
    %61 = tpu.matmul %59, %60, %cst_25 {dimension_numbers = #tpu.dot_dimension_numbers<[1], [0], [0], [1], [0, 0, 1, 1], [], []>} : vector<16x32xbf16>, vector<32x32xbf16>, vector<16x32xf32> -> vector<16x32xf32>
    %62 = vector.broadcast %6 : vector<1x32xf32> to vector<16x32xf32>
    %63 = arith.addf %61, %62 : vector<16x32xf32>
    %64 = arith.extf %1 : vector<16x32xbf16> to vector<16x32xf32>
    %65 = arith.addf %64, %63 : vector<16x32xf32>
    %cst_26 = arith.constant dense<0.000000e+00> : vector<16xf32>
    %66 = vector.multi_reduction <add>, %65, %cst_26 [1] : vector<16x32xf32> to vector<16xf32>
    %67 = vector.shape_cast %66 : vector<16xf32> to vector<16x1xf32>
    %cst_27 = arith.constant 3.200000e+01 : f32
    %68 = vector.broadcast %cst_27 : f32 to vector<16x1xf32>
    %69 = arith.divf %67, %68 : vector<16x1xf32>
    %70 = vector.broadcast %69 : vector<16x1xf32> to vector<16x32xf32>
    %71 = arith.subf %65, %70 : vector<16x32xf32>
    %72 = arith.mulf %71, %71 : vector<16x32xf32>
    %cst_28 = arith.constant dense<0.000000e+00> : vector<16xf32>
    %73 = vector.multi_reduction <add>, %72, %cst_28 [1] : vector<16x32xf32> to vector<16xf32>
    %74 = vector.shape_cast %73 : vector<16xf32> to vector<16x1xf32>
    %cst_29 = arith.constant 3.200000e+01 : f32
    %75 = vector.broadcast %cst_29 : f32 to vector<16x1xf32>
    %76 = arith.divf %74, %75 : vector<16x1xf32>
    %77 = vector.broadcast %69 : vector<16x1xf32> to vector<16x32xf32>
    %78 = arith.subf %65, %77 : vector<16x32xf32>
    %cst_30 = arith.constant 9.99999974E-6 : f32
    %79 = vector.broadcast %cst_30 : f32 to vector<16x1xf32>
    %80 = arith.addf %76, %79 : vector<16x1xf32>
    %81 = math.rsqrt %80 : vector<16x1xf32>
    %82 = vector.broadcast %81 : vector<16x1xf32> to vector<16x32xf32>
    %83 = arith.mulf %78, %82 : vector<16x32xf32>
    %84 = vector.broadcast %7 : vector<1x32xf32> to vector<16x32xf32>
    %85 = arith.mulf %83, %84 : vector<16x32xf32>
    %86 = vector.broadcast %8 : vector<1x32xf32> to vector<16x32xf32>
    %87 = arith.addf %85, %86 : vector<16x32xf32>
    %88 = arith.truncf %87 : vector<16x32xf32> to vector<16x32xbf16>
    %cst_31 = arith.constant 0.000000e+00 : f32
    %89 = vector.broadcast %cst_31 : f32 to vector<16x32xf32>
    %c0_32 = arith.constant 0 : index
    %c0_33 = arith.constant 0 : index
    %90 = vector.load %arg7[%c0_32, %c0_33] : memref<32x128xbf16, #tpu.memory_space<vmem>>, vector<32x128xbf16>
    %cst_34 = arith.constant dense<0.000000e+00> : vector<16x128xf32>
    %91 = tpu.matmul %88, %90, %cst_34 {dimension_numbers = #tpu.dot_dimension_numbers<[1], [0], [0], [1], [0, 0, 1, 1], [], []>} : vector<16x32xbf16>, vector<32x128xbf16>, vector<16x128xf32> -> vector<16x128xf32>
    %92 = vector.broadcast %13 : vector<1x128xf32> to vector<16x128xf32>
    %93 = arith.addf %91, %92 : vector<16x128xf32>
    %cst_35 = arith.constant 0.000000e+00 : f32
    %94 = vector.broadcast %cst_35 : f32 to vector<16x128xf32>
    %95 = arith.maximumf %93, %94 : vector<16x128xf32>
    %96 = arith.truncf %95 : vector<16x128xf32> to vector<16x128xbf16>
    %c0_36 = arith.constant 0 : index
    %c0_37 = arith.constant 0 : index
    %97 = vector.load %arg8[%c0_36, %c0_37] : memref<128x32xbf16, #tpu.memory_space<vmem>>, vector<128x32xbf16>
    %cst_38 = arith.constant dense<0.000000e+00> : vector<16x32xf32>
    %98 = tpu.matmul %96, %97, %cst_38 {dimension_numbers = #tpu.dot_dimension_numbers<[1], [0], [0], [1], [0, 0, 1, 1], [], []>} : vector<16x128xbf16>, vector<128x32xbf16>, vector<16x32xf32> -> vector<16x32xf32>
    %99 = arith.addf %89, %98 : vector<16x32xf32>
    %100 = vector.broadcast %9 : vector<1x32xf32> to vector<16x32xf32>
    %101 = arith.addf %99, %100 : vector<16x32xf32>
    %102 = arith.addf %87, %101 : vector<16x32xf32>
    %cst_39 = arith.constant dense<0.000000e+00> : vector<16xf32>
    %103 = vector.multi_reduction <add>, %102, %cst_39 [1] : vector<16x32xf32> to vector<16xf32>
    %104 = vector.shape_cast %103 : vector<16xf32> to vector<16x1xf32>
    %cst_40 = arith.constant 3.200000e+01 : f32
    %105 = vector.broadcast %cst_40 : f32 to vector<16x1xf32>
    %106 = arith.divf %104, %105 : vector<16x1xf32>
    %107 = vector.broadcast %106 : vector<16x1xf32> to vector<16x32xf32>
    %108 = arith.subf %102, %107 : vector<16x32xf32>
    %109 = arith.mulf %108, %108 : vector<16x32xf32>
    %cst_41 = arith.constant dense<0.000000e+00> : vector<16xf32>
    %110 = vector.multi_reduction <add>, %109, %cst_41 [1] : vector<16x32xf32> to vector<16xf32>
    %111 = vector.shape_cast %110 : vector<16xf32> to vector<16x1xf32>
    %cst_42 = arith.constant 3.200000e+01 : f32
    %112 = vector.broadcast %cst_42 : f32 to vector<16x1xf32>
    %113 = arith.divf %111, %112 : vector<16x1xf32>
    %114 = vector.broadcast %106 : vector<16x1xf32> to vector<16x32xf32>
    %115 = arith.subf %102, %114 : vector<16x32xf32>
    %cst_43 = arith.constant 9.99999974E-6 : f32
    %116 = vector.broadcast %cst_43 : f32 to vector<16x1xf32>
    %117 = arith.addf %113, %116 : vector<16x1xf32>
    %118 = math.rsqrt %117 : vector<16x1xf32>
    %119 = vector.broadcast %118 : vector<16x1xf32> to vector<16x32xf32>
    %120 = arith.mulf %115, %119 : vector<16x32xf32>
    %121 = vector.broadcast %10 : vector<1x32xf32> to vector<16x32xf32>
    %122 = arith.mulf %120, %121 : vector<16x32xf32>
    %123 = vector.broadcast %11 : vector<1x32xf32> to vector<16x32xf32>
    %124 = arith.addf %122, %123 : vector<16x32xf32>
    %125 = vector.shape_cast %124 : vector<16x32xf32> to vector<2x8x32xf32>
    %c0_44 = arith.constant 0 : index
    %c0_45 = arith.constant 0 : index
    %c0_46 = arith.constant 0 : index
    %126 = vector.load %arg12[%c0_44, %c0_45, %c0_46] : memref<2x8x32xf32, #tpu.memory_space<vmem>>, vector<2x8x32xf32>
    tpu.vector_store %arg12[%c0_44, %c0_45, %c0_46], %125 {strides = array<i32>} : memref<2x8x32xf32, #tpu.memory_space<vmem>>, vector<2x8x32xf32>,
    %127 = vector.shape_cast %53 : vector<8x8x8xf32> to vector<2x4x8x8xf32>
    %cst_47 = arith.constant dense<0.000000e+00> : vector<2x8x8xf32>
    %128 = vector.multi_reduction <add>, %127, %cst_47 [1] : vector<2x4x8x8xf32> to vector<2x8x8xf32>
    %cst_48 = arith.constant 4.000000e+00 : f32
    %129 = vector.broadcast %cst_48 : f32 to vector<2x8x8xf32>
    %130 = arith.divf %128, %129 : vector<2x8x8xf32>
    %c0_49 = arith.constant 0 : index
    %c0_50 = arith.constant 0 : index
    %c0_51 = arith.constant 0 : index
    %131 = vector.load %arg13[%c0_49, %c0_50, %c0_51] : memref<2x8x8xf32, #tpu.memory_space<vmem>>, vector<2x8x8xf32>
    tpu.vector_store %arg13[%c0_49, %c0_50, %c0_51], %130 {strides = array<i32>} : memref<2x8x8xf32, #tpu.memory_space<vmem>>, vector<2x8x8xf32>,
    return
  }
  func.func @transform_0(%arg0: i32) -> (i32, i32, i32) {
    %c0_i32 = arith.constant 0 : i32
    %c0_i32_0 = arith.constant 0 : i32
    %c0_i32_1 = arith.constant 0 : i32
    return %arg0, %c0_i32, %c0_i32_0 : i32, i32, i32
  }
  func.func @transform_1(%arg0: i32) -> (i32, i32, i32) {
    %c0_i32 = arith.constant 0 : i32
    %c0_i32_0 = arith.constant 0 : i32
    %c0_i32_1 = arith.constant 0 : i32
    return %arg0, %c0_i32, %c0_i32_0 : i32, i32, i32
  }
  func.func @transform_2(%arg0: i32) -> (i32, i32, i32) {
    %c0_i32 = arith.constant 0 : i32
    %c0_i32_0 = arith.constant 0 : i32
    %c0_i32_1 = arith.constant 0 : i32
    return %arg0, %c0_i32, %c0_i32_0 : i32, i32, i32
  }
  func.func @transform_3(%arg0: i32) -> (i32, i32) {
    %c0_i32 = arith.constant 0 : i32
    %c0_i32_0 = arith.constant 0 : i32
    %c0_i32_1 = arith.constant 0 : i32
    return %c0_i32, %c0_i32_0 : i32, i32
  }
  func.func @transform_4(%arg0: i32) -> (i32, i32) {
    %c0_i32 = arith.constant 0 : i32
    %c0_i32_0 = arith.constant 0 : i32
    %c0_i32_1 = arith.constant 0 : i32
    return %c0_i32, %c0_i32_0 : i32, i32
  }
  func.func @transform_5(%arg0: i32) -> (i32, i32) {
    %c0_i32 = arith.constant 0 : i32
    %c0_i32_0 = arith.constant 0 : i32
    %c0_i32_1 = arith.constant 0 : i32
    return %c0_i32, %c0_i32_0 : i32, i32
  }
  func.func @transform_6(%arg0: i32) -> (i32, i32) {
    %c0_i32 = arith.constant 0 : i32
    %c0_i32_0 = arith.constant 0 : i32
    %c0_i32_1 = arith.constant 0 : i32
    return %c0_i32, %c0_i32_0 : i32, i32
  }
  func.func @transform_7(%arg0: i32) -> (i32, i32) {
    %c0_i32 = arith.constant 0 : i32
    %c0_i32_0 = arith.constant 0 : i32
    %c0_i32_1 = arith.constant 0 : i32
    return %c0_i32, %c0_i32_0 : i32, i32
  }
  func.func @transform_8(%arg0: i32) -> (i32, i32) {
    %c0_i32 = arith.constant 0 : i32
    %c0_i32_0 = arith.constant 0 : i32
    %c0_i32_1 = arith.constant 0 : i32
    return %c0_i32, %c0_i32_0 : i32, i32
  }
  func.func @transform_9(%arg0: i32) -> (i32, i32) {
    %c0_i32 = arith.constant 0 : i32
    %c0_i32_0 = arith.constant 0 : i32
    %c0_i32_1 = arith.constant 0 : i32
    return %c0_i32, %c0_i32_0 : i32, i32
  }
  func.func @transform_10(%arg0: i32) -> (i32, i32) {
    %c0_i32 = arith.constant 0 : i32
    %c0_i32_0 = arith.constant 0 : i32
    %c0_i32_1 = arith.constant 0 : i32
    return %c0_i32, %c0_i32_0 : i32, i32
  }
  func.func @transform_11(%arg0: i32) -> (i32, i32, i32) {
    %c0_i32 = arith.constant 0 : i32
    %c0_i32_0 = arith.constant 0 : i32
    %c0_i32_1 = arith.constant 0 : i32
    return %arg0, %c0_i32, %c0_i32_0 : i32, i32, i32
  }
  func.func @transform_12(%arg0: i32) -> (i32, i32, i32) {
    %c0_i32 = arith.constant 0 : i32
    %c0_i32_0 = arith.constant 0 : i32
    %c0_i32_1 = arith.constant 0 : i32
    return %arg0, %c0_i32, %c0_i32_0 : i32, i32, i32
  }
}

module attributes {stable_mosaic.version = 11 : i64} {
  func.func @cmt_block_kernel(%arg0: i32, %arg1: memref<2x8x32xbf16, #tpu.memory_space<vmem>>, %arg2: memref<2x8x32xbf16, #tpu.memory_space<vmem>>, %arg3: memref<2x1x8xf32, #tpu.memory_space<vmem>>, %arg4: memref<32x32xbf16, #tpu.memory_space<vmem>>, %arg5: memref<32x64xbf16, #tpu.memory_space<vmem>>, %arg6: memref<32x32xbf16, #tpu.memory_space<vmem>>, %arg7: memref<32x128xbf16, #tpu.memory_space<vmem>>, %arg8: memref<128x32xbf16, #tpu.memory_space<vmem>>, %arg9: memref<8x32xf32, #tpu.memory_space<vmem>>, %arg10: memref<1x64xf32, #tpu.memory_space<vmem>>, %arg11: memref<1x128xf32, #tpu.memory_space<vmem>>, %arg12: memref<2x8x32xf32, #tpu.memory_space<vmem>>, %arg13: memref<2x8x8xf32, #tpu.memory_space<vmem>>) attributes {dimension_semantics = [#tpu.dimension_semantics<parallel>], iteration_bounds = array<i64: 1>, scalar_prefetch = 0 : i64, scratch_operands = 0 : i64, tpu.core_type = #tpu.core_type<tc>, window_params = [{transform_indices = @transform_0, window_bounds = array<i64: 2, 8, 32>}, {transform_indices = @transform_1, window_bounds = array<i64: 2, 8, 32>}, {transform_indices = @transform_2, window_bounds = array<i64: 2, 1, 8>}, {pipeline_mode = #tpu.pipeline_mode<synchronous>, transform_indices = @transform_3, window_bounds = array<i64: 32, 32>}, {pipeline_mode = #tpu.pipeline_mode<synchronous>, transform_indices = @transform_4, window_bounds = array<i64: 32, 64>}, {pipeline_mode = #tpu.pipeline_mode<synchronous>, transform_indices = @transform_5, window_bounds = array<i64: 32, 32>}, {pipeline_mode = #tpu.pipeline_mode<synchronous>, transform_indices = @transform_6, window_bounds = array<i64: 32, 128>}, {pipeline_mode = #tpu.pipeline_mode<synchronous>, transform_indices = @transform_7, window_bounds = array<i64: 128, 32>}, {pipeline_mode = #tpu.pipeline_mode<synchronous>, transform_indices = @transform_8, window_bounds = array<i64: 8, 32>}, {pipeline_mode = #tpu.pipeline_mode<synchronous>, transform_indices = @transform_9, window_bounds = array<i64: 1, 64>}, {pipeline_mode = #tpu.pipeline_mode<synchronous>, transform_indices = @transform_10, window_bounds = array<i64: 1, 128>}, {transform_indices = @transform_11, window_bounds = array<i64: 2, 8, 32>}, {transform_indices = @transform_12, window_bounds = array<i64: 2, 8, 8>}]} {
    %c0 = arith.constant 0 : index
    %c0_0 = arith.constant 0 : index
    %c0_1 = arith.constant 0 : index
    %0 = vector.load %arg1[%c0, %c0_0, %c0_1] : memref<2x8x32xbf16, #tpu.memory_space<vmem>>, vector<2x8x32xbf16>
    %1 = vector.shape_cast %0 : vector<2x8x32xbf16> to vector<16x32xbf16>
    %c0_2 = arith.constant 0 : index
    %c0_3 = arith.constant 0 : index
    %c0_4 = arith.constant 0 : index
    %2 = vector.load %arg2[%c0_2, %c0_3, %c0_4] : memref<2x8x32xbf16, #tpu.memory_space<vmem>>, vector<2x8x32xbf16>
    %3 = vector.shape_cast %2 : vector<2x8x32xbf16> to vector<16x32xbf16>
    %c0_5 = arith.constant 0 : index
    %c0_6 = arith.constant 0 : index
    %4 = vector.load %arg9[%c0_5, %c0_6] : memref<8x32xf32, #tpu.memory_space<vmem>>, vector<8x32xf32>
    %5 = vector.extract_strided_slice %4 {offsets = [0, 0], sizes = [1, 32], strides = [1, 1]} : vector<8x32xf32> to vector<1x32xf32>
    %6 = vector.extract_strided_slice %4 {offsets = [1, 0], sizes = [1, 32], strides = [1, 1]} : vector<8x32xf32> to vector<1x32xf32>
    %7 = vector.extract_strided_slice %4 {offsets = [2, 0], sizes = [1, 32], strides = [1, 1]} : vector<8x32xf32> to vector<1x32xf32>
    %8 = vector.extract_strided_slice %4 {offsets = [3, 0], sizes = [1, 32], strides = [1, 1]} : vector<8x32xf32> to vector<1x32xf32>
    %9 = vector.extract_strided_slice %4 {offsets = [4, 0], sizes = [1, 32], strides = [1, 1]} : vector<8x32xf32> to vector<1x32xf32>
    %10 = vector.extract_strided_slice %4 {offsets = [5, 0], sizes = [1, 32], strides = [1, 1]} : vector<8x32xf32> to vector<1x32xf32>
    %11 = vector.extract_strided_slice %4 {offsets = [6, 0], sizes = [1, 32], strides = [1, 1]} : vector<8x32xf32> to vector<1x32xf32>
    %c0_7 = arith.constant 0 : index
    %c0_8 = arith.constant 0 : index
    %12 = vector.load %arg10[%c0_7, %c0_8] : memref<1x64xf32, #tpu.memory_space<vmem>>, vector<1x64xf32>
    %c0_9 = arith.constant 0 : index
    %c0_10 = arith.constant 0 : index
    %13 = vector.load %arg11[%c0_9, %c0_10] : memref<1x128xf32, #tpu.memory_space<vmem>>, vector<1x128xf32>
    %c0_11 = arith.constant 0 : index
    %c0_12 = arith.constant 0 : index
    %14 = vector.load %arg4[%c0_11, %c0_12] : memref<32x32xbf16, #tpu.memory_space<vmem>>, vector<32x32xbf16>
    %cst = arith.constant dense<0.000000e+00> : vector<16x32xf32>
    %15 = tpu.matmul %1, %14, %cst {dimension_numbers = #tpu.dot_dimension_numbers<[1], [0], [0], [1], [0, 0, 1, 1], [], []>} : vector<16x32xbf16>, vector<32x32xbf16>, vector<16x32xf32> -> vector<16x32xf32>
    %16 = vector.broadcast %5 : vector<1x32xf32> to vector<16x32xf32>
    %17 = arith.addf %15, %16 : vector<16x32xf32>
    %c0_13 = arith.constant 0 : index
    %c0_14 = arith.constant 0 : index
    %18 = vector.load %arg5[%c0_13, %c0_14] : memref<32x64xbf16, #tpu.memory_space<vmem>>, vector<32x64xbf16>
    %cst_15 = arith.constant dense<0.000000e+00> : vector<16x64xf32>
    %19 = tpu.matmul %3, %18, %cst_15 {dimension_numbers = #tpu.dot_dimension_numbers<[1], [0], [0], [1], [0, 0, 1, 1], [], []>} : vector<16x32xbf16>, vector<32x64xbf16>, vector<16x64xf32> -> vector<16x64xf32>
    %20 = vector.broadcast %12 : vector<1x64xf32> to vector<16x64xf32>
    %21 = arith.addf %19, %20 : vector<16x64xf32>
    %22 = vector.extract_strided_slice %21 {offsets = [0, 0], sizes = [16, 32], strides = [1, 1]} : vector<16x64xf32> to vector<16x32xf32>
    %23 = vector.extract_strided_slice %21 {offsets = [0, 32], sizes = [16, 32], strides = [1, 1]} : vector<16x64xf32> to vector<16x32xf32>
    %24 = arith.truncf %17 : vector<16x32xf32> to vector<16x32xbf16>
    %25 = vector.shape_cast %24 : vector<16x32xbf16> to vector<2x8x4x8xbf16>
    %26 = tpu.transpose %25, [0, 2, 1, 3] : vector<2x8x4x8xbf16> -> vector<2x4x8x8xbf16>
    %27 = vector.shape_cast %26 : vector<2x4x8x8xbf16> to vector<8x8x8xbf16>
    %28 = arith.truncf %22 : vector<16x32xf32> to vector<16x32xbf16>
    %29 = vector.shape_cast %28 : vector<16x32xbf16> to vector<2x8x4x8xbf16>
    %30 = tpu.transpose %29, [0, 2, 1, 3] : vector<2x8x4x8xbf16> -> vector<2x4x8x8xbf16>
    %31 = vector.shape_cast %30 : vector<2x4x8x8xbf16> to vector<8x8x8xbf16>
    %32 = arith.truncf %23 : vector<16x32xf32> to vector<16x32xbf16>
    %33 = vector.shape_cast %32 : vector<16x32xbf16> to vector<2x8x4x8xbf16>
    %34 = tpu.transpose %33, [0, 2, 1, 3] : vector<2x8x4x8xbf16> -> vector<2x4x8x8xbf16>
    %35 = vector.shape_cast %34 : vector<2x4x8x8xbf16> to vector<8x8x8xbf16>
    "tpu.trace_start"() <{level = 10 : i32, message = "gqd,gkd->gqk"}> : () -> ()
    %cst_16 = arith.constant dense<0.000000e+00> : vector<8x8x8xf32>
    %36 = tpu.matmul %27, %31, %cst_16 {dimension_numbers = #tpu.dot_dimension_numbers<[2], [2], [1], [1], [0, 0, 0, 1, 1, 1], [0], [0]>} : vector<8x8x8xbf16>, vector<8x8x8xbf16>, vector<8x8x8xf32> -> vector<8x8x8xf32>
    "tpu.trace_stop"() : () -> ()
    %c0_17 = arith.constant 0 : index
    %c0_18 = arith.constant 0 : index
    %c0_19 = arith.constant 0 : index
    %37 = vector.load %arg3[%c0_17, %c0_18, %c0_19] : memref<2x1x8xf32, #tpu.memory_space<vmem>>, vector<2x1x8xf32>
    %38 = vector.shape_cast %37 : vector<2x1x8xf32> to vector<2x1x1x8xf32>
    %39 = vector.shape_cast %38 : vector<2x1x1x8xf32> to vector<2x1x1x8xf32>
    %40 = vector.broadcast %39 : vector<2x1x1x8xf32> to vector<2x4x1x8xf32>
    %41 = vector.shape_cast %40 : vector<2x4x1x8xf32> to vector<8x1x8xf32>
    %42 = vector.broadcast %41 : vector<8x1x8xf32> to vector<8x8x8xf32>
    %43 = arith.addf %36, %42 : vector<8x8x8xf32>
    %cst_20 = arith.constant dense<0xFF800000> : vector<8x8xf32>
    %44 = vector.multi_reduction <maximumf>, %43, %cst_20 [2] : vector<8x8x8xf32> to vector<8x8xf32>
    %45 = vector.shape_cast %44 : vector<8x8xf32> to vector<8x8x1xf32>
    %46 = vector.broadcast %45 : vector<8x8x1xf32> to vector<8x8x8xf32>
    %47 = arith.subf %43, %46 : vector<8x8x8xf32>
    %48 = math.exp %47 : vector<8x8x8xf32>
    %cst_21 = arith.constant dense<0.000000e+00> : vector<8x8xf32>
    %49 = vector.multi_reduction <add>, %48, %cst_21 [2] : vector<8x8x8xf32> to vector<8x8xf32>
    %50 = vector.shape_cast %49 : vector<8x8xf32> to vector<8x8x1xf32>
    %51 = tpu.reciprocal %50 : vector<8x8x1xf32> -> vector<8x8x1xf32>
    %52 = vector.broadcast %51 : vector<8x8x1xf32> to vector<8x8x8xf32>
    %53 = arith.mulf %48, %52 : vector<8x8x8xf32>
    %54 = arith.truncf %53 : vector<8x8x8xf32> to vector<8x8x8xbf16>
    "tpu.trace_start"() <{level = 10 : i32, message = "gqk,gkd->gqd"}> : () -> ()
    %cst_22 = arith.constant dense<0.000000e+00> : vector<8x8x8xf32>
    %55 = tpu.matmul %54, %35, %cst_22 {dimension_numbers = #tpu.dot_dimension_numbers<[2], [1], [1], [2], [0, 0, 0, 1, 1, 2], [0], [0]>} : vector<8x8x8xbf16>, vector<8x8x8xbf16>, vector<8x8x8xf32> -> vector<8x8x8xf32>
    "tpu.trace_stop"() : () -> ()
    %56 = vector.shape_cast %55 : vector<8x8x8xf32> to vector<2x4x8x8xf32>
    %57 = tpu.transpose %56, [0, 2, 1, 3] : vector<2x4x8x8xf32> -> vector<2x8x4x8xf32>
    %58 = vector.shape_cast %57 : vector<2x8x4x8xf32> to vector<16x32xf32>
    %59 = arith.truncf %58 : vector<16x32xf32> to vector<16x32xbf16>
    %c0_23 = arith.constant 0 : index
    %c0_24 = arith.constant 0 : index
    %60 = vector.load %arg6[%c0_23, %c0_24] : memref<32x32xbf16, #tpu.memory_space<vmem>>, vector<32x32xbf16>
    %cst_25 = arith.constant dense<0.000000e+00> : vector<16x32xf32>
    %61 = tpu.matmul %59, %60, %cst_25 {dimension_numbers = #tpu.dot_dimension_numbers<[1], [0], [0], [1], [0, 0, 1, 1], [], []>} : vector<16x32xbf16>, vector<32x32xbf16>, vector<16x32xf32> -> vector<16x32xf32>
    %62 = vector.broadcast %6 : vector<1x32xf32> to vector<16x32xf32>
    %63 = arith.addf %61, %62 : vector<16x32xf32>
    %64 = arith.extf %1 : vector<16x32xbf16> to vector<16x32xf32>
    %65 = arith.addf %64, %63 : vector<16x32xf32>
    %cst_26 = arith.constant dense<0.000000e+00> : vector<16xf32>
    %66 = vector.multi_reduction <add>, %65, %cst_26 [1] : vector<16x32xf32> to vector<16xf32>
    %67 = vector.shape_cast %66 : vector<16xf32> to vector<16x1xf32>
    %cst_27 = arith.constant 3.200000e+01 : f32
    %68 = vector.broadcast %cst_27 : f32 to vector<16x1xf32>
    %69 = arith.divf %67, %68 : vector<16x1xf32>
    %70 = vector.broadcast %69 : vector<16x1xf32> to vector<16x32xf32>
    %71 = arith.subf %65, %70 : vector<16x32xf32>
    %72 = arith.mulf %71, %71 : vector<16x32xf32>
    %cst_28 = arith.constant dense<0.000000e+00> : vector<16xf32>
    %73 = vector.multi_reduction <add>, %72, %cst_28 [1] : vector<16x32xf32> to vector<16xf32>
    %74 = vector.shape_cast %73 : vector<16xf32> to vector<16x1xf32>
    %cst_29 = arith.constant 3.200000e+01 : f32
    %75 = vector.broadcast %cst_29 : f32 to vector<16x1xf32>
    %76 = arith.divf %74, %75 : vector<16x1xf32>
    %77 = vector.broadcast %69 : vector<16x1xf32> to vector<16x32xf32>
    %78 = arith.subf %65, %77 : vector<16x32xf32>
    %cst_30 = arith.constant 9.99999974E-6 : f32
    %79 = vector.broadcast %cst_30 : f32 to vector<16x1xf32>
    %80 = arith.addf %76, %79 : vector<16x1xf32>
    %81 = math.rsqrt %80 : vector<16x1xf32>
    %82 = vector.broadcast %81 : vector<16x1xf32> to vector<16x32xf32>
    %83 = arith.mulf %78, %82 : vector<16x32xf32>
    %84 = vector.broadcast %7 : vector<1x32xf32> to vector<16x32xf32>
    %85 = arith.mulf %83, %84 : vector<16x32xf32>
    %86 = vector.broadcast %8 : vector<1x32xf32> to vector<16x32xf32>
    %87 = arith.addf %85, %86 : vector<16x32xf32>
    %88 = arith.truncf %87 : vector<16x32xf32> to vector<16x32xbf16>
    %cst_31 = arith.constant 0.000000e+00 : f32
    %89 = vector.broadcast %cst_31 : f32 to vector<16x32xf32>
    %c0_32 = arith.constant 0 : index
    %c0_33 = arith.constant 0 : index
    %90 = vector.load %arg7[%c0_32, %c0_33] : memref<32x128xbf16, #tpu.memory_space<vmem>>, vector<32x128xbf16>
    %cst_34 = arith.constant dense<0.000000e+00> : vector<16x128xf32>
    %91 = tpu.matmul %88, %90, %cst_34 {dimension_numbers = #tpu.dot_dimension_numbers<[1], [0], [0], [1], [0, 0, 1, 1], [], []>} : vector<16x32xbf16>, vector<32x128xbf16>, vector<16x128xf32> -> vector<16x128xf32>
    %92 = vector.broadcast %13 : vector<1x128xf32> to vector<16x128xf32>
    %93 = arith.addf %91, %92 : vector<16x128xf32>
    %cst_35 = arith.constant 0.000000e+00 : f32
    %94 = vector.broadcast %cst_35 : f32 to vector<16x128xf32>
    %95 = arith.maximumf %93, %94 : vector<16x128xf32>
    %96 = arith.truncf %95 : vector<16x128xf32> to vector<16x128xbf16>
    %c0_36 = arith.constant 0 : index
    %c0_37 = arith.constant 0 : index
    %97 = vector.load %arg8[%c0_36, %c0_37] : memref<128x32xbf16, #tpu.memory_space<vmem>>, vector<128x32xbf16>
    %cst_38 = arith.constant dense<0.000000e+00> : vector<16x32xf32>
    %98 = tpu.matmul %96, %97, %cst_38 {dimension_numbers = #tpu.dot_dimension_numbers<[1], [0], [0], [1], [0, 0, 1, 1], [], []>} : vector<16x128xbf16>, vector<128x32xbf16>, vector<16x32xf32> -> vector<16x32xf32>
    %99 = arith.addf %89, %98 : vector<16x32xf32>
    %100 = vector.broadcast %9 : vector<1x32xf32> to vector<16x32xf32>
    %101 = arith.addf %99, %100 : vector<16x32xf32>
    %102 = arith.addf %87, %101 : vector<16x32xf32>
    %cst_39 = arith.constant dense<0.000000e+00> : vector<16xf32>
    %103 = vector.multi_reduction <add>, %102, %cst_39 [1] : vector<16x32xf32> to vector<16xf32>
    %104 = vector.shape_cast %103 : vector<16xf32> to vector<16x1xf32>
    %cst_40 = arith.constant 3.200000e+01 : f32
    %105 = vector.broadcast %cst_40 : f32 to vector<16x1xf32>
    %106 = arith.divf %104, %105 : vector<16x1xf32>
    %107 = vector.broadcast %106 : vector<16x1xf32> to vector<16x32xf32>
    %108 = arith.subf %102, %107 : vector<16x32xf32>
    %109 = arith.mulf %108, %108 : vector<16x32xf32>
    %cst_41 = arith.constant dense<0.000000e+00> : vector<16xf32>
    %110 = vector.multi_reduction <add>, %109, %cst_41 [1] : vector<16x32xf32> to vector<16xf32>
    %111 = vector.shape_cast %110 : vector<16xf32> to vector<16x1xf32>
    %cst_42 = arith.constant 3.200000e+01 : f32
    %112 = vector.broadcast %cst_42 : f32 to vector<16x1xf32>
    %113 = arith.divf %111, %112 : vector<16x1xf32>
    %114 = vector.broadcast %106 : vector<16x1xf32> to vector<16x32xf32>
    %115 = arith.subf %102, %114 : vector<16x32xf32>
    %cst_43 = arith.constant 9.99999974E-6 : f32
    %116 = vector.broadcast %cst_43 : f32 to vector<16x1xf32>
    %117 = arith.addf %113, %116 : vector<16x1xf32>
    %118 = math.rsqrt %117 : vector<16x1xf32>
    %119 = vector.broadcast %118 : vector<16x1xf32> to vector<16x32xf32>
    %120 = arith.mulf %115, %119 : vector<16x32xf32>
    %121 = vector.broadcast %10 : vector<1x32xf32> to vector<16x32xf32>
    %122 = arith.mulf %120, %121 : vector<16x32xf32>
    %123 = vector.broadcast %11 : vector<1x32xf32> to vector<16x32xf32>
    %124 = arith.addf %122, %123 : vector<16x32xf32>
    %125 = vector.shape_cast %124 : vector<16x32xf32> to vector<2x8x32xf32>
    %c0_44 = arith.constant 0 : index
    %c0_45 = arith.constant 0 : index
    %c0_46 = arith.constant 0 : index
    %126 = vector.load %arg12[%c0_44, %c0_45, %c0_46] : memref<2x8x32xf32, #tpu.memory_space<vmem>>, vector<2x8x32xf32>
    tpu.vector_store %arg12[%c0_44, %c0_45, %c0_46], %125 {strides = array<i32>} : memref<2x8x32xf32, #tpu.memory_space<vmem>>, vector<2x8x32xf32>,
    %127 = vector.shape_cast %53 : vector<8x8x8xf32> to vector<2x4x8x8xf32>
    %cst_47 = arith.constant dense<0.000000e+00> : vector<2x8x8xf32>
    %128 = vector.multi_reduction <add>, %127, %cst_47 [1] : vector<2x4x8x8xf32> to vector<2x8x8xf32>
    %cst_48 = arith.constant 4.000000e+00 : f32
    %129 = vector.broadcast %cst_48 : f32 to vector<2x8x8xf32>
    %130 = arith.divf %128, %129 : vector<2x8x8xf32>
    %c0_49 = arith.constant 0 : index
    %c0_50 = arith.constant 0 : index
    %c0_51 = arith.constant 0 : index
    %131 = vector.load %arg13[%c0_49, %c0_50, %c0_51] : memref<2x8x8xf32, #tpu.memory_space<vmem>>, vector<2x8x8xf32>
    tpu.vector_store %arg13[%c0_49, %c0_50, %c0_51], %130 {strides = array<i32>} : memref<2x8x8xf32, #tpu.memory_space<vmem>>, vector<2x8x8xf32>,
    return
  }
  func.func @transform_0(%arg0: i32) -> (i32, i32, i32) {
    %c0_i32 = arith.constant 0 : i32
    %c0_i32_0 = arith.constant 0 : i32
    %c0_i32_1 = arith.constant 0 : i32
    return %arg0, %c0_i32, %c0_i32_0 : i32, i32, i32
  }
  func.func @transform_1(%arg0: i32) -> (i32, i32, i32) {
    %c0_i32 = arith.constant 0 : i32
    %c0_i32_0 = arith.constant 0 : i32
    %c0_i32_1 = arith.constant 0 : i32
    return %arg0, %c0_i32, %c0_i32_0 : i32, i32, i32
  }
  func.func @transform_2(%arg0: i32) -> (i32, i32, i32) {
    %c0_i32 = arith.constant 0 : i32
    %c0_i32_0 = arith.constant 0 : i32
    %c0_i32_1 = arith.constant 0 : i32
    return %arg0, %c0_i32, %c0_i32_0 : i32, i32, i32
  }
  func.func @transform_3(%arg0: i32) -> (i32, i32) {
    %c0_i32 = arith.constant 0 : i32
    %c0_i32_0 = arith.constant 0 : i32
    %c0_i32_1 = arith.constant 0 : i32
    return %c0_i32, %c0_i32_0 : i32, i32
  }
  func.func @transform_4(%arg0: i32) -> (i32, i32) {
    %c0_i32 = arith.constant 0 : i32
    %c0_i32_0 = arith.constant 0 : i32
    %c0_i32_1 = arith.constant 0 : i32
    return %c0_i32, %c0_i32_0 : i32, i32
  }
  func.func @transform_5(%arg0: i32) -> (i32, i32) {
    %c0_i32 = arith.constant 0 : i32
    %c0_i32_0 = arith.constant 0 : i32
    %c0_i32_1 = arith.constant 0 : i32
    return %c0_i32, %c0_i32_0 : i32, i32
  }
  func.func @transform_6(%arg0: i32) -> (i32, i32) {
    %c0_i32 = arith.constant 0 : i32
    %c0_i32_0 = arith.constant 0 : i32
    %c0_i32_1 = arith.constant 0 : i32
    return %c0_i32, %c0_i32_0 : i32, i32
  }
  func.func @transform_7(%arg0: i32) -> (i32, i32) {
    %c0_i32 = arith.constant 0 : i32
    %c0_i32_0 = arith.constant 0 : i32
    %c0_i32_1 = arith.constant 0 : i32
    return %c0_i32, %c0_i32_0 : i32, i32
  }
  func.func @transform_8(%arg0: i32) -> (i32, i32) {
    %c0_i32 = arith.constant 0 : i32
    %c0_i32_0 = arith.constant 0 : i32
    %c0_i32_1 = arith.constant 0 : i32
    return %c0_i32, %c0_i32_0 : i32, i32
  }
  func.func @transform_9(%arg0: i32) -> (i32, i32) {
    %c0_i32 = arith.constant 0 : i32
    %c0_i32_0 = arith.constant 0 : i32
    %c0_i32_1 = arith.constant 0 : i32
    return %c0_i32, %c0_i32_0 : i32, i32
  }
  func.func @transform_10(%arg0: i32) -> (i32, i32) {
    %c0_i32 = arith.constant 0 : i32
    %c0_i32_0 = arith.constant 0 : i32
    %c0_i32_1 = arith.constant 0 : i32
    return %c0_i32, %c0_i32_0 : i32, i32
  }
  func.func @transform_11(%arg0: i32) -> (i32, i32, i32) {
    %c0_i32 = arith.constant 0 : i32
    %c0_i32_0 = arith.constant 0 : i32
    %c0_i32_1 = arith.constant 0 : i32
    return %arg0, %c0_i32, %c0_i32_0 : i32, i32, i32
  }
  func.func @transform_12(%arg0: i32) -> (i32, i32, i32) {
    %c0_i32 = arith.constant 0 : i32
    %c0_i32_0 = arith.constant 0 : i32
    %c0_i32_1 = arith.constant 0 : i32
    return %arg0, %c0_i32, %c0_i32_0 : i32, i32, i32
  }
}

module attributes {stable_mosaic.version = 11 : i64} {
  func.func @cmt_block_kernel(%arg0: i32, %arg1: memref<2x8x32xbf16, #tpu.memory_space<vmem>>, %arg2: memref<2x8x32xbf16, #tpu.memory_space<vmem>>, %arg3: memref<2x1x8xf32, #tpu.memory_space<vmem>>, %arg4: memref<32x32xbf16, #tpu.memory_space<vmem>>, %arg5: memref<32x64xbf16, #tpu.memory_space<vmem>>, %arg6: memref<32x32xbf16, #tpu.memory_space<vmem>>, %arg7: memref<32x128xbf16, #tpu.memory_space<vmem>>, %arg8: memref<128x32xbf16, #tpu.memory_space<vmem>>, %arg9: memref<8x32xf32, #tpu.memory_space<vmem>>, %arg10: memref<1x64xf32, #tpu.memory_space<vmem>>, %arg11: memref<1x128xf32, #tpu.memory_space<vmem>>, %arg12: memref<2x8x32xf32, #tpu.memory_space<vmem>>, %arg13: memref<2x8x8xf32, #tpu.memory_space<vmem>>) attributes {dimension_semantics = [#tpu.dimension_semantics<parallel>], iteration_bounds = array<i64: 1>, scalar_prefetch = 0 : i64, scratch_operands = 0 : i64, tpu.core_type = #tpu.core_type<tc>, window_params = [{transform_indices = @transform_0, window_bounds = array<i64: 2, 8, 32>}, {transform_indices = @transform_1, window_bounds = array<i64: 2, 8, 32>}, {transform_indices = @transform_2, window_bounds = array<i64: 2, 1, 8>}, {pipeline_mode = #tpu.pipeline_mode<synchronous>, transform_indices = @transform_3, window_bounds = array<i64: 32, 32>}, {pipeline_mode = #tpu.pipeline_mode<synchronous>, transform_indices = @transform_4, window_bounds = array<i64: 32, 64>}, {pipeline_mode = #tpu.pipeline_mode<synchronous>, transform_indices = @transform_5, window_bounds = array<i64: 32, 32>}, {pipeline_mode = #tpu.pipeline_mode<synchronous>, transform_indices = @transform_6, window_bounds = array<i64: 32, 128>}, {pipeline_mode = #tpu.pipeline_mode<synchronous>, transform_indices = @transform_7, window_bounds = array<i64: 128, 32>}, {pipeline_mode = #tpu.pipeline_mode<synchronous>, transform_indices = @transform_8, window_bounds = array<i64: 8, 32>}, {pipeline_mode = #tpu.pipeline_mode<synchronous>, transform_indices = @transform_9, window_bounds = array<i64: 1, 64>}, {pipeline_mode = #tpu.pipeline_mode<synchronous>, transform_indices = @transform_10, window_bounds = array<i64: 1, 128>}, {transform_indices = @transform_11, window_bounds = array<i64: 2, 8, 32>}, {transform_indices = @transform_12, window_bounds = array<i64: 2, 8, 8>}]} {
    %c0 = arith.constant 0 : index
    %c0_0 = arith.constant 0 : index
    %c0_1 = arith.constant 0 : index
    %0 = vector.load %arg1[%c0, %c0_0, %c0_1] : memref<2x8x32xbf16, #tpu.memory_space<vmem>>, vector<2x8x32xbf16>
    %1 = vector.shape_cast %0 : vector<2x8x32xbf16> to vector<16x32xbf16>
    %c0_2 = arith.constant 0 : index
    %c0_3 = arith.constant 0 : index
    %c0_4 = arith.constant 0 : index
    %2 = vector.load %arg2[%c0_2, %c0_3, %c0_4] : memref<2x8x32xbf16, #tpu.memory_space<vmem>>, vector<2x8x32xbf16>
    %3 = vector.shape_cast %2 : vector<2x8x32xbf16> to vector<16x32xbf16>
    %c0_5 = arith.constant 0 : index
    %c0_6 = arith.constant 0 : index
    %4 = vector.load %arg9[%c0_5, %c0_6] : memref<8x32xf32, #tpu.memory_space<vmem>>, vector<8x32xf32>
    %5 = vector.extract_strided_slice %4 {offsets = [0, 0], sizes = [1, 32], strides = [1, 1]} : vector<8x32xf32> to vector<1x32xf32>
    %6 = vector.extract_strided_slice %4 {offsets = [1, 0], sizes = [1, 32], strides = [1, 1]} : vector<8x32xf32> to vector<1x32xf32>
    %7 = vector.extract_strided_slice %4 {offsets = [2, 0], sizes = [1, 32], strides = [1, 1]} : vector<8x32xf32> to vector<1x32xf32>
    %8 = vector.extract_strided_slice %4 {offsets = [3, 0], sizes = [1, 32], strides = [1, 1]} : vector<8x32xf32> to vector<1x32xf32>
    %9 = vector.extract_strided_slice %4 {offsets = [4, 0], sizes = [1, 32], strides = [1, 1]} : vector<8x32xf32> to vector<1x32xf32>
    %10 = vector.extract_strided_slice %4 {offsets = [5, 0], sizes = [1, 32], strides = [1, 1]} : vector<8x32xf32> to vector<1x32xf32>
    %11 = vector.extract_strided_slice %4 {offsets = [6, 0], sizes = [1, 32], strides = [1, 1]} : vector<8x32xf32> to vector<1x32xf32>
    %c0_7 = arith.constant 0 : index
    %c0_8 = arith.constant 0 : index
    %12 = vector.load %arg10[%c0_7, %c0_8] : memref<1x64xf32, #tpu.memory_space<vmem>>, vector<1x64xf32>
    %c0_9 = arith.constant 0 : index
    %c0_10 = arith.constant 0 : index
    %13 = vector.load %arg11[%c0_9, %c0_10] : memref<1x128xf32, #tpu.memory_space<vmem>>, vector<1x128xf32>
    %c0_11 = arith.constant 0 : index
    %c0_12 = arith.constant 0 : index
    %14 = vector.load %arg4[%c0_11, %c0_12] : memref<32x32xbf16, #tpu.memory_space<vmem>>, vector<32x32xbf16>
    %cst = arith.constant dense<0.000000e+00> : vector<16x32xf32>
    %15 = tpu.matmul %1, %14, %cst {dimension_numbers = #tpu.dot_dimension_numbers<[1], [0], [0], [1], [0, 0, 1, 1], [], []>} : vector<16x32xbf16>, vector<32x32xbf16>, vector<16x32xf32> -> vector<16x32xf32>
    %16 = vector.broadcast %5 : vector<1x32xf32> to vector<16x32xf32>
    %17 = arith.addf %15, %16 : vector<16x32xf32>
    %c0_13 = arith.constant 0 : index
    %c0_14 = arith.constant 0 : index
    %18 = vector.load %arg5[%c0_13, %c0_14] : memref<32x64xbf16, #tpu.memory_space<vmem>>, vector<32x64xbf16>
    %cst_15 = arith.constant dense<0.000000e+00> : vector<16x64xf32>
    %19 = tpu.matmul %3, %18, %cst_15 {dimension_numbers = #tpu.dot_dimension_numbers<[1], [0], [0], [1], [0, 0, 1, 1], [], []>} : vector<16x32xbf16>, vector<32x64xbf16>, vector<16x64xf32> -> vector<16x64xf32>
    %20 = vector.broadcast %12 : vector<1x64xf32> to vector<16x64xf32>
    %21 = arith.addf %19, %20 : vector<16x64xf32>
    %22 = vector.extract_strided_slice %21 {offsets = [0, 0], sizes = [16, 32], strides = [1, 1]} : vector<16x64xf32> to vector<16x32xf32>
    %23 = vector.extract_strided_slice %21 {offsets = [0, 32], sizes = [16, 32], strides = [1, 1]} : vector<16x64xf32> to vector<16x32xf32>
    %24 = arith.truncf %17 : vector<16x32xf32> to vector<16x32xbf16>
    %25 = vector.extract_strided_slice %24 {offsets = [0, 0], sizes = [8, 8], strides = [1, 1]} : vector<16x32xbf16> to vector<8x8xbf16>
    %26 = vector.extract_strided_slice %24 {offsets = [0, 8], sizes = [8, 8], strides = [1, 1]} : vector<16x32xbf16> to vector<8x8xbf16>
    %27 = vector.extract_strided_slice %24 {offsets = [0, 16], sizes = [8, 8], strides = [1, 1]} : vector<16x32xbf16> to vector<8x8xbf16>
    %28 = vector.extract_strided_slice %24 {offsets = [0, 24], sizes = [8, 8], strides = [1, 1]} : vector<16x32xbf16> to vector<8x8xbf16>
    %29 = vector.extract_strided_slice %24 {offsets = [8, 0], sizes = [8, 8], strides = [1, 1]} : vector<16x32xbf16> to vector<8x8xbf16>
    %30 = vector.extract_strided_slice %24 {offsets = [8, 8], sizes = [8, 8], strides = [1, 1]} : vector<16x32xbf16> to vector<8x8xbf16>
    %31 = vector.extract_strided_slice %24 {offsets = [8, 16], sizes = [8, 8], strides = [1, 1]} : vector<16x32xbf16> to vector<8x8xbf16>
    %32 = vector.extract_strided_slice %24 {offsets = [8, 24], sizes = [8, 8], strides = [1, 1]} : vector<16x32xbf16> to vector<8x8xbf16>
    %33 = vector.shape_cast %25 : vector<8x8xbf16> to vector<1x8x8xbf16>
    %34 = vector.shape_cast %26 : vector<8x8xbf16> to vector<1x8x8xbf16>
    %35 = vector.shape_cast %27 : vector<8x8xbf16> to vector<1x8x8xbf16>
    %36 = vector.shape_cast %28 : vector<8x8xbf16> to vector<1x8x8xbf16>
    %37 = vector.shape_cast %29 : vector<8x8xbf16> to vector<1x8x8xbf16>
    %38 = vector.shape_cast %30 : vector<8x8xbf16> to vector<1x8x8xbf16>
    %39 = vector.shape_cast %31 : vector<8x8xbf16> to vector<1x8x8xbf16>
    %40 = vector.shape_cast %32 : vector<8x8xbf16> to vector<1x8x8xbf16>
    %41 = tpu.concatenate %33, %34, %35, %36, %37, %38, %39, %40 in 0 : vector<1x8x8xbf16>, vector<1x8x8xbf16>, vector<1x8x8xbf16>, vector<1x8x8xbf16>, vector<1x8x8xbf16>, vector<1x8x8xbf16>, vector<1x8x8xbf16>, vector<1x8x8xbf16> -> vector<8x8x8xbf16>
    %42 = arith.truncf %22 : vector<16x32xf32> to vector<16x32xbf16>
    %43 = vector.extract_strided_slice %42 {offsets = [0, 0], sizes = [8, 8], strides = [1, 1]} : vector<16x32xbf16> to vector<8x8xbf16>
    %44 = vector.extract_strided_slice %42 {offsets = [0, 8], sizes = [8, 8], strides = [1, 1]} : vector<16x32xbf16> to vector<8x8xbf16>
    %45 = vector.extract_strided_slice %42 {offsets = [0, 16], sizes = [8, 8], strides = [1, 1]} : vector<16x32xbf16> to vector<8x8xbf16>
    %46 = vector.extract_strided_slice %42 {offsets = [0, 24], sizes = [8, 8], strides = [1, 1]} : vector<16x32xbf16> to vector<8x8xbf16>
    %47 = vector.extract_strided_slice %42 {offsets = [8, 0], sizes = [8, 8], strides = [1, 1]} : vector<16x32xbf16> to vector<8x8xbf16>
    %48 = vector.extract_strided_slice %42 {offsets = [8, 8], sizes = [8, 8], strides = [1, 1]} : vector<16x32xbf16> to vector<8x8xbf16>
    %49 = vector.extract_strided_slice %42 {offsets = [8, 16], sizes = [8, 8], strides = [1, 1]} : vector<16x32xbf16> to vector<8x8xbf16>
    %50 = vector.extract_strided_slice %42 {offsets = [8, 24], sizes = [8, 8], strides = [1, 1]} : vector<16x32xbf16> to vector<8x8xbf16>
    %51 = vector.shape_cast %43 : vector<8x8xbf16> to vector<1x8x8xbf16>
    %52 = vector.shape_cast %44 : vector<8x8xbf16> to vector<1x8x8xbf16>
    %53 = vector.shape_cast %45 : vector<8x8xbf16> to vector<1x8x8xbf16>
    %54 = vector.shape_cast %46 : vector<8x8xbf16> to vector<1x8x8xbf16>
    %55 = vector.shape_cast %47 : vector<8x8xbf16> to vector<1x8x8xbf16>
    %56 = vector.shape_cast %48 : vector<8x8xbf16> to vector<1x8x8xbf16>
    %57 = vector.shape_cast %49 : vector<8x8xbf16> to vector<1x8x8xbf16>
    %58 = vector.shape_cast %50 : vector<8x8xbf16> to vector<1x8x8xbf16>
    %59 = tpu.concatenate %51, %52, %53, %54, %55, %56, %57, %58 in 0 : vector<1x8x8xbf16>, vector<1x8x8xbf16>, vector<1x8x8xbf16>, vector<1x8x8xbf16>, vector<1x8x8xbf16>, vector<1x8x8xbf16>, vector<1x8x8xbf16>, vector<1x8x8xbf16> -> vector<8x8x8xbf16>
    %60 = arith.truncf %23 : vector<16x32xf32> to vector<16x32xbf16>
    %61 = vector.extract_strided_slice %60 {offsets = [0, 0], sizes = [8, 8], strides = [1, 1]} : vector<16x32xbf16> to vector<8x8xbf16>
    %62 = vector.extract_strided_slice %60 {offsets = [0, 8], sizes = [8, 8], strides = [1, 1]} : vector<16x32xbf16> to vector<8x8xbf16>
    %63 = vector.extract_strided_slice %60 {offsets = [0, 16], sizes = [8, 8], strides = [1, 1]} : vector<16x32xbf16> to vector<8x8xbf16>
    %64 = vector.extract_strided_slice %60 {offsets = [0, 24], sizes = [8, 8], strides = [1, 1]} : vector<16x32xbf16> to vector<8x8xbf16>
    %65 = vector.extract_strided_slice %60 {offsets = [8, 0], sizes = [8, 8], strides = [1, 1]} : vector<16x32xbf16> to vector<8x8xbf16>
    %66 = vector.extract_strided_slice %60 {offsets = [8, 8], sizes = [8, 8], strides = [1, 1]} : vector<16x32xbf16> to vector<8x8xbf16>
    %67 = vector.extract_strided_slice %60 {offsets = [8, 16], sizes = [8, 8], strides = [1, 1]} : vector<16x32xbf16> to vector<8x8xbf16>
    %68 = vector.extract_strided_slice %60 {offsets = [8, 24], sizes = [8, 8], strides = [1, 1]} : vector<16x32xbf16> to vector<8x8xbf16>
    %69 = vector.shape_cast %61 : vector<8x8xbf16> to vector<1x8x8xbf16>
    %70 = vector.shape_cast %62 : vector<8x8xbf16> to vector<1x8x8xbf16>
    %71 = vector.shape_cast %63 : vector<8x8xbf16> to vector<1x8x8xbf16>
    %72 = vector.shape_cast %64 : vector<8x8xbf16> to vector<1x8x8xbf16>
    %73 = vector.shape_cast %65 : vector<8x8xbf16> to vector<1x8x8xbf16>
    %74 = vector.shape_cast %66 : vector<8x8xbf16> to vector<1x8x8xbf16>
    %75 = vector.shape_cast %67 : vector<8x8xbf16> to vector<1x8x8xbf16>
    %76 = vector.shape_cast %68 : vector<8x8xbf16> to vector<1x8x8xbf16>
    %77 = tpu.concatenate %69, %70, %71, %72, %73, %74, %75, %76 in 0 : vector<1x8x8xbf16>, vector<1x8x8xbf16>, vector<1x8x8xbf16>, vector<1x8x8xbf16>, vector<1x8x8xbf16>, vector<1x8x8xbf16>, vector<1x8x8xbf16>, vector<1x8x8xbf16> -> vector<8x8x8xbf16>
    "tpu.trace_start"() <{level = 10 : i32, message = "gqd,gkd->gqk"}> : () -> ()
    %cst_16 = arith.constant dense<0.000000e+00> : vector<8x8x8xf32>
    %78 = tpu.matmul %41, %59, %cst_16 {dimension_numbers = #tpu.dot_dimension_numbers<[2], [2], [1], [1], [0, 0, 0, 1, 1, 1], [0], [0]>} : vector<8x8x8xbf16>, vector<8x8x8xbf16>, vector<8x8x8xf32> -> vector<8x8x8xf32>
    "tpu.trace_stop"() : () -> ()
    %c0_17 = arith.constant 0 : index
    %c0_18 = arith.constant 0 : index
    %c0_19 = arith.constant 0 : index
    %79 = vector.load %arg3[%c0_17, %c0_18, %c0_19] : memref<2x1x8xf32, #tpu.memory_space<vmem>>, vector<2x1x8xf32>
    %80 = vector.shape_cast %79 : vector<2x1x8xf32> to vector<2x1x1x8xf32>
    %81 = vector.shape_cast %80 : vector<2x1x1x8xf32> to vector<2x1x1x8xf32>
    %82 = vector.broadcast %81 : vector<2x1x1x8xf32> to vector<2x4x1x8xf32>
    %83 = vector.shape_cast %82 : vector<2x4x1x8xf32> to vector<8x1x8xf32>
    %84 = vector.broadcast %83 : vector<8x1x8xf32> to vector<8x8x8xf32>
    %85 = arith.addf %78, %84 : vector<8x8x8xf32>
    %cst_20 = arith.constant dense<0xFF800000> : vector<8x8xf32>
    %86 = vector.multi_reduction <maximumf>, %85, %cst_20 [2] : vector<8x8x8xf32> to vector<8x8xf32>
    %87 = vector.shape_cast %86 : vector<8x8xf32> to vector<8x8x1xf32>
    %88 = vector.broadcast %87 : vector<8x8x1xf32> to vector<8x8x8xf32>
    %89 = arith.subf %85, %88 : vector<8x8x8xf32>
    %90 = math.exp %89 : vector<8x8x8xf32>
    %cst_21 = arith.constant dense<0.000000e+00> : vector<8x8xf32>
    %91 = vector.multi_reduction <add>, %90, %cst_21 [2] : vector<8x8x8xf32> to vector<8x8xf32>
    %92 = vector.shape_cast %91 : vector<8x8xf32> to vector<8x8x1xf32>
    %93 = tpu.reciprocal %92 : vector<8x8x1xf32> -> vector<8x8x1xf32>
    %94 = vector.broadcast %93 : vector<8x8x1xf32> to vector<8x8x8xf32>
    %95 = arith.mulf %90, %94 : vector<8x8x8xf32>
    %96 = arith.truncf %95 : vector<8x8x8xf32> to vector<8x8x8xbf16>
    "tpu.trace_start"() <{level = 10 : i32, message = "gqk,gkd->gqd"}> : () -> ()
    %cst_22 = arith.constant dense<0.000000e+00> : vector<8x8x8xf32>
    %97 = tpu.matmul %96, %77, %cst_22 {dimension_numbers = #tpu.dot_dimension_numbers<[2], [1], [1], [2], [0, 0, 0, 1, 1, 2], [0], [0]>} : vector<8x8x8xbf16>, vector<8x8x8xbf16>, vector<8x8x8xf32> -> vector<8x8x8xf32>
    "tpu.trace_stop"() : () -> ()
    %98 = vector.extract_strided_slice %97 {offsets = [0, 0, 0], sizes = [1, 8, 8], strides = [1, 1, 1]} : vector<8x8x8xf32> to vector<1x8x8xf32>
    %99 = vector.shape_cast %98 : vector<1x8x8xf32> to vector<8x8xf32>
    %100 = vector.extract_strided_slice %97 {offsets = [1, 0, 0], sizes = [1, 8, 8], strides = [1, 1, 1]} : vector<8x8x8xf32> to vector<1x8x8xf32>
    %101 = vector.shape_cast %100 : vector<1x8x8xf32> to vector<8x8xf32>
    %102 = vector.extract_strided_slice %97 {offsets = [2, 0, 0], sizes = [1, 8, 8], strides = [1, 1, 1]} : vector<8x8x8xf32> to vector<1x8x8xf32>
    %103 = vector.shape_cast %102 : vector<1x8x8xf32> to vector<8x8xf32>
    %104 = vector.extract_strided_slice %97 {offsets = [3, 0, 0], sizes = [1, 8, 8], strides = [1, 1, 1]} : vector<8x8x8xf32> to vector<1x8x8xf32>
    %105 = vector.shape_cast %104 : vector<1x8x8xf32> to vector<8x8xf32>
    %106 = tpu.concatenate %99, %101, %103, %105 in 1 : vector<8x8xf32>, vector<8x8xf32>, vector<8x8xf32>, vector<8x8xf32> -> vector<8x32xf32>
    %107 = vector.extract_strided_slice %97 {offsets = [4, 0, 0], sizes = [1, 8, 8], strides = [1, 1, 1]} : vector<8x8x8xf32> to vector<1x8x8xf32>
    %108 = vector.shape_cast %107 : vector<1x8x8xf32> to vector<8x8xf32>
    %109 = vector.extract_strided_slice %97 {offsets = [5, 0, 0], sizes = [1, 8, 8], strides = [1, 1, 1]} : vector<8x8x8xf32> to vector<1x8x8xf32>
    %110 = vector.shape_cast %109 : vector<1x8x8xf32> to vector<8x8xf32>
    %111 = vector.extract_strided_slice %97 {offsets = [6, 0, 0], sizes = [1, 8, 8], strides = [1, 1, 1]} : vector<8x8x8xf32> to vector<1x8x8xf32>
    %112 = vector.shape_cast %111 : vector<1x8x8xf32> to vector<8x8xf32>
    %113 = vector.extract_strided_slice %97 {offsets = [7, 0, 0], sizes = [1, 8, 8], strides = [1, 1, 1]} : vector<8x8x8xf32> to vector<1x8x8xf32>
    %114 = vector.shape_cast %113 : vector<1x8x8xf32> to vector<8x8xf32>
    %115 = tpu.concatenate %108, %110, %112, %114 in 1 : vector<8x8xf32>, vector<8x8xf32>, vector<8x8xf32>, vector<8x8xf32> -> vector<8x32xf32>
    %116 = tpu.concatenate %106, %115 in 0 : vector<8x32xf32>, vector<8x32xf32> -> vector<16x32xf32>
    %117 = arith.truncf %116 : vector<16x32xf32> to vector<16x32xbf16>
    %c0_23 = arith.constant 0 : index
    %c0_24 = arith.constant 0 : index
    %118 = vector.load %arg6[%c0_23, %c0_24] : memref<32x32xbf16, #tpu.memory_space<vmem>>, vector<32x32xbf16>
    %cst_25 = arith.constant dense<0.000000e+00> : vector<16x32xf32>
    %119 = tpu.matmul %117, %118, %cst_25 {dimension_numbers = #tpu.dot_dimension_numbers<[1], [0], [0], [1], [0, 0, 1, 1], [], []>} : vector<16x32xbf16>, vector<32x32xbf16>, vector<16x32xf32> -> vector<16x32xf32>
    %120 = vector.broadcast %6 : vector<1x32xf32> to vector<16x32xf32>
    %121 = arith.addf %119, %120 : vector<16x32xf32>
    %122 = arith.extf %1 : vector<16x32xbf16> to vector<16x32xf32>
    %123 = arith.addf %122, %121 : vector<16x32xf32>
    %cst_26 = arith.constant dense<0.000000e+00> : vector<16xf32>
    %124 = vector.multi_reduction <add>, %123, %cst_26 [1] : vector<16x32xf32> to vector<16xf32>
    %125 = vector.shape_cast %124 : vector<16xf32> to vector<16x1xf32>
    %cst_27 = arith.constant 3.200000e+01 : f32
    %126 = vector.broadcast %cst_27 : f32 to vector<16x1xf32>
    %127 = arith.divf %125, %126 : vector<16x1xf32>
    %128 = vector.broadcast %127 : vector<16x1xf32> to vector<16x32xf32>
    %129 = arith.subf %123, %128 : vector<16x32xf32>
    %130 = arith.mulf %129, %129 : vector<16x32xf32>
    %cst_28 = arith.constant dense<0.000000e+00> : vector<16xf32>
    %131 = vector.multi_reduction <add>, %130, %cst_28 [1] : vector<16x32xf32> to vector<16xf32>
    %132 = vector.shape_cast %131 : vector<16xf32> to vector<16x1xf32>
    %cst_29 = arith.constant 3.200000e+01 : f32
    %133 = vector.broadcast %cst_29 : f32 to vector<16x1xf32>
    %134 = arith.divf %132, %133 : vector<16x1xf32>
    %135 = vector.broadcast %127 : vector<16x1xf32> to vector<16x32xf32>
    %136 = arith.subf %123, %135 : vector<16x32xf32>
    %cst_30 = arith.constant 9.99999974E-6 : f32
    %137 = vector.broadcast %cst_30 : f32 to vector<16x1xf32>
    %138 = arith.addf %134, %137 : vector<16x1xf32>
    %139 = math.rsqrt %138 : vector<16x1xf32>
    %140 = vector.broadcast %139 : vector<16x1xf32> to vector<16x32xf32>
    %141 = arith.mulf %136, %140 : vector<16x32xf32>
    %142 = vector.broadcast %7 : vector<1x32xf32> to vector<16x32xf32>
    %143 = arith.mulf %141, %142 : vector<16x32xf32>
    %144 = vector.broadcast %8 : vector<1x32xf32> to vector<16x32xf32>
    %145 = arith.addf %143, %144 : vector<16x32xf32>
    %146 = arith.truncf %145 : vector<16x32xf32> to vector<16x32xbf16>
    %cst_31 = arith.constant 0.000000e+00 : f32
    %147 = vector.broadcast %cst_31 : f32 to vector<16x32xf32>
    %c0_32 = arith.constant 0 : index
    %c0_33 = arith.constant 0 : index
    %148 = vector.load %arg7[%c0_32, %c0_33] : memref<32x128xbf16, #tpu.memory_space<vmem>>, vector<32x128xbf16>
    %cst_34 = arith.constant dense<0.000000e+00> : vector<16x128xf32>
    %149 = tpu.matmul %146, %148, %cst_34 {dimension_numbers = #tpu.dot_dimension_numbers<[1], [0], [0], [1], [0, 0, 1, 1], [], []>} : vector<16x32xbf16>, vector<32x128xbf16>, vector<16x128xf32> -> vector<16x128xf32>
    %150 = vector.broadcast %13 : vector<1x128xf32> to vector<16x128xf32>
    %151 = arith.addf %149, %150 : vector<16x128xf32>
    %cst_35 = arith.constant 0.000000e+00 : f32
    %152 = vector.broadcast %cst_35 : f32 to vector<16x128xf32>
    %153 = arith.maximumf %151, %152 : vector<16x128xf32>
    %154 = arith.truncf %153 : vector<16x128xf32> to vector<16x128xbf16>
    %c0_36 = arith.constant 0 : index
    %c0_37 = arith.constant 0 : index
    %155 = vector.load %arg8[%c0_36, %c0_37] : memref<128x32xbf16, #tpu.memory_space<vmem>>, vector<128x32xbf16>
    %cst_38 = arith.constant dense<0.000000e+00> : vector<16x32xf32>
    %156 = tpu.matmul %154, %155, %cst_38 {dimension_numbers = #tpu.dot_dimension_numbers<[1], [0], [0], [1], [0, 0, 1, 1], [], []>} : vector<16x128xbf16>, vector<128x32xbf16>, vector<16x32xf32> -> vector<16x32xf32>
    %157 = arith.addf %147, %156 : vector<16x32xf32>
    %158 = vector.broadcast %9 : vector<1x32xf32> to vector<16x32xf32>
    %159 = arith.addf %157, %158 : vector<16x32xf32>
    %160 = arith.addf %145, %159 : vector<16x32xf32>
    %cst_39 = arith.constant dense<0.000000e+00> : vector<16xf32>
    %161 = vector.multi_reduction <add>, %160, %cst_39 [1] : vector<16x32xf32> to vector<16xf32>
    %162 = vector.shape_cast %161 : vector<16xf32> to vector<16x1xf32>
    %cst_40 = arith.constant 3.200000e+01 : f32
    %163 = vector.broadcast %cst_40 : f32 to vector<16x1xf32>
    %164 = arith.divf %162, %163 : vector<16x1xf32>
    %165 = vector.broadcast %164 : vector<16x1xf32> to vector<16x32xf32>
    %166 = arith.subf %160, %165 : vector<16x32xf32>
    %167 = arith.mulf %166, %166 : vector<16x32xf32>
    %cst_41 = arith.constant dense<0.000000e+00> : vector<16xf32>
    %168 = vector.multi_reduction <add>, %167, %cst_41 [1] : vector<16x32xf32> to vector<16xf32>
    %169 = vector.shape_cast %168 : vector<16xf32> to vector<16x1xf32>
    %cst_42 = arith.constant 3.200000e+01 : f32
    %170 = vector.broadcast %cst_42 : f32 to vector<16x1xf32>
    %171 = arith.divf %169, %170 : vector<16x1xf32>
    %172 = vector.broadcast %164 : vector<16x1xf32> to vector<16x32xf32>
    %173 = arith.subf %160, %172 : vector<16x32xf32>
    %cst_43 = arith.constant 9.99999974E-6 : f32
    %174 = vector.broadcast %cst_43 : f32 to vector<16x1xf32>
    %175 = arith.addf %171, %174 : vector<16x1xf32>
    %176 = math.rsqrt %175 : vector<16x1xf32>
    %177 = vector.broadcast %176 : vector<16x1xf32> to vector<16x32xf32>
    %178 = arith.mulf %173, %177 : vector<16x32xf32>
    %179 = vector.broadcast %10 : vector<1x32xf32> to vector<16x32xf32>
    %180 = arith.mulf %178, %179 : vector<16x32xf32>
    %181 = vector.broadcast %11 : vector<1x32xf32> to vector<16x32xf32>
    %182 = arith.addf %180, %181 : vector<16x32xf32>
    %183 = vector.shape_cast %182 : vector<16x32xf32> to vector<2x8x32xf32>
    %c0_44 = arith.constant 0 : index
    %c0_45 = arith.constant 0 : index
    %c0_46 = arith.constant 0 : index
    %184 = vector.load %arg12[%c0_44, %c0_45, %c0_46] : memref<2x8x32xf32, #tpu.memory_space<vmem>>, vector<2x8x32xf32>
    tpu.vector_store %arg12[%c0_44, %c0_45, %c0_46], %183 {strides = array<i32>} : memref<2x8x32xf32, #tpu.memory_space<vmem>>, vector<2x8x32xf32>,
    %185 = vector.shape_cast %95 : vector<8x8x8xf32> to vector<2x4x8x8xf32>
    %cst_47 = arith.constant dense<0.000000e+00> : vector<2x8x8xf32>
    %186 = vector.multi_reduction <add>, %185, %cst_47 [1] : vector<2x4x8x8xf32> to vector<2x8x8xf32>
    %cst_48 = arith.constant 4.000000e+00 : f32
    %187 = vector.broadcast %cst_48 : f32 to vector<2x8x8xf32>
    %188 = arith.divf %186, %187 : vector<2x8x8xf32>
    %c0_49 = arith.constant 0 : index
    %c0_50 = arith.constant 0 : index
    %c0_51 = arith.constant 0 : index
    %189 = vector.load %arg13[%c0_49, %c0_50, %c0_51] : memref<2x8x8xf32, #tpu.memory_space<vmem>>, vector<2x8x8xf32>
    tpu.vector_store %arg13[%c0_49, %c0_50, %c0_51], %188 {strides = array<i32>} : memref<2x8x8xf32, #tpu.memory_space<vmem>>, vector<2x8x8xf32>,
    return
  }
  func.func @transform_0(%arg0: i32) -> (i32, i32, i32) {
    %c0_i32 = arith.constant 0 : i32
    %c0_i32_0 = arith.constant 0 : i32
    %c0_i32_1 = arith.constant 0 : i32
    return %arg0, %c0_i32, %c0_i32_0 : i32, i32, i32
  }
  func.func @transform_1(%arg0: i32) -> (i32, i32, i32) {
    %c0_i32 = arith.constant 0 : i32
    %c0_i32_0 = arith.constant 0 : i32
    %c0_i32_1 = arith.constant 0 : i32
    return %arg0, %c0_i32, %c0_i32_0 : i32, i32, i32
  }
  func.func @transform_2(%arg0: i32) -> (i32, i32, i32) {
    %c0_i32 = arith.constant 0 : i32
    %c0_i32_0 = arith.constant 0 : i32
    %c0_i32_1 = arith.constant 0 : i32
    return %arg0, %c0_i32, %c0_i32_0 : i32, i32, i32
  }
  func.func @transform_3(%arg0: i32) -> (i32, i32) {
    %c0_i32 = arith.constant 0 : i32
    %c0_i32_0 = arith.constant 0 : i32
    %c0_i32_1 = arith.constant 0 : i32
    return %c0_i32, %c0_i32_0 : i32, i32
  }
  func.func @transform_4(%arg0: i32) -> (i32, i32) {
    %c0_i32 = arith.constant 0 : i32
    %c0_i32_0 = arith.constant 0 : i32
    %c0_i32_1 = arith.constant 0 : i32
    return %c0_i32, %c0_i32_0 : i32, i32
  }
  func.func @transform_5(%arg0: i32) -> (i32, i32) {
    %c0_i32 = arith.constant 0 : i32
    %c0_i32_0 = arith.constant 0 : i32
    %c0_i32_1 = arith.constant 0 : i32
    return %c0_i32, %c0_i32_0 : i32, i32
  }
  func.func @transform_6(%arg0: i32) -> (i32, i32) {
    %c0_i32 = arith.constant 0 : i32
    %c0_i32_0 = arith.constant 0 : i32
    %c0_i32_1 = arith.constant 0 : i32
    return %c0_i32, %c0_i32_0 : i32, i32
  }
  func.func @transform_7(%arg0: i32) -> (i32, i32) {
    %c0_i32 = arith.constant 0 : i32
    %c0_i32_0 = arith.constant 0 : i32
    %c0_i32_1 = arith.constant 0 : i32
    return %c0_i32, %c0_i32_0 : i32, i32
  }
  func.func @transform_8(%arg0: i32) -> (i32, i32) {
    %c0_i32 = arith.constant 0 : i32
    %c0_i32_0 = arith.constant 0 : i32
    %c0_i32_1 = arith.constant 0 : i32
    return %c0_i32, %c0_i32_0 : i32, i32
  }
  func.func @transform_9(%arg0: i32) -> (i32, i32) {
    %c0_i32 = arith.constant 0 : i32
    %c0_i32_0 = arith.constant 0 : i32
    %c0_i32_1 = arith.constant 0 : i32
    return %c0_i32, %c0_i32_0 : i32, i32
  }
  func.func @transform_10(%arg0: i32) -> (i32, i32) {
    %c0_i32 = arith.constant 0 : i32
    %c0_i32_0 = arith.constant 0 : i32
    %c0_i32_1 = arith.constant 0 : i32
    return %c0_i32, %c0_i32_0 : i32, i32
  }
  func.func @transform_11(%arg0: i32) -> (i32, i32, i32) {
    %c0_i32 = arith.constant 0 : i32
    %c0_i32_0 = arith.constant 0 : i32
    %c0_i32_1 = arith.constant 0 : i32
    return %arg0, %c0_i32, %c0_i32_0 : i32, i32, i32
  }
  func.func @transform_12(%arg0: i32) -> (i32, i32, i32) {
    %c0_i32 = arith.constant 0 : i32
    %c0_i32_0 = arith.constant 0 : i32
    %c0_i32_1 = arith.constant 0 : i32
    return %arg0, %c0_i32, %c0_i32_0 : i32, i32, i32
  }
}

</mosaic_0001>

<bundles_post_ra>
// kernel: tpu_custom_call.1
= control target key start
LH: loop header
LB: loop body
LE: loop exit
PB: predicated region body
PF: predicated region fallthrough
CT: control target
= control target key end

     0   :  { %18 = vsyncpa [#allocation3], 0  ;;  %v2967_v1 = vmov 0.0   ;;  %vm2968_vm0 = vmmov 0   ;;  %vm75_vm1 = vcmask 261120   ;;  %s3564_s0 = inlined_call_operand.vmem [shape: bf16[2,8,32], index: 0, kind: input, shape index: {}]   ;;  %s3565_s1 = inlined_call_operand.vmem [shape: bf16[2,8,32], index: 1, kind: input, shape index: {}]   ;;  %s3566_s2 = inlined_call_operand.vmem [shape: f32[2,1,8], index: 2, kind: input, shape index: {}]   ;;  %s3567_s3 = inlined_call_operand.vmem [shape: bf16[32,32], index: 3, kind: input, shape index: {}]   ;;  %s3568_s4 = inlined_call_operand.vmem [shape: bf16[32,64], index: 4, kind: input, shape index: {}]   ;;  %s3569_s5 = inlined_call_operand.vmem [shape: bf16[32,32], index: 5, kind: input, shape index: {}]   ;;  %s3570_s6 = inlined_call_operand.vmem [shape: bf16[32,128], index: 6, kind: input, shape index: {}]   ;;  %s3571_s7 = inlined_call_operand.vmem [shape: bf16[128,32], index: 7, kind: input, shape index: {}]   ;;  %s3572_s8 = inlined_call_operand.vmem [shape: f32[8,32], index: 8, kind: input, shape index: {}]   ;;  %s3573_s9 = inlined_call_operand.vmem [shape: f32[1,64], index: 9, kind: input, shape index: {}]   ;;  %s3574_s10 = inlined_call_operand.vmem [shape: f32[1,128], index: 10, kind: input, shape index: {}]   ;;  %s3575_s11 = inlined_call_operand.hbm [shape: f32[2,8,32], index: 11, kind: output, shape index: {0}]   ;;  %s3576_s12 = inlined_call_operand.hbm [shape: f32[2,8,8], index: 12, kind: output, shape index: {1}]  }
   0x1   :  { %v2858_v0 = vld [vmem:[%s3567_s3] sm:$0xff]   ;;  %2680 = vmatprep.subr.bf16.mxu1 %v2967_v1  ;;  %v2859_v2 = vld [vmem:[%s3567_s3 + $0x8] sm:$0xff]   ;;  %2708 = vmatprep.subr.bf16.mxu0 %v2967_v1 }
   0x2   :  { %2681 = vmatpush3.bf16.msra.mxu1 %v2858_v0  ;;  %2684 = vmatprep.mubr.msk.bf16.mxu1 %vm2968_vm0, %v2967_v1  ;;  %v43_v3 = vld [vmem:[%s3564_s0] sm:$0xff]   ;;  %v2862_v5 = vld [vmem:[%s3568_s4 + $0x8] sm:$0xff]  }
   0x3   :  { %2682 = vmatprep.subr.bf16.mxu1 %v2967_v1  ;;  %2710 = vmatprep.mubr.msk.bf16.mxu0 %vm2968_vm0, %v2967_v1  ;;  %v2861_v4 = vld [vmem:[%s3568_s4] sm:$0xff]  }
   0x4   :  { %v2863_v6 = vld [vmem:[%s3565_s1] sm:$0xff]  }
   0x6   :  { %2683 = vmatpush3.bf16.msra.mxu1 %v2859_v2 }
   0x7   :  { %2688 = vmatprep.subr.bf16.mxu1 %v2967_v1 }
   0x9   :  { %2685 = vmatmul.mubr.msk.bf16.vlgmr.msra.gmra.mrb[0].mxu1 %vm75_vm1, %v43_v3 }
   0xa   :  { %2689 = vmatpush3.bf16.msra.mxu1 %v2861_v4  ;;  %2692 = vmatprep.mubr.msk.bf16.mxu1 %vm2968_vm0, %v2967_v1 }
   0xb   :  { %2690 = vmatprep.subr.bf16.mxu1 %v2967_v1 }
   0xc   :  { %19 = vsyncpa [#allocation5], 0  ;;  %v54_v7 = vlaneseq  ;;  %v47_v10 = vld [vmem:[%s3572_s8] sm:$0xff]  ;;  %s2969_s16 = smov 104   ;;  %s2970_s17 = smov 120   ;;  %v2974_v41 = vmov 0  }
   0xd   :  { %v2573_v19 = vld [vmem:[%s3573_s9] ss:$0 sm:$0xff]  ;;  %s2971_s18 = smov 112   ;;  %v2972_v27 = vmov 1983009808   ;;  %v3115_v42 = vpack.i.b16 %v2974_v41, %v2974_v41  ;;  %vm1051_vm2 = vcmask 64512  }
   0xe   :  { %2691 = vmatpush3.bf16.msra.mxu1 %v2862_v5  ;;  %v3081_v8 = vshrl.u32 %v54_v7, 7  ;;  %v223_v28 = vunpack.c.l.s4 %v2972_v27  ;;  %v2973_v32 = vmov 1934713408   ;;  %vm1519_vm3 = vcmask 1043456   ;;  %s2976_s26 = smov 16   ;;  %s2977_s27 = smov 8  }
   0xf   :  { %2696 = vmatprep.subr.bf16.mxu1 %v2967_v1  ;;  %v254_v33 = vunpack.c.l.s4 %v2973_v32  ;;  %s2978_s28 = smov 24   ;;  %vm2183_vm4 = vcmask 130048   ;;  %vm2186_vm5 = vcmask 195584  }
  0x10   :  { %v56_v9 = vsub.s32 0, %v3081_v8  ;;  %v224_v29 = vunpack.c.0.s8 %v223_v28 }
  0x11   :  { %2693 = vmatmul.mubr.msk.bf16.vlgmr.msra.gmra.mrb[4].mxu1 %vm75_vm1, %v2863_v6  ;;  %v255_v40 = vunpack.c.0.s8 %v254_v33 }
  0x12   :  { %2698 = vmatprep.mubr.msk.bf16.mxu1 %vm2968_vm0, %v2967_v1  ;;  %v57_v11 = vrot.slane %v47_v10, %v56_v9  ;;  %v3107_v36 = vsub.s32 %v224_v29, %v3081_v8 }
  0x13   :  { %v3125_v53 = vsub.s32 %v255_v40, %v3081_v8 }
  0xdc   :  { %v113_v12 = vpop.f32.mrb[0].mxu1 }
  0xdd   :  { %v2686_v13 = vpop.f32.mrb[1].mxu1  ;;  %v114_v15 = vadd.f32 %v113_v12, %v57_v11 }
  0xde   :  { %v116_v14 = vpop.f32.mrb[2].mxu1 }
  0xdf   :  { %v117_v16 = vadd.f32 %v116_v14, %v57_v11  ;;  %v2687_v17 = vpop.f32.mrb[3].mxu1 }
  0xe1   :  { %v3087_v18 = vpack.c.bf16 %v117_v16, %v114_v15 }
  0xe3   :  { %v203_v2 = vshrl.u32 %v3087_v18, 16 }
  0xe4   :  { %v184_v20 = vpop.f32.mrb[4].mxu1 }
  0xe5   :  { %v2694_v21 = vpop.f32.mrb[5].mxu1  ;;  %v185_v23 = vadd.f32 %v2573_v19, %v184_v20 }
  0xe6   :  { %v187_v22 = vpop.f32.mrb[6].mxu1 }
  0xe7   :  { %v188_v24 = vadd.f32 %v2573_v19, %v187_v22  ;;  %v2695_v25 = vpop.f32.mrb[7].mxu1 }
  0xe9   :  { %v3092_v26 = vpack.c.bf16 %v188_v24, %v185_v23 }
  0xeb   :  { %483 = vrot.lane.b32.xlu1 %v3092_v26, %s2969_s16  ;;  %479 = vrot.lane.b32.xlu0 %v3092_v26, %s2970_s17  ;;  %v489_v35 = vshrl.u32 %v3092_v26, 16 }
  0xef   :  { %193 = vrot.lane.b32.xlu1 %v3087_v18, %s2970_s17  ;;  %481 = vrot.lane.b32.xlu0 %v3092_v26, %s2971_s18 }
  0xf3   :  { %197 = vrot.lane.b32.xlu1 %v3087_v18, %s2969_s16  ;;  %195 = vrot.lane.b32.xlu0 %v3087_v18, %s2971_s18 }
 0x15d   :  { %v3100_v30 = vpop.permute.xlu1 %483  ;;  %v3102_v31 = vpop.permute.xlu0 %479 }
 0x15e   :  { %v490_v34 = vshrl.u32 %v3102_v31, 16  ;;  %v487_v37 = vpack.i.b16 %v3102_v31, %v3092_v26  ;;  %v498_v44 = vshrl.u32 %v3100_v30, 16 }
 0x160   :  { %v491_v43 = vpack.i.b16 %v490_v34, %v489_v35  ;;  %v508_v47 = vrot.slane %v487_v37, %v3107_v36  ;;  %v501_v54 = vcombine.high %v487_v37, %v3115_v42 }
 0x161   :  { %v194_v38 = vpop.permute.xlu1 %193  ;;  %v3111_v39 = vpop.permute.xlu0 %481 }
 0x162   :  { %v495_v45 = vpack.i.b16 %v3100_v30, %v3111_v39  ;;  %v497_v46 = vshrl.u32 %v3111_v39, 16  ;;  %v574_v55 = vrot.slane %v491_v43, %v3107_v36  ;;  %v204_v56 = vshrl.u32 %v194_v38, 16 }
 0x163   :  { %v567_v0 = vcombine.high %v491_v43, %v3115_v42  ;;  %v201_v3 = vpack.i.b16 %v194_v38, %v3087_v18  ;;  %v515_v10 = vrot.slane %v501_v54, %v3107_v36 }
 0x164   :  { %v499_v48 = vpack.i.b16 %v498_v44, %v497_v46  ;;  %v516_v49 = vcombine.high %v495_v45, %v3115_v42  ;;  %v523_v50 = vrot.slane %v495_v45, %v3107_v36  ;;  %v205_v11 = vpack.i.b16 %v204_v56, %v203_v2 }
 0x165   :  { %v198_v51 = vpop.permute.xlu1 %197  ;;  %v196_v52 = vpop.permute.xlu0 %195  ;;  %v581_v15 = vrot.slane %v567_v0, %v3107_v36  ;;  %v228_v16 = vrot.slane %v201_v3, %v3107_v36  ;;  %v221_v23 = vcombine.high %v201_v3, %v3115_v42 }
 0x166   :  { %v531_v57 = vcombine.low %v508_v47, %v523_v50  ;;  %v212_v58 = vshrl.u32 %v198_v51, 16  ;;  %v209_v59 = vpack.i.b16 %v198_v51, %v196_v52  ;;  %v532_v60 = vcombine.high %v508_v47, %v523_v50 }
 0x167   :  { %v582_v61 = vcombine.high %v499_v48, %v3115_v42  ;;  %v589_v62 = vrot.slane %v499_v48, %v3107_v36  ;;  %v211_v63 = vshrl.u32 %v196_v52, 16  ;;  %v530_v4 = vrot.slane %v516_v49, %v3107_v36 }
 0x168   :  { %v539_v5 = vrot.slane %v531_v57, %v3125_v53  ;;  %v546_v6 = vrot.slane %v532_v60, %v3125_v53  ;;  %v243_v12 = vrot.slane %v209_v59, %v3107_v36  ;;  %v287_v24 = vcombine.high %v205_v11, %v3115_v42 }
 0x169   :  { %v597_v7 = vcombine.low %v574_v55, %v589_v62  ;;  %v598_v9 = vcombine.high %v574_v55, %v589_v62  ;;  %v596_v13 = vrot.slane %v582_v61, %v3107_v36  ;;  %v213_v14 = vpack.i.b16 %v212_v58, %v211_v63 }
 0x16a   :  { %v547_v17 = vcombine.low %v515_v10, %v530_v4  ;;  %v548_v18 = vcombine.high %v515_v10, %v530_v4  ;;  %v633_v21 = vcombine.low %v539_v5, %v546_v6  ;;  %v2582_v22 = vcombine.high %v539_v5, %v546_v6 }
 0x16b   :  { %v605_v19 = vrot.slane %v597_v7, %v3125_v53  ;;  %v612_v20 = vrot.slane %v598_v9, %v3125_v53  ;;  %v251_v25 = vcombine.low %v228_v16, %v243_v12  ;;  %v613_v27 = vcombine.low %v581_v15, %v596_v13 }
 0x16c   :  { %v614_v28 = vcombine.high %v581_v15, %v596_v13  ;;  %v252_v29 = vcombine.high %v228_v16, %v243_v12  ;;  %v302_v32 = vcombine.high %v213_v14, %v3115_v42  ;;  %v294_v33 = vrot.slane %v205_v11, %v3107_v36 }
 0x16d   :  { %v555_v34 = vrot.slane %v547_v17, %v3125_v53  ;;  %v562_v35 = vrot.slane %v548_v18, %v3125_v53  ;;  %v309_v37 = vrot.slane %v213_v14, %v3107_v36  ;;  %v640_v38 = vrot.slane %v633_v21, %v3107_v36 }
 0x16e   :  { %v648_v40 = vrot.slane %v2582_v22, %v3107_v36  ;;  %v658_v43 = vcombine.low %v605_v19, %v612_v20  ;;  %v236_v44 = vcombine.high %v209_v59, %v3115_v42  ;;  %v259_v45 = vrot.slane %v251_v25, %v3125_v53 }
 0x16f   :  { %v266_v46 = vrot.slane %v252_v29, %v3125_v53  ;;  %v317_v47 = vcombine.low %v294_v33, %v309_v37  ;;  %v318_v48 = vcombine.high %v294_v33, %v309_v37  ;;  %v235_v49 = vrot.slane %v221_v23, %v3107_v36 }
 0x170   :  { %v621_v50 = vrot.slane %v613_v27, %v3125_v53  ;;  %v628_v51 = vrot.slane %v614_v28, %v3125_v53  ;;  %v316_v52 = vrot.slane %v302_v32, %v3107_v36  ;;  %v301_v54 = vrot.slane %v287_v24, %v3107_v36 }
 0x171   :  { %v2583_v55 = vcombine.high %v605_v19, %v612_v20  ;;  %v325_v56 = vrot.slane %v317_v47, %v3125_v53  ;;  %v332_v57 = vrot.slane %v318_v48, %v3125_v53  ;;  %v683_v58 = vcombine.low %v555_v34, %v562_v35 }
 0x172   :  { %v250_v59 = vrot.slane %v236_v44, %v3107_v36  ;;  %v649_v60 = vcombine.low %v640_v38, %v648_v40  ;;  %v665_v61 = vrot.slane %v658_v43, %v3107_v36  ;;  %v353_v62 = vcombine.low %v259_v45, %v266_v46 }
 0x173   :  { %v2578_v63 = vcombine.high %v259_v45, %v266_v46  ;;  %v378_v0 = vcombine.low %v325_v56, %v332_v57  ;;  %v2579_v2 = vcombine.high %v325_v56, %v332_v57  ;;  %v2584_v3 = vcombine.high %v555_v34, %v562_v35 }
 0x174   :  { %v708_v4 = vcombine.low %v621_v50, %v628_v51  ;;  %v333_v5 = vcombine.low %v301_v54, %v316_v52  ;;  %v334_v6 = vcombine.high %v301_v54, %v316_v52  ;;  %v2585_v7 = vcombine.high %v621_v50, %v628_v51 }
 0x175   :  { %v385_v9 = vrot.slane %v378_v0, %v3107_v36  ;;  %v393_v10 = vrot.slane %v2579_v2, %v3107_v36  ;;  %v673_v11 = vrot.slane %v2583_v55, %v3107_v36  ;;  %v267_v12 = vcombine.low %v235_v49, %v250_v59 }
 0x176   :  { %v268_v13 = vcombine.high %v235_v49, %v250_v59  ;;  %v360_v14 = vrot.slane %v353_v62, %v3107_v36  ;;  %v368_v15 = vrot.slane %v2578_v63, %v3107_v36  ;;  %v656_v16 = vrot.slane %v649_v60, %v3125_v53 }
 0x177   :  { %v674_v17 = vcombine.low %v665_v61, %v673_v11  ;;  %v341_v18 = vrot.slane %v333_v5, %v3125_v53  ;;  %v348_v19 = vrot.slane %v334_v6, %v3125_v53  ;;  %v394_v20 = vcombine.low %v385_v9, %v393_v10 }
 0x178   :  { %v690_v21 = vrot.slane %v683_v58, %v3107_v36  ;;  %v698_v23 = vrot.slane %v2584_v3, %v3107_v36  ;;  %v715_v24 = vrot.slane %v708_v4, %v3107_v36  ;;  %v723_v25 = vrot.slane %v2585_v7, %v3107_v36 }
 0x179   :  { %v681_v22 = vrot.slane %v674_v17, %v3125_v53  ;;  %v275_v27 = vrot.slane %v267_v12, %v3125_v53  ;;  %v282_v28 = vrot.slane %v268_v13, %v3125_v53  ;;  %v369_v29 = vcombine.low %v360_v14, %v368_v15 }
 0x17a   :  { %v657_v33 = vcombine.high %v656_v16, %v2974_v41  ;;  %v428_v35 = vcombine.low %v341_v18, %v348_v19  ;;  %v2581_v37 = vcombine.high %v341_v18, %v348_v19  ;;  %v401_v38 = vrot.slane %v394_v20, %v3125_v53 }
 0x17b   :  { %v735_v32 = vpack.i.b16 %v681_v22, %v656_v16  ;;  %v682_v34 = vcombine.high %v681_v22, %v2974_v41  ;;  %v724_v40 = vcombine.low %v715_v24, %v723_v25  ;;  %v737_v45 = vshrl.u32 %v681_v22, 16 }
 0x17c   :  { %v699_v46 = vcombine.low %v690_v21, %v698_v23  ;;  %v403_v47 = vcombine.low %v275_v27, %v282_v28  ;;  %v2580_v48 = vcombine.high %v275_v27, %v282_v28  ;;  %v376_v49 = vrot.slane %v369_v29, %v3125_v53 }
 0x17d   :  { %v1056_v43 = vsel %vm1051_vm2, %v735_v32, 0  ;;  %v741_v44 = vpack.i.b16 %v682_v34, %v657_v33  ;;  %v736_v51 = vshrl.u32 %v656_v16, 16  ;;  %v731_v52 = vrot.slane %v724_v40, %v3125_v53 }
 0x17e   :  { %2697 = vmatpush3.bf16.xpose.msra.mxu1 %v1056_v43  ;;  %v435_v54 = vrot.slane %v428_v35, %v3107_v36  ;;  %v443_v55 = vrot.slane %v2581_v37, %v3107_v36  ;;  %v402_v57 = vcombine.high %v401_v38, %v2974_v41  ;;  %v706_v58 = vrot.slane %v699_v46, %v3125_v53 }
 0x17f   :  { %v1148_v50 = vsel %vm1051_vm2, %v741_v44, 0  ;;  %2702 = vmatprep.subr.bf16.mxu1 %v2967_v1  ;;  %v738_v56 = vpack.i.b16 %v737_v45, %v736_v51  ;;  %v410_v59 = vrot.slane %v403_v47, %v3107_v36  ;;  %v418_v60 = vrot.slane %v2580_v48, %v3107_v36  ;;  %v2590_v48 = vld [vmem:[%s3566_s2] ss:$0 sm:$0xff] }
 0x180   :  { %2709 = vmatpush3.bf16.xpose.msra.mxu0 %v1148_v50  ;;  %v455_v61 = vpack.i.b16 %v401_v38, %v376_v49  ;;  %v377_v62 = vcombine.high %v376_v49, %v2974_v41  ;;  %v747_v63 = vpack.i.b16 %v731_v52, %v706_v58  ;;  %v444_v0 = vcombine.low %v435_v54, %v443_v55 }
 0x181   :  { %2720 = vmatprep.subr.bf16.mxu0 %v2967_v1  ;;  %v743_v2 = vshrl.u32 %v682_v34, 16  ;;  %v1102_v3 = vsel %vm1051_vm2, %v738_v56, 0  ;;  %v419_v5 = vcombine.low %v410_v59, %v418_v60  ;;  %v742_v6 = vshrl.u32 %v657_v33, 16 }
 0x182   :  { %v461_v4 = vpack.i.b16 %v402_v57, %v377_v62  ;;  %v1240_v7 = vsel %vm1051_vm2, %v747_v63, 0  ;;  %v457_v9 = vshrl.u32 %v401_v38, 16  ;;  %v732_v10 = vcombine.high %v731_v52, %v2974_v41  ;;  %v2591_v63 = vld [vmem:[%s3566_s2 + $0x1] ss:$0 sm:$0xff]  ;;  %s2975_s2 = smov 96  }
 0x183   :  { %v456_v11 = vshrl.u32 %v376_v49, 16  ;;  %v744_v12 = vpack.i.b16 %v743_v2, %v742_v6  ;;  %v451_v13 = vrot.slane %v444_v0, %v3125_v53  ;;  %v707_v14 = vcombine.high %v706_v58, %v2974_v41 }
 0x184   :  { %v426_v16 = vrot.slane %v419_v5, %v3125_v53  ;;  %v749_v20 = vshrl.u32 %v731_v52, 16  ;;  %v463_v21 = vshrl.u32 %v402_v57, 16  ;;  %v748_v23 = vshrl.u32 %v706_v58, 16 }
 0x185   :  { %2699 = vmatmul.mubr.msk.bf16.vlgmr.msra.gmra.mrb[8].mxu1 %vm1051_vm2, %v455_v61  ;;  %v458_v15 = vpack.i.b16 %v457_v9, %v456_v11  ;;  %v753_v17 = vpack.i.b16 %v732_v10, %v707_v14  ;;  %v1194_v18 = vsel %vm1051_vm2, %v744_v12, 0  ;;  %v462_v24 = vshrl.u32 %v377_v62, 16 }
 0x186   :  { %2703 = vmatpush3.bf16.xpose.msra.mxu1 %v1102_v3  ;;  %2704 = vmatprep.mubr.msk.bf16.mxu1 %vm2968_vm0, %v2967_v1  ;;  %v467_v19 = vpack.i.b16 %v451_v13, %v426_v16  ;;  %v750_v25 = vpack.i.b16 %v749_v20, %v748_v23  ;;  %v452_v27 = vcombine.high %v451_v13, %v2974_v41  ;;  %v755_v34 = vshrl.u32 %v732_v10, 16 }
 0x187   :  { %2711 = vmatmul.mubr.msk.bf16.vlgmr.msra.gmra.mrb[0].mxu0 %vm1051_vm2, %v461_v4  ;;  %2714 = vmatprep.subr.bf16.mxu1 %v2967_v1  ;;  %v1332_v22 = vsel %vm1051_vm2, %v753_v17, 0  ;;  %v464_v28 = vpack.i.b16 %v463_v21, %v462_v24  ;;  %v427_v29 = vcombine.high %v426_v16, %v2974_v41  ;;  %v469_v35 = vshrl.u32 %v451_v13, 16 }
 0x188   :  { %2721 = vmatpush3.bf16.xpose.msra.mxu0 %v1240_v7  ;;  %2722 = vmatprep.mubr.msk.bf16.mxu0 %vm2968_vm0, %v2967_v1  ;;  %v1286_v32 = vsel %vm1051_vm2, %v750_v25, 0  ;;  %v754_v37 = vshrl.u32 %v707_v14, 16  ;;  %v468_v38 = vshrl.u32 %v426_v16, 16  ;;  %v475_v45 = vshrl.u32 %v452_v27, 16 }
 0x189   :  { %2732 = vmatprep.subr.bf16.mxu0 %v2967_v1  ;;  %v473_v33 = vpack.i.b16 %v452_v27, %v427_v29  ;;  %v474_v46 = vshrl.u32 %v427_v29, 16 }
 0x18a   :  { %v756_v40 = vpack.i.b16 %v755_v34, %v754_v37  ;;  %v470_v43 = vpack.i.b16 %v469_v35, %v468_v38 }
 0x18b   :  { %v476_v47 = vpack.i.b16 %v475_v45, %v474_v46 }
 0x18c   :  { %v1378_v44 = vsel %vm1051_vm2, %v756_v40, 0 }
 0x18d   :  { %2705 = vmatmul.mubr.msk.bf16.vlgmr.msra.gmra.mrb[12].mxu1 %vm1051_vm2, %v458_v15 }
 0x18e   :  { %2715 = vmatpush3.bf16.xpose.msra.mxu1 %v1194_v18  ;;  %2716 = vmatprep.mubr.msk.bf16.mxu1 %vm2968_vm0, %v2967_v1 }
 0x18f   :  { %2723 = vmatmul.mubr.msk.bf16.vlgmr.msra.gmra.mrb[4].mxu0 %vm1051_vm2, %v467_v19  ;;  %2726 = vmatprep.subr.bf16.mxu1 %v2967_v1 }
 0x190   :  { %2733 = vmatpush3.bf16.xpose.msra.mxu0 %v1332_v22  ;;  %2734 = vmatprep.mubr.msk.bf16.mxu0 %vm2968_vm0, %v2967_v1 }
 0x191   :  { %2744 = vmatprep.subr.bf16.mxu0 %v2967_v1 }
 0x195   :  { %2717 = vmatmul.mubr.msk.bf16.vlgmr.msra.gmra.mrb[16].mxu1 %vm1051_vm2, %v464_v28 }
 0x196   :  { %2727 = vmatpush3.bf16.xpose.msra.mxu1 %v1286_v32  ;;  %2728 = vmatprep.mubr.msk.bf16.mxu1 %vm2968_vm0, %v2967_v1 }
 0x197   :  { %2735 = vmatmul.mubr.msk.bf16.vlgmr.msra.gmra.mrb[8].mxu0 %vm1051_vm2, %v473_v33  ;;  %2738 = vmatprep.subr.bf16.mxu1 %v2967_v1 }
 0x198   :  { %2746 = vmatprep.mubr.msk.bf16.mxu0 %vm2968_vm0, %v2967_v1 }
 0x19d   :  { %2729 = vmatmul.mubr.msk.bf16.vlgmr.msra.gmra.mrb[20].mxu1 %vm1051_vm2, %v470_v43 }
 0x19e   :  { %2739 = vmatpush3.bf16.xpose.msra.mxu1 %v1378_v44  ;;  %2740 = vmatprep.mubr.msk.bf16.mxu1 %vm2968_vm0, %v2967_v1 }
 0x19f   :  { %2750 = vmatprep.subr.bf16.mxu1 %v2967_v1 }
 0x1a5   :  { %2741 = vmatmul.mubr.msk.bf16.vlgmr.msra.gmra.mrb[24].mxu1 %vm1051_vm2, %v476_v47 }
 0x1a6   :  { %2752 = vmatprep.mubr.msk.bf16.mxu1 %vm2968_vm0, %v2967_v1 }
 0x258   :  { %v1092_v49 = vpop.f32.mrb[8].mxu1 }
 0x259   :  { %v1093_v50 = vadd.f32 %v2590_v48, %v1092_v49  ;;  %v2700_v51 = vpop.f32.mrb[9].mxu1 }
 0x25a   :  { %v1095_v52 = vpop.f32.mrb[10].mxu1  ;;  %v1184_v54 = vpop.f32.mrb[0].mxu0 }
 0x25b   :  { %v3241_v55 = vadd.f32 %v2590_v48, %v1184_v54  ;;  %v2701_v56 = vpop.f32.mrb[11].mxu1  ;;  %v2712_v57 = vpop.f32.mrb[1].mxu0  ;;  %v1420_v58 = vsel %vm1051_vm2, %v1093_v50, -inf }
 0x25c   :  { %v1187_v59 = vpop.f32.mrb[2].mxu0  ;;  %1421 = vmax.xlane.f32.xlu0 %v1420_v58 }
 0x25d   :  { %v2713_v60 = vpop.f32.mrb[3].mxu0  ;;  %v1426_v61 = vsel %vm1051_vm2, %v3241_v55, -inf }
 0x260   :  { %1427 = vmax.xlane.f32.xlu0 %v1426_v61  ;;  %v1138_v62 = vpop.f32.mrb[12].mxu1 }
 0x261   :  { %v1139_v0 = vadd.f32 %v2590_v48, %v1138_v62  ;;  %v2706_v2 = vpop.f32.mrb[13].mxu1 }
 0x262   :  { %v1141_v3 = vpop.f32.mrb[14].mxu1  ;;  %v1276_v4 = vpop.f32.mrb[4].mxu0 }
 0x263   :  { %v3249_v5 = vadd.f32 %v2591_v63, %v1276_v4  ;;  %v2707_v6 = vpop.f32.mrb[15].mxu1  ;;  %v2724_v7 = vpop.f32.mrb[5].mxu0  ;;  %v1423_v9 = vsel %vm1051_vm2, %v1139_v0, -inf }
 0x264   :  { %v1279_v10 = vpop.f32.mrb[6].mxu0  ;;  %1424 = vmax.xlane.f32.xlu1 %v1423_v9 }
 0x265   :  { %v2725_v11 = vpop.f32.mrb[7].mxu0  ;;  %v1432_v12 = vsel %vm1051_vm2, %v3249_v5, -inf }
 0x268   :  { %1433 = vmax.xlane.f32.xlu1 %v1432_v12  ;;  %v1230_v13 = vpop.f32.mrb[16].mxu1 }
 0x269   :  { %v1231_v14 = vadd.f32 %v2590_v48, %v1230_v13  ;;  %v2718_v15 = vpop.f32.mrb[17].mxu1 }
 0x26a   :  { %v1233_v16 = vpop.f32.mrb[18].mxu1  ;;  %v1368_v17 = vpop.f32.mrb[8].mxu0 }
 0x26b   :  { %v1369_v18 = vadd.f32 %v2591_v63, %v1368_v17  ;;  %v2719_v19 = vpop.f32.mrb[19].mxu1  ;;  %v2736_v20 = vpop.f32.mrb[9].mxu0  ;;  %v1429_v21 = vsel %vm1051_vm2, %v1231_v14, -inf }
 0x26c   :  { %v1371_v22 = vpop.f32.mrb[10].mxu0  ;;  %1430 = vmax.xlane.f32.xlu0 %v1429_v21 }
 0x26d   :  { %v2737_v23 = vpop.f32.mrb[11].mxu0  ;;  %v1438_v24 = vsel %vm1051_vm2, %v1369_v18, -inf }
 0x26e   :  { %1439 = vmax.xlane.f32.xlu1 %v1438_v24 }
 0x270   :  { %v1322_v25 = vpop.f32.mrb[20].mxu1 }
 0x271   :  { %v1323_v27 = vadd.f32 %v2591_v63, %v1322_v25  ;;  %v2730_v28 = vpop.f32.mrb[21].mxu1 }
 0x272   :  { %v1325_v29 = vpop.f32.mrb[22].mxu1 }
 0x273   :  { %v2731_v32 = vpop.f32.mrb[23].mxu1  ;;  %v1435_v33 = vsel %vm1051_vm2, %v1323_v27, -inf }
 0x274   :  { %1436 = vmax.xlane.f32.xlu0 %v1435_v33 }
 0x278   :  { %v1414_v34 = vpop.f32.mrb[24].mxu1 }
 0x279   :  { %v1415_v35 = vadd.f32 %v2591_v63, %v1414_v34  ;;  %v2742_v37 = vpop.f32.mrb[25].mxu1 }
 0x27a   :  { %v1417_v38 = vpop.f32.mrb[26].mxu1 }
 0x27b   :  { %v2743_v40 = vpop.f32.mrb[27].mxu1  ;;  %v1441_v43 = vsel %vm1051_vm2, %v1415_v35, -inf }
 0x27c   :  { %1442 = vmax.xlane.f32.xlu0 %v1441_v43 }
 0x27f   :  { %757 = vrot.lane.b32.xlu1 %v3092_v26, %s2975_s2 }
 0x2e9   :  { %v1422_v44 = vpop.xlane.xlu0 %1421 }
 0x2ea   :  { %v1444_v45 = vsub.f32 %v1093_v50, %v1422_v44 }
 0x2ec   :  { %v1452_v46 = vmul.f32 1.442695, %v1444_v45 }
 0x2ed   :  { %v1428_v26 = vpop.xlane.xlu0 %1427 }
 0x2ee   :  { %2877 = vpow2.f32 %v1452_v46  ;;  %v1446_v60 = vsub.f32 %v3241_v55, %v1428_v26 }
 0x2f0   :  { %v1456_v63 = vmul.f32 1.442695, %v1446_v60 }
 0x2f1   :  { %v1425_v47 = vpop.xlane.xlu1 %1424 }
 0x2f2   :  { %v1445_v48 = vsub.f32 %v1139_v0, %v1425_v47 }
 0x2f4   :  { %v1454_v49 = vmul.f32 1.442695, %v1445_v48 }
 0x2f5   :  { %v1434_v50 = vpop.xlane.xlu1 %1433 }
 0x2f6   :  { %2879 = vpow2.f32 %v1454_v49  ;;  %v1448_v0 = vsub.f32 %v3249_v5, %v1434_v50 }
 0x2f8   :  { %v3259_v51 = vpop.eup %2877 }
 0x2f9   :  { %v1468_v52 = vsel %vm1051_vm2, %v3259_v51, 0.0  ;;  %v1431_v57 = vpop.xlane.xlu0 %1430 }
 0x2fa   :  { %1469 = vadd.xlane.f32.xlu1 %v1468_v52  ;;  %v1447_v58 = vsub.f32 %v1231_v14, %v1431_v57 }
 0x2fb   :  { %v1440_v59 = vpop.xlane.xlu1 %1439 }
 0x2fc   :  { %v1458_v61 = vmul.f32 1.442695, %v1447_v58  ;;  %v1450_v62 = vsub.f32 %v1369_v18, %v1440_v59 }
 0x2fe   :  { %2881 = vpow2.f32 %v1458_v61  ;;  %v1464_v2 = vmul.f32 1.442695, %v1450_v62 }
 0x2ff   :  { %2883 = vpow2.f32 %v1456_v63  ;;  %v758_v19 = vpop.permute.xlu1 %757 }
 0x300   :  { %v3263_v54 = vpop.eup %2879  ;;  %2885 = vpow2.f32 %v1464_v2  ;;  %v769_v32 = vshrl.u32 %v758_v19, 16 }
 0x301   :  { %v1471_v56 = vsel %vm1051_vm2, %v3263_v54, 0.0  ;;  %v1437_v3 = vpop.xlane.xlu0 %1436 }
 0x302   :  { %1472 = vadd.xlane.f32.xlu0 %v1471_v56 }
 0x308   :  { %v3272_v7 = vpop.eup %2881 }
 0x309   :  { %v1443_v4 = vpop.xlane.xlu0 %1442  ;;  %v3274_v9 = vpop.eup %2883  ;;  %v1477_v5 = vsel %vm1051_vm2, %v3272_v7, 0.0 }
 0x30a   :  { %v1451_v6 = vsub.f32 %v1415_v35, %v1443_v4  ;;  %v3278_v10 = vpop.eup %2885  ;;  %v1474_v12 = vsel %vm1051_vm2, %v3274_v9, 0.0 }
 0x30b   :  { %761 = vrot.lane.b32.xlu1 %v3111_v39, %s2975_s2  ;;  %v1460_v39 = vmul.f32 1.442695, %v1448_v0  ;;  %v1486_v11 = vsel %vm1051_vm2, %v3278_v10, 0.0 }
 0x30c   :  { %v1466_v55 = vmul.f32 1.442695, %v1451_v6 }
 0x30d   :  { %2887 = vpow2.f32 %v1460_v39 }
 0x30f   :  { %763 = vrot.lane.b32.xlu1 %v3100_v30, %s2975_s2  ;;  %v1449_v30 = vsub.f32 %v1323_v27, %v1437_v3 }
 0x317   :  { %v3284_v13 = vpop.eup %2887 }
 0x318   :  { %759 = vrot.lane.b32.xlu0 %v3102_v31, %s2975_s2  ;;  %v1462_v31 = vmul.f32 1.442695, %v1449_v30  ;;  %v1480_v14 = vsel %vm1051_vm2, %v3284_v13, 0.0 }
 0x31a   :  { %2889 = vpow2.f32 %v1462_v31 }
 0x31b   :  { %2891 = vpow2.f32 %v1466_v55 }
 0x324   :  { %v3288_v15 = vpop.eup %2889 }
 0x325   :  { %v1483_v16 = vsel %vm1051_vm2, %v3288_v15, 0.0  ;;  %v3292_v17 = vpop.eup %2891 }
 0x326   :  { %v1489_v18 = vsel %vm1051_vm2, %v3292_v17, 0.0 }
 0x333   :  { %1478 = vadd.xlane.f32.xlu1 %v1477_v5 }
 0x337   :  { %1487 = vadd.xlane.f32.xlu1 %v1486_v11  ;;  %1475 = vadd.xlane.f32.xlu0 %v1474_v12 }
 0x33b   :  { %1481 = vadd.xlane.f32.xlu0 %v1480_v14 }
 0x33f   :  { %1484 = vadd.xlane.f32.xlu0 %v1483_v16 }
 0x343   :  { %1490 = vadd.xlane.f32.xlu0 %v1489_v18 }
 0x387   :  { %v1470_v20 = vpop.xlane.xlu1 %1469 }
 0x388   :  { %2893 = vrcp.f32 %v1470_v20 }
 0x38b   :  { %v762_v21 = vpop.permute.xlu1 %761 }
 0x38c   :  { %v777_v27 = vshrl.u32 %v762_v21, 16 }
 0x38f   :  { %v764_v22 = vpop.permute.xlu1 %763  ;;  %v1473_v23 = vpop.xlane.xlu0 %1472 }
 0x390   :  { %v778_v24 = vshrl.u32 %v764_v22, 16  ;;  %v3296_v25 = vpack.i.b16 %v764_v22, %v762_v21  ;;  %2895 = vrcp.f32 %v1473_v23 }
 0x392   :  { %v779_v33 = vpack.i.b16 %v778_v24, %v777_v27  ;;  %v803_v35 = vrot.slane %v3296_v25, %v3107_v36  ;;  %v2894_v2 = vpop.eup %2893  ;;  %v796_v27 = vcombine.high %v3296_v25, %v3115_v42 }
 0x393   :  { %v760_v28 = vpop.permute.xlu0 %759  ;;  %v3318_v31 = vmul.f32 %v2894_v2, %v3259_v51 }
 0x394   :  { %v3298_v29 = vpack.i.b16 %v760_v28, %v758_v19  ;;  %v770_v34 = vshrl.u32 %v760_v28, 16  ;;  %v869_v44 = vrot.slane %v779_v33, %v3107_v36  ;;  %v862_v51 = vcombine.high %v779_v33, %v3115_v42 }
 0x395   :  { %v810_v25 = vrot.slane %v796_v27, %v3107_v36 }
 0x396   :  { %v788_v37 = vrot.slane %v3298_v29, %v3107_v36  ;;  %v771_v38 = vpack.i.b16 %v770_v34, %v769_v32  ;;  %v781_v22 = vcombine.high %v3298_v29, %v3115_v42  ;;  %v876_v33 = vrot.slane %v862_v51, %v3107_v36 }
 0x398   :  { %v811_v40 = vcombine.low %v788_v37, %v803_v35  ;;  %v812_v43 = vcombine.high %v788_v37, %v803_v35  ;;  %v854_v45 = vrot.slane %v771_v38, %v3107_v36  ;;  %v847_v14 = vcombine.high %v771_v38, %v3115_v42 }
 0x399   :  { %v795_v34 = vrot.slane %v781_v22, %v3107_v36 }
 0x39a   :  { %v819_v46 = vrot.slane %v811_v40, %v3125_v53  ;;  %v826_v47 = vrot.slane %v812_v43, %v3125_v53  ;;  %v877_v48 = vcombine.low %v854_v45, %v869_v44  ;;  %v878_v49 = vcombine.high %v854_v45, %v869_v44  ;;  %v2896_v30 = vpop.eup %2895 }
 0x39b   :  { %v3322_v12 = vmul.f32 %v2896_v30, %v3263_v54  ;;  %v1508_v54 = vpack.c.bf16 %v3318_v31, %v3318_v31  ;;  %v861_v28 = vrot.slane %v847_v14, %v3107_v36  ;;  %v827_v38 = vcombine.low %v795_v34, %v810_v25 }
 0x39c   :  { %v913_v52 = vcombine.low %v819_v46, %v826_v47  ;;  %v2586_v56 = vcombine.high %v819_v46, %v826_v47  ;;  %v885_v26 = vrot.slane %v877_v48, %v3125_v53  ;;  %v892_v50 = vrot.slane %v878_v49, %v3125_v53 }
 0x39d   :  { %v1509_v29 = vpack.c.bf16 %v3322_v12, %v3322_v12  ;;  %v893_v35 = vcombine.low %v861_v28, %v876_v33  ;;  %v894_v37 = vcombine.high %v861_v28, %v876_v33  ;;  %v828_v40 = vcombine.high %v795_v34, %v810_v25 }
 0x39e   :  { %v920_v57 = vrot.slane %v913_v52, %v3107_v36  ;;  %v928_v58 = vrot.slane %v2586_v56, %v3107_v36  ;;  %v938_v59 = vcombine.low %v885_v26, %v892_v50  ;;  %v2587_v60 = vcombine.high %v885_v26, %v892_v50 }
 0x39f   :  { %v901_v43 = vrot.slane %v893_v35, %v3125_v53  ;;  %v908_v44 = vrot.slane %v894_v37, %v3125_v53  ;;  %v835_v45 = vrot.slane %v827_v38, %v3125_v53  ;;  %v842_v46 = vrot.slane %v828_v40, %v3125_v53 }
 0x3a0   :  { %v929_v61 = vcombine.low %v920_v57, %v928_v58  ;;  %v945_v62 = vrot.slane %v938_v59, %v3107_v36  ;;  %v953_v63 = vrot.slane %v2587_v60, %v3107_v36 }
 0x3a1   :  { %v988_v47 = vcombine.low %v901_v43, %v908_v44  ;;  %v2589_v48 = vcombine.high %v901_v43, %v908_v44  ;;  %v963_v49 = vcombine.low %v835_v45, %v842_v46  ;;  %v2588_v52 = vcombine.high %v835_v45, %v842_v46 }
 0x3a2   :  { %v936_v0 = vrot.slane %v929_v61, %v3125_v53  ;;  %v954_v3 = vcombine.low %v945_v62, %v953_v63 }
 0x3a3   :  { %v995_v56 = vrot.slane %v988_v47, %v3107_v36  ;;  %v1003_v26 = vrot.slane %v2589_v48, %v3107_v36  ;;  %v970_v50 = vrot.slane %v963_v49, %v3107_v36  ;;  %v978_v57 = vrot.slane %v2588_v52, %v3107_v36 }
 0x3a4   :  { %v937_v39 = vcombine.high %v936_v0, %v2974_v41  ;;  %v961_v4 = vrot.slane %v954_v3, %v3125_v53  ;;  %v1016_v55 = vshrl.u32 %v936_v0, 16 }
 0x3a5   :  { %v1004_v59 = vcombine.low %v995_v56, %v1003_v26  ;;  %v979_v60 = vcombine.low %v970_v50, %v978_v57 }
 0x3a6   :  { %v1015_v6 = vpack.i.b16 %v961_v4, %v936_v0  ;;  %v1017_v5 = vshrl.u32 %v961_v4, 16  ;;  %v962_v11 = vcombine.high %v961_v4, %v2974_v41  ;;  %v1022_v16 = vshrl.u32 %v937_v39, 16 }
 0x3a7   :  { %v1011_v62 = vrot.slane %v1004_v59, %v3125_v53  ;;  %v986_v63 = vrot.slane %v979_v60, %v3125_v53 }
 0x3a8   :  { %v1521_v18 = vsel %vm1519_vm3, %v1015_v6, 0  ;;  %v1018_v19 = vpack.i.b16 %v1017_v5, %v1016_v55  ;;  %v1021_v20 = vpack.i.b16 %v962_v11, %v937_v39  ;;  %v1023_v21 = vshrl.u32 %v962_v11, 16 }
 0x3a9   :  { %2745 = vmatpush3.bf16.msra.mxu0 %v1521_v18  ;;  %v1029_v3 = vshrl.u32 %v1011_v62, 16  ;;  %v1028_v39 = vshrl.u32 %v986_v63, 16  ;;  %v2519_v11 = vsel %vm1051_vm2, %v3322_v12, 0.0  ;;  %v987_v51 = vcombine.high %v986_v63, %v2974_v41 }
 0x3aa   :  { %v1567_v23 = vsel %vm1519_vm3, %v1018_v19, 0  ;;  %2756 = vmatprep.subr.bf16.mxu0 %v2967_v1  ;;  %v1024_v24 = vpack.i.b16 %v1023_v21, %v1022_v16  ;;  %v1613_v32 = vsel %vm1519_vm3, %v1021_v20, 0  ;;  %v1012_v19 = vcombine.high %v1011_v62, %v2974_v41 }
 0x3ab   :  { %2751 = vmatpush3.bf16.msra.mxu1 %v1567_v23  ;;  %v1030_v55 = vpack.i.b16 %v1029_v3, %v1028_v39  ;;  %v2518_v20 = vsel %vm1051_vm2, %v3318_v31, 0.0  ;;  %v1027_v21 = vpack.i.b16 %v1011_v62, %v986_v63  ;;  %v1034_v41 = vshrl.u32 %v987_v51, 16 }
 0x3ac   :  { %2747 = vmatmul.mubr.msk.bf16.vlgmr.msra.gmra.mrb[12].mxu0 %vm1051_vm2, %v1508_v54  ;;  %2762 = vmatprep.subr.bf16.mxu1 %v2967_v1  ;;  %v1659_v42 = vsel %vm1519_vm3, %v1024_v24, 0  ;;  %v2520_v12 = vadd.f32 %v2519_v11, %v2518_v20  ;;  %v1035_v24 = vshrl.u32 %v1012_v19, 16  ;;  %v1033_v37 = vpack.i.b16 %v1012_v19, %v987_v51 }
 0x3ad   :  { %2757 = vmatpush3.bf16.msra.mxu0 %v1613_v32  ;;  %2758 = vmatprep.mubr.msk.bf16.mxu0 %vm2968_vm0, %v2967_v1  ;;  %v1751_v16 = vsel %vm1519_vm3, %v1030_v55, 0 }
 0x3ae   :  { %2753 = vmatmul.mubr.msk.bf16.vlgmr.msra.gmra.mrb[28].mxu1 %vm1051_vm2, %v1509_v29  ;;  %2768 = vmatprep.subr.bf16.mxu0 %v2967_v1  ;;  %v1036_v25 = vpack.i.b16 %v1035_v24, %v1034_v41 }
 0x3af   :  { %2763 = vmatpush3.bf16.msra.mxu1 %v1659_v42  ;;  %2764 = vmatprep.mubr.msk.bf16.mxu1 %vm2968_vm0, %v2967_v1 }
 0x3b0   :  { %2774 = vmatprep.subr.bf16.mxu1 %v2967_v1 }
 0x3c0   :  { %v1479_v58 = vpop.xlane.xlu1 %1478 }
 0x3c1   :  { %2897 = vrcp.f32 %v1479_v58 }
 0x3c4   :  { %v1476_v61 = vpop.xlane.xlu0 %1475  ;;  %v1488_v0 = vpop.xlane.xlu1 %1487 }
 0x3c5   :  { %2899 = vrcp.f32 %v1476_v61 }
 0x3c8   :  { %v1482_v2 = vpop.xlane.xlu0 %1481 }
 0x3c9   :  { %2901 = vrcp.f32 %v1482_v2 }
 0x3ca   :  { %2903 = vrcp.f32 %v1488_v0 }
 0x3cb   :  { %v2898_v30 = vpop.eup %2897 }
 0x3cc   :  { %v1503_v4 = vmul.f32 %v2898_v30, %v3272_v7  ;;  %v1485_v6 = vpop.xlane.xlu0 %1484 }
 0x3cd   :  { %2905 = vrcp.f32 %v1485_v6 }
 0x3ce   :  { %v1511_v5 = vpack.c.bf16 %v1503_v4, %v1503_v4  ;;  %v2523_v28 = vsel %vm1051_vm2, %v1503_v4, 0.0 }
 0x3cf   :  { %v2900_v14 = vpop.eup %2899 }
 0x3d0   :  { %2765 = vmatmul.mubr.msk.bf16.vlgmr.msra.gmra.mrb[32].mxu1 %vm1051_vm2, %v1511_v5  ;;  %v1491_v18 = vpop.xlane.xlu0 %1490  ;;  %v1502_v7 = vmul.f32 %v2900_v14, %v3274_v9  ;;  %v1705_v9 = vsel %vm1519_vm3, %v1027_v21, 0 }
 0x3d1   :  { %2775 = vmatpush3.bf16.msra.mxu1 %v1751_v16  ;;  %2907 = vrcp.f32 %v1491_v18  ;;  %2776 = vmatprep.mubr.msk.bf16.mxu1 %vm2968_vm0, %v2967_v1 }
 0x3d2   :  { %2786 = vmatprep.subr.bf16.mxu1 %v2967_v1  ;;  %v2521_v23 = vsel %vm1051_vm2, %v1502_v7, 0.0  ;;  %v1510_v54 = vpack.c.bf16 %v1502_v7, %v1502_v7 }
 0x3d3   :  { %v2902_v22 = vpop.eup %2901  ;;  %v2522_v27 = vadd.f32 %v2521_v23, %v2520_v12 }
 0x3d4   :  { %v2904_v31 = vpop.eup %2903  ;;  %2759 = vmatmul.mubr.msk.bf16.vlgmr.msra.gmra.mrb[16].mxu0 %vm1051_vm2, %v1510_v54  ;;  %v1504_v32 = vmul.f32 %v2902_v22, %v3284_v13 }
 0x3d5   :  { %2769 = vmatpush3.bf16.msra.mxu0 %v1705_v9  ;;  %2770 = vmatprep.mubr.msk.bf16.mxu0 %vm2968_vm0, %v2967_v1  ;;  %v2524_v29 = vadd.f32 %v2523_v28, %v2522_v27  ;;  %v1506_v34 = vmul.f32 %v2904_v31, %v3278_v10  ;;  %v1843_v10 = vsel %vm1519_vm3, %v1036_v25, 0 }
 0x3d6   :  { %2780 = vmatprep.subr.bf16.mxu0 %v2967_v1  ;;  %v2525_v38 = vsel %vm1051_vm2, %v1504_v32, 0.0  ;;  %v1512_v45 = vpack.c.bf16 %v1504_v32, %v1504_v32 }
 0x3d7   :  { %v2906_v33 = vpop.eup %2905  ;;  %v2533_v35 = vmul.f32 0.25, %v2524_v29  ;;  %v2528_v46 = vsel %vm1051_vm2, %v1506_v34, 0.0  ;;  %v1514_v26 = vpack.c.bf16 %v1506_v34, %v1506_v34 }
 0x3d8   :  { %v1505_v42 = vmul.f32 %v2906_v33, %v3288_v15  ;;  %v1797_v15 = vsel %vm1519_vm3, %v1033_v37, 0 }
 0x3d9   :  { %2535 = vst.msk [vmem:[#allocation4] sm:$0xff] %vm1051_vm2, %v2533_v35 }
 0x3da   :  { %v2526_v13 = vsel %vm1051_vm2, %v1505_v42, 0.0  ;;  %v1513_v40 = vpack.c.bf16 %v1505_v42, %v1505_v42 }
 0x3db   :  { %v2908_v43 = vpop.eup %2907  ;;  %v2527_v44 = vadd.f32 %v2526_v13, %v2525_v38 }
 0x3dc   :  { %v1507_v47 = vmul.f32 %v2908_v43, %v3292_v17  ;;  %2777 = vmatmul.mubr.msk.bf16.vlgmr.msra.gmra.mrb[36].mxu1 %vm1051_vm2, %v1513_v40  ;;  %2771 = vmatmul.mubr.msk.bf16.vlgmr.msra.gmra.mrb[20].mxu0 %vm1051_vm2, %v1512_v45 }
 0x3dd   :  { %2787 = vmatpush3.bf16.msra.mxu1 %v1843_v10  ;;  %v2529_v48 = vadd.f32 %v2528_v46, %v2527_v44  ;;  %2781 = vmatpush3.bf16.msra.mxu0 %v1797_v15 }
 0x3de   :  { %2782 = vmatprep.mubr.msk.bf16.mxu0 %vm2968_vm0, %v2967_v1  ;;  %v2530_v49 = vsel %vm1051_vm2, %v1507_v47, 0.0  ;;  %2788 = vmatprep.mubr.msk.bf16.mxu1 %vm2968_vm0, %v2967_v1  ;;  %v1515_v56 = vpack.c.bf16 %v1507_v47, %v1507_v47 }
 0x3df   :  { %2792 = vmatprep.subr.bf16.mxu0 %v2967_v1  ;;  %v2531_v17 = vadd.f32 %v2530_v49, %v2529_v48  ;;  %2800 = vmatprep.subr.bf16.mxu1 %v2967_v1 }
 0x3e1   :  { %v2534_v52 = vmul.f32 0.25, %v2531_v17 }
 0x3e3   :  { %2536 = vst.msk [vmem:[#allocation4 + $0x8] sm:$0xff] %vm1051_vm2, %v2534_v52 }
 0x3e4   :  { %2789 = vmatmul.mubr.msk.bf16.vlgmr.msra.gmra.mrb[40].mxu1 %vm1051_vm2, %v1515_v56  ;;  %2783 = vmatmul.mubr.msk.bf16.vlgmr.msra.gmra.mrb[24].mxu0 %vm1051_vm2, %v1514_v26 }
 0x3e5   :  { %2804 = vmatprep.mubr.msk.bf16.mxu1 %vm2968_vm0, %v2967_v1  ;;  %2796 = vmatprep.mubr.msk.bf16.mxu0 %vm2968_vm0, %v2967_v1 }
 0x47f   :  { %v1557_v50 = vpop.f32.mrb[12].mxu0 }
 0x480   :  { %v2748_v57 = vpop.f32.mrb[13].mxu0 }
 0x481   :  { %v1560_v58 = vpop.f32.mrb[14].mxu0  ;;  %v1603_v59 = vpop.f32.mrb[28].mxu1 }
 0x482   :  { %v2749_v60 = vpop.f32.mrb[15].mxu0  ;;  %v2754_v61 = vpop.f32.mrb[29].mxu1 }
 0x483   :  { %v1606_v62 = vpop.f32.mrb[30].mxu1 }
 0x484   :  { %v2755_v63 = vpop.f32.mrb[31].mxu1 }
 0x4a3   :  { %v1695_v0 = vpop.f32.mrb[32].mxu1 }
 0x4a4   :  { %v1901_v2 = vcombine.low %v1603_v59, %v1695_v0  ;;  %v1902_v3 = vcombine.high %v1603_v59, %v1695_v0  ;;  %v2766_v39 = vpop.f32.mrb[33].mxu1 }
 0x4a5   :  { %v1698_v30 = vpop.f32.mrb[34].mxu1 }
 0x4a6   :  { %v2767_v4 = vpop.f32.mrb[35].mxu1  ;;  %v1909_v16 = vrot.slane %v1901_v2, %v3107_v36  ;;  %v1916_v18 = vrot.slane %v1902_v3, %v3107_v36 }
 0x4a7   :  { %v1649_v6 = vpop.f32.mrb[16].mxu0 }
 0x4a8   :  { %v1885_v55 = vcombine.low %v1557_v50, %v1649_v6  ;;  %v1886_v5 = vcombine.high %v1557_v50, %v1649_v6  ;;  %v2760_v11 = vpop.f32.mrb[17].mxu0 }
 0x4a9   :  { %v1652_v14 = vpop.f32.mrb[18].mxu0 }
 0x4aa   :  { %v1893_v19 = vrot.slane %v1885_v55, %v3107_v36  ;;  %v1900_v20 = vrot.slane %v1886_v5, %v3107_v36  ;;  %v2761_v7 = vpop.f32.mrb[19].mxu0 }
 0x4ac   :  { %v1917_v21 = vcombine.low %v1893_v19, %v1909_v16  ;;  %v1918_v12 = vcombine.high %v1893_v19, %v1909_v16  ;;  %v1933_v51 = vcombine.low %v1900_v20, %v1916_v18  ;;  %v1934_v22 = vcombine.high %v1900_v20, %v1916_v18 }
 0x4ae   :  { %v1925_v23 = vrot.slane %v1917_v21, %v3125_v53  ;;  %v1932_v54 = vrot.slane %v1918_v12, %v3125_v53  ;;  %v1941_v24 = vrot.slane %v1933_v51, %v3125_v53  ;;  %v1948_v27 = vrot.slane %v1934_v22, %v3125_v53 }
 0x4af   :  { %v1787_v31 = vpop.f32.mrb[36].mxu1  ;;  %v1741_v9 = vpop.f32.mrb[20].mxu0 }
 0x4b0   :  { %v2778_v28 = vpop.f32.mrb[37].mxu1  ;;  %v2021_v32 = vcombine.low %v1925_v23, %v1932_v54  ;;  %v2608_v41 = vcombine.high %v1925_v23, %v1932_v54  ;;  %v2037_v29 = vcombine.low %v1941_v24, %v1948_v27  ;;  %v2609_v33 = vcombine.high %v1941_v24, %v1948_v27  ;;  %v2772_v34 = vpop.f32.mrb[21].mxu0  ;;  %v2864_v23 = vld [vmem:[%s3569_s5] sm:$0xff]  }
 0x4b1   :  { %v1790_v42 = vpop.f32.mrb[38].mxu1  ;;  %v1744_v25 = vpop.f32.mrb[22].mxu0  ;;  %2793 = vmatpush3.bf16.msra.mxu0 %v2864_v23 }
 0x4b2   :  { %v2779_v35 = vpop.f32.mrb[39].mxu1  ;;  %v2028_v37 = vrot.slane %v2021_v32, %v3107_v36  ;;  %v2036_v38 = vrot.slane %v2608_v41, %v3107_v36  ;;  %v2044_v13 = vrot.slane %v2037_v29, %v3107_v36  ;;  %v2052_v40 = vrot.slane %v2609_v33, %v3107_v36  ;;  %v2773_v43 = vpop.f32.mrb[23].mxu0  ;;  %2794 = vmatprep.subr.bf16.mxu0 %v2967_v1  ;;  %v2865_v25 = vld [vmem:[%s3569_s5 + $0x8] sm:$0xff]  }
 0x4b4   :  { %v2054_v44 = vcombine.high %v2028_v37, %v2036_v38  ;;  %v2070_v45 = vcombine.high %v2044_v13, %v2052_v40  ;;  %v2053_v46 = vcombine.low %v2028_v37, %v2036_v38  ;;  %v2069_v47 = vcombine.low %v2044_v13, %v2052_v40 }
 0x4b5   :  { %2795 = vmatpush3.bf16.msra.mxu0 %v2865_v25 }
 0x4b6   :  { %v2068_v15 = vrot.slane %v2054_v44, %v3125_v53  ;;  %v2084_v48 = vrot.slane %v2070_v45, %v3125_v53  ;;  %v3423_v49 = vrot.slane %v2053_v46, %v3125_v53  ;;  %v3426_v17 = vrot.slane %v2069_v47, %v3125_v53  ;;  %2808 = vmatprep.subr.bf16.mxu0 %v2967_v1 }
 0x4b7   :  { %v1879_v10 = vpop.f32.mrb[40].mxu1  ;;  %v1833_v52 = vpop.f32.mrb[24].mxu0 }
 0x4b8   :  { %v1969_v56 = vcombine.low %v1787_v31, %v1879_v10  ;;  %v1970_v26 = vcombine.high %v1787_v31, %v1879_v10  ;;  %v2790_v50 = vpop.f32.mrb[41].mxu1  ;;  %v1953_v57 = vcombine.low %v1741_v9, %v1833_v52  ;;  %v1954_v58 = vcombine.high %v1741_v9, %v1833_v52  ;;  %v2784_v59 = vpop.f32.mrb[25].mxu0 }
 0x4b9   :  { %v1882_v60 = vpop.f32.mrb[42].mxu1  ;;  %v2087_v61 = vcombine.low %v2068_v15, %v2084_v48  ;;  %v2085_v62 = vcombine.low %v3423_v49, %v3426_v17  ;;  %v1836_v2 = vpop.f32.mrb[26].mxu0  ;;  %v2086_v39 = vcombine.high %v3423_v49, %v3426_v17  ;;  %v2088_v30 = vcombine.high %v2068_v15, %v2084_v48 }
 0x4ba   :  { %v1977_v63 = vrot.slane %v1969_v56, %v3107_v36  ;;  %v1984_v0 = vrot.slane %v1970_v26, %v3107_v36  ;;  %v2791_v3 = vpop.f32.mrb[43].mxu1  ;;  %v1961_v4 = vrot.slane %v1953_v57, %v3107_v36  ;;  %v1968_v6 = vrot.slane %v1954_v58, %v3107_v36  ;;  %v2785_v55 = vpop.f32.mrb[27].mxu0  ;;  %v3466_v60 = vld [vmem:[%s3572_s8] sm:$0xff] }
 0x4bb   :  { %v2196_v59 = vsub.s32 1, %v3081_v8 }
 0x4bc   :  { %v1985_v5 = vcombine.low %v1961_v4, %v1977_v63  ;;  %v1986_v11 = vcombine.high %v1961_v4, %v1977_v63  ;;  %v2001_v14 = vcombine.low %v1968_v6, %v1984_v0  ;;  %v2002_v16 = vcombine.high %v1968_v6, %v1984_v0 }
 0x4be   :  { %v1993_v18 = vrot.slane %v1985_v5, %v3125_v53  ;;  %v2000_v19 = vrot.slane %v1986_v11, %v3125_v53  ;;  %v2009_v20 = vrot.slane %v2001_v14, %v3125_v53  ;;  %v2016_v7 = vrot.slane %v2002_v16, %v3125_v53 }
 0x4c0   :  { %v2089_v21 = vcombine.low %v1993_v18, %v2000_v19  ;;  %v2610_v12 = vcombine.high %v1993_v18, %v2000_v19  ;;  %v2105_v51 = vcombine.low %v2009_v20, %v2016_v7  ;;  %v2611_v22 = vcombine.high %v2009_v20, %v2016_v7 }
 0x4c2   :  { %v2096_v54 = vrot.slane %v2089_v21, %v3107_v36  ;;  %v2104_v24 = vrot.slane %v2610_v12, %v3107_v36  ;;  %v2112_v27 = vrot.slane %v2105_v51, %v3107_v36  ;;  %v2120_v31 = vrot.slane %v2611_v22, %v3107_v36 }
 0x4c4   :  { %v2122_v9 = vcombine.high %v2096_v54, %v2104_v24  ;;  %v2138_v28 = vcombine.high %v2112_v27, %v2120_v31  ;;  %v2121_v32 = vcombine.low %v2096_v54, %v2104_v24  ;;  %v2137_v41 = vcombine.low %v2112_v27, %v2120_v31  ;;  %v2866_v54 = vld [vmem:[%s3570_s6] sm:$0xff]   ;;  %v2867_v24 = vld [vmem:[%s3570_s6 + $0x8] sm:$0xff]  }
 0x4c5   :  { %2801 = vmatpush3.bf16.msra.mxu1 %v2866_v54  ;;  %v2868_v27 = vld [vmem:[%s3571_s7] sm:$0xff]   ;;  %v2869_v31 = vld [vmem:[%s3571_s7 + $0x8] sm:$0xff]  }
 0x4c6   :  { %v2136_v29 = vrot.slane %v2122_v9, %v3125_v53  ;;  %v2152_v33 = vrot.slane %v2138_v28, %v3125_v53  ;;  %v2129_v34 = vrot.slane %v2121_v32, %v3125_v53  ;;  %v2145_v42 = vrot.slane %v2137_v41, %v3125_v53  ;;  %2802 = vmatprep.subr.bf16.mxu1 %v2967_v1  ;;  %v2870_v9 = vld [vmem:[%s3571_s7 + $0x10] sm:$0xff]   ;;  %v2871_v28 = vld [vmem:[%s3571_s7 + $0x18] sm:$0xff]   ;;  %v2872_v32 = vld [vmem:[%s3571_s7 + $0x20] sm:$0xff]  }
 0x4c7   :  { %v2873_v41 = vld [vmem:[%s3571_s7 + $0x28] sm:$0xff]  }
 0x4c8   :  { %v2155_v36 = vcombine.low %v2136_v29, %v2152_v33  ;;  %v2154_v35 = vcombine.high %v2129_v34, %v2145_v42  ;;  %v2153_v37 = vcombine.low %v2129_v34, %v2145_v42  ;;  %v2156_v38 = vcombine.high %v2136_v29, %v2152_v33 }
 0x4c9   :  { %2803 = vmatpush3.bf16.msra.mxu1 %v2867_v24 }
 0x4ca   :  { %v2848_v13 = vpack.i.bf16 %v2155_v36, %v2087_v61  ;;  %v2843_v40 = vpack.i.bf16 %v2154_v35, %v2086_v39  ;;  %v2853_v43 = vpack.i.bf16 %v2156_v38, %v2088_v30  ;;  %v2197_v61 = vrot.slane %v3466_v60, %v2196_v59 }
 0x4cb   :  { %v2287_v35 = vsub.s32 2, %v3081_v8  ;;  %v2293_v38 = vsub.s32 3, %v3081_v8 }
 0x4cc   :  { %2849 = vrot.lane.b32.xlu0 %v2848_v13, %s2976_s26  ;;  %2844 = vrot.lane.b32.xlu1 %v2843_v40, %s2977_s27 }
 0x4d0   :  { %2854 = vrot.lane.b32.xlu1 %v2853_v43, %s2978_s28 }
 0x53e   :  { %v2850_v53 = vpop.permute.xlu0 %2849  ;;  %v2845_v44 = vpop.permute.xlu1 %2844 }
 0x53f   :  { %v2847_v45 = vunpack.i.h.bf16 %v2845_v44  ;;  %v2846_v46 = vunpack.i.l.bf16 %v2845_v44  ;;  %v2852_v47 = vunpack.i.h.bf16 %v2850_v53  ;;  %v2851_v10 = vunpack.i.l.bf16 %v2850_v53 }
 0x541   :  { %v2181_v15 = vsel %vm1051_vm2, %v2085_v62, %v2846_v46  ;;  %v2182_v48 = vsel %vm1051_vm2, %v2153_v37, %v2847_v45  ;;  %v2918_v62 = vld [vmem:[%s3564_s0] sm:$0xff]   ;;  %v2288_v37 = vrot.slane %v3466_v60, %v2287_v35  ;;  %v2294_v45 = vrot.slane %v3466_v60, %v2293_v38 }
 0x542   :  { %v2855_v49 = vpop.permute.xlu1 %2854  ;;  %v2184_v56 = vsel %vm2183_vm4, %v2181_v15, %v2851_v10  ;;  %v2185_v26 = vsel %vm2183_vm4, %v2182_v48, %v2852_v47  ;;  %v2254_v63 = vunpack.c.l.bf16 %v2918_v62  ;;  %v2255_v39 = vunpack.c.h.bf16 %v2918_v62  ;;  %v2874_v48 = vld [vmem:[%s3571_s7 + $0x30] sm:$0xff]  }
 0x543   :  { %v2857_v17 = vunpack.i.h.bf16 %v2855_v49  ;;  %v2856_v52 = vunpack.i.l.bf16 %v2855_v49  ;;  %v2875_v49 = vld [vmem:[%s3571_s7 + $0x38] sm:$0xff]   ;;  %s2979_s7 = smov [#allocation4]  }
 0x545   :  { %v2187_v50 = vsel %vm2186_vm5, %v2184_v56, %v2856_v52  ;;  %v2188_v57 = vsel %vm2186_vm5, %v2185_v26, %v2857_v17  ;;  %v2615_v17 = vld [vmem:[%s3574_s10] ss:$0 sm:$0xff]  ;;  %s2554_s10 = sshll.u32 %s2979_s7, 4  ;;  %s2555_s10 = int_to_ptr.vmem [resolvable:$true] %s2554_s10 }
 0x546   :  { %v2189_v58 = vpack.c.bf16 %v2188_v57, %v2187_v50  ;;  %s2919_s5 = scalar_lea.vmem %s2555_s10, 256  ;;  %p2924_p1 = scmp.lt.s32.totalorder %s2555_s10, %s2555_s10 }
 0x547   :  { %p2920_p0 = scmp.ne.s32.totalorder %s2555_s10, %s2919_s5  ;;  %p2925_p2 = scmp.lt.s32.totalorder %s2919_s5, %s2919_s5 }
 0x548   :  { %2797 = vmatmul.mubr.msk.bf16.vlgmr.msra.gmra.mrb[28].mxu0 %vm75_vm1, %v2189_v58 }
 0x549   :  { %2824 = vmatprep.mubr.msk.bf16.mxu0 %vm2968_vm0, %v2967_v1  ;;  %2809 = vmatpush3.bf16.msra.mxu0 %v2868_v27  ;;  %p2926_p3 = por %p2925_p2, %p2924_p1 }
 0x54a   :  { %2810 = vmatprep.subr.bf16.mxu0 %v2967_v1 }
 0x54b   :  { %p2927_p4 = pnand %p2926_p3, %p2920_p0 }
 0x54d   :  { %2811 = vmatpush3.bf16.msra.mxu0 %v2869_v31 }
 0x54e   :  { %2812 = vmatprep.subr.bf16.mxu0 %v2967_v1 }
 0x551   :  { %2813 = vmatpush3.bf16.msra.mxu0 %v2870_v9 }
 0x552   :  { %2814 = vmatprep.subr.bf16.mxu0 %v2967_v1 }
 0x555   :  { %2815 = vmatpush3.bf16.msra.mxu0 %v2871_v28 }
 0x556   :  { %2816 = vmatprep.subr.bf16.mxu0 %v2967_v1 }
 0x559   :  { %2817 = vmatpush3.bf16.msra.mxu0 %v2872_v32 }
 0x55a   :  { %2818 = vmatprep.subr.bf16.mxu0 %v2967_v1 }
 0x55d   :  { %2819 = vmatpush3.bf16.msra.mxu0 %v2873_v41 }
 0x55e   :  { %2820 = vmatprep.subr.bf16.mxu0 %v2967_v1 }
 0x561   :  { %2821 = vmatpush3.bf16.msra.mxu0 %v2874_v48 }
 0x562   :  { %2822 = vmatprep.subr.bf16.mxu0 %v2967_v1 }
 0x565   :  { %2823 = vmatpush3.bf16.msra.mxu0 %v2875_v49 }
 0x61b   :  { %v2247_v0 = vpop.f32.mrb[28].mxu0 }
 0x61c   :  { %v2248_v2 = vadd.f32 %v2247_v0, %v2197_v61  ;;  %v2798_v3 = vpop.f32.mrb[29].mxu0 }
 0x61d   :  { %v2250_v30 = vpop.f32.mrb[30].mxu0 }
 0x61e   :  { %v2251_v4 = vadd.f32 %v2250_v30, %v2197_v61  ;;  %v2799_v6 = vpop.f32.mrb[31].mxu0  ;;  %v2256_v55 = vadd.f32 %v2254_v63, %v2248_v2  ;;  %v2385_v63 = vsub.s32 4, %v3081_v8 }
 0x620   :  { %v2258_v5 = vsel %vm75_vm1, %v2256_v55, 0.0  ;;  %v2257_v11 = vadd.f32 %v2255_v39, %v2251_v4  ;;  %v2386_v0 = vrot.slane %v3466_v60, %v2385_v63 }
 0x621   :  { %2259 = vadd.xlane.f32.xlu1 %v2258_v5 }
 0x622   :  { %v2261_v14 = vsel %vm75_vm1, %v2257_v11, 0.0 }
 0x623   :  { %2262 = vadd.xlane.f32.xlu0 %v2261_v14 }
 0x6ae   :  { %v2260_v16 = vpop.xlane.xlu1 %2259 }
 0x6af   :  { %v2265_v18 = vmul.f32 0.03125, %v2260_v16 }
 0x6b0   :  { %v2263_v19 = vpop.xlane.xlu0 %2262 }
 0x6b1   :  { %v2267_v20 = vsub.f32 %v2256_v55, %v2265_v18  ;;  %v2266_v7 = vmul.f32 0.03125, %v2263_v19 }
 0x6b3   :  { %v2268_v21 = vsub.f32 %v2257_v11, %v2266_v7  ;;  %v2269_v12 = vmul.f32 %v2267_v20, %v2267_v20 }
 0x6b5   :  { %v2271_v51 = vsel %vm75_vm1, %v2269_v12, 0.0  ;;  %v2270_v22 = vmul.f32 %v2268_v21, %v2268_v21 }
 0x6b6   :  { %2272 = vadd.xlane.f32.xlu0 %v2271_v51 }
 0x6b7   :  { %v2274_v23 = vsel %vm75_vm1, %v2270_v22, 0.0 }
 0x6b8   :  { %2275 = vadd.xlane.f32.xlu1 %v2274_v23 }
 0x743   :  { %v2273_v29 = vpop.xlane.xlu0 %2272 }
 0x744   :  { %v2277_v33 = vmul.f32 0.03125, %v2273_v29 }
 0x745   :  { %v2276_v34 = vpop.xlane.xlu1 %2275 }
 0x746   :  { %v2279_v42 = vadd.f32 1e-05, %v2277_v33  ;;  %v2278_v25 = vmul.f32 0.03125, %v2276_v34 }
 0x748   :  { %2909 = vrsqrt.f32 %v2279_v42  ;;  %v2280_v36 = vadd.f32 1e-05, %v2278_v25 }
 0x74a   :  { %2911 = vrsqrt.f32 %v2280_v36 }
 0x752   :  { %v2910_v13 = vpop.eup %2909 }
 0x753   :  { %v2283_v40 = vmul.f32 %v2910_v13, %v2267_v20 }
 0x754   :  { %v2912_v43 = vpop.eup %2911 }
 0x755   :  { %v2289_v53 = vmul.f32 %v2288_v37, %v2283_v40  ;;  %v2284_v44 = vmul.f32 %v2912_v43, %v2268_v21 }
 0x757   :  { %v2290_v46 = vmul.f32 %v2288_v37, %v2284_v44  ;;  %v2295_v47 = vadd.f32 %v2294_v45, %v2289_v53 }
 0x759   :  { %v2296_v10 = vadd.f32 %v2294_v45, %v2290_v46 }
 0x75b   :  { %v2297_v15 = vpack.c.bf16 %v2296_v10, %v2295_v47 }
 0x75d   :  { %2805 = vmatmul.mubr.msk.bf16.vlgmr.msra.gmra.mrb[44].mxu1 %vm75_vm1, %v2297_v15 }
 0x830   :  { %v2357_v52 = vpop.f32.mrb[44].mxu1 }
 0x831   :  { %v2358_v56 = vadd.f32 %v2615_v17, %v2357_v52  ;;  %v2806_v26 = vpop.f32.mrb[45].mxu1 }
 0x832   :  { %v2360_v50 = vpop.f32.mrb[46].mxu1 }
 0x833   :  { %v2361_v57 = vadd.f32 %v2615_v17, %v2360_v50  ;;  %v2807_v58 = vpop.f32.mrb[47].mxu1  ;;  %v2364_v59 = vmax.f32 %v2358_v56, 0.0 }
 0x835   :  { %v2365_v61 = vmax.f32 %v2361_v57, 0.0 }
 0x837   :  { %v2366_v62 = vpack.c.bf16 %v2365_v61, %v2364_v59 }
 0x839   :  { %2825 = vmatmul.mubr.bf16.vlgmr.msra.gmra.mrb[32].mxu0 %v2366_v62 }
 0x90c   :  { %v2469_v1 = vpop.f32.mrb[32].mxu0 }
 0x90d   :  { %v2470_v2 = vadd.f32 %v2469_v1, %v2386_v0  ;;  %v2826_v3 = vpop.f32.mrb[33].mxu0 }
 0x90e   :  { %v2472_v39 = vpop.f32.mrb[34].mxu0 }
 0x90f   :  { %v2473_v30 = vadd.f32 %v2472_v39, %v2386_v0  ;;  %v2827_v4 = vpop.f32.mrb[35].mxu0  ;;  %v2476_v6 = vadd.f32 %v2470_v2, %v2295_v47 }
 0x911   :  { %v2478_v55 = vsel %vm75_vm1, %v2476_v6, 0.0  ;;  %v2477_v5 = vadd.f32 %v2473_v30, %v2296_v10 }
 0x912   :  { %2479 = vadd.xlane.f32.xlu0 %v2478_v55 }
 0x913   :  { %v2481_v11 = vsel %vm75_vm1, %v2477_v5, 0.0 }
 0x914   :  { %2482 = vadd.xlane.f32.xlu1 %v2481_v11 }
 0x99f   :  { %v2480_v14 = vpop.xlane.xlu0 %2479 }
 0x9a0   :  { %v2484_v16 = vmul.f32 0.03125, %v2480_v14 }
 0x9a1   :  { %v2483_v18 = vpop.xlane.xlu1 %2482 }
 0x9a2   :  { %v2486_v19 = vsub.f32 %v2476_v6, %v2484_v16  ;;  %v2485_v20 = vmul.f32 0.03125, %v2483_v18 }
 0x9a4   :  { %v2487_v7 = vsub.f32 %v2477_v5, %v2485_v20  ;;  %v2488_v21 = vmul.f32 %v2486_v19, %v2486_v19 }
 0x9a6   :  { %v2490_v12 = vsel %vm75_vm1, %v2488_v21, 0.0  ;;  %v2489_v51 = vmul.f32 %v2487_v7, %v2487_v7 }
 0x9a7   :  { %2491 = vadd.xlane.f32.xlu0 %v2490_v12 }
 0x9a8   :  { %v2493_v22 = vsel %vm75_vm1, %v2489_v51, 0.0 }
 0x9a9   :  { %2494 = vadd.xlane.f32.xlu1 %v2493_v22 }
 0x9aa   :  { %2930 = shalt.err (!%p2927_p4)
}
 0x9ab   :  { %s2931_s30 = scalar_lea.hbm %s3576_s12, 256 }
 0x9ac   :  { %p2932_p5 = scmp.ne.s32.totalorder %s3576_s12, %s2931_s30  ;;  %p2935_p6 = scmp.lt.u32.totalorder %s2931_s30, %s3576_s12 }
 0x9ae   :  { %p2937_p7 = pnand %p2935_p6, %p2932_p5 }
 0x9b0   :  { %2940 = shalt.err (!%p2937_p7)
}
 0x9b1   :  { %s2980_s14 = smov 128   ;;  %v2506_v28 = vsub.s32 5, %v3081_v8  ;;  %v2512_v32 = vsub.s32 6, %v3081_v8 }
 0x9b2   :  { %2560 = dma.vmem_to_hbm [thread:$0]  %s2555_s10, 256, %s3576_s12, [#allocation5], %s2980_s14, %s2980_s14, %s2977_s27  }
 0x9b3   :  { %v2507_v41 = vrot.slane %v3466_v60, %v2506_v28  ;;  %v2513_v34 = vrot.slane %v3466_v60, %v2512_v32  ;;  %s2981_s12 = smov [#allocation2]  }
 0x9b4   :  { %s2542_s16 = sshll.u32 %s2981_s12, 4  ;;  %s2543_s16 = int_to_ptr.vmem [resolvable:$true] %s2542_s16 }
 0x9b5   :  { %s2941_s17 = scalar_lea.vmem %s2543_s16, 256  ;;  %p2946_p9 = scmp.lt.s32.totalorder %s2543_s16, %s2543_s16 }
 0x9b6   :  { %p2942_p8 = scmp.ne.s32.totalorder %s2543_s16, %s2941_s17  ;;  %p2947_p10 = scmp.lt.s32.totalorder %s2941_s17, %s2941_s17 }
 0x9b8   :  { %p2948_p11 = por %p2947_p10, %p2946_p9 }
 0x9ba   :  { %p2949_p12 = pnand %p2948_p11, %p2942_p8 }
 0xa34   :  { %v2492_v23 = vpop.xlane.xlu0 %2491 }
 0xa35   :  { %v2496_v54 = vmul.f32 0.03125, %v2492_v23 }
 0xa36   :  { %v2495_v24 = vpop.xlane.xlu1 %2494 }
 0xa37   :  { %v2498_v27 = vadd.f32 1e-05, %v2496_v54  ;;  %v2497_v31 = vmul.f32 0.03125, %v2495_v24 }
 0xa39   :  { %2913 = vrsqrt.f32 %v2498_v27  ;;  %v2499_v9 = vadd.f32 1e-05, %v2497_v31 }
 0xa3b   :  { %2915 = vrsqrt.f32 %v2499_v9 }
 0xa43   :  { %v2914_v29 = vpop.eup %2913 }
 0xa44   :  { %v2502_v33 = vmul.f32 %v2914_v29, %v2486_v19 }
 0xa45   :  { %v2916_v42 = vpop.eup %2915 }
 0xa46   :  { %v2503_v25 = vmul.f32 %v2916_v42, %v2487_v7  ;;  %v2508_v36 = vmul.f32 %v2507_v41, %v2502_v33 }
 0xa48   :  { %v2509_v35 = vmul.f32 %v2507_v41, %v2503_v25  ;;  %v2514_v37 = vadd.f32 %v2513_v34, %v2508_v36 }
 0xa4a   :  { %v2515_v38 = vadd.f32 %v2513_v34, %v2509_v35  ;;  %2516 = vst.msk [vmem:[#allocation2] sm:$0xff] %vm75_vm1, %v2514_v37 }
 0xa4c   :  { %2517 = vst.msk [vmem:[#allocation2 + $0x8] sm:$0xff] %vm75_vm1, %v2515_v38 }
 0xa4d   :  { %2952 = shalt.err (!%p2949_p12)
}
 0xa4e   :  { %s2953_s9 = scalar_lea.hbm %s3575_s11, 256 }
 0xa4f   :  { %p2954_p13 = scmp.ne.s32.totalorder %s3575_s11, %s2953_s9  ;;  %p2957_p0 = scmp.lt.u32.totalorder %s2953_s9, %s3575_s11 }
 0xa51   :  { %p2959_p1 = pnand %p2957_p0, %p2954_p13 }
 0xa53   :  { %2962 = shalt.err (!%p2959_p1)
}
 0xa54   :  { %2548 = dma.vmem_to_hbm [thread:$0]  %s2543_s16, 256, %s3575_s11, [#allocation3], %s2980_s14, %s2980_s14, %s2977_s27  }
 0xa55   :  { %2963 = dma.done.wait [#allocation3], 256  }
 0xa56   :  { %2964 = vsyncadd [#allocation3], 4294967040 }
 0xa57   :  { %2965 = dma.done.wait [#allocation5], 256  }
 0xa58   :  { %2966 = vsyncadd [#allocation5], 4294967040 }
 0xa59   :  { %2567 = vsyncpa [#allocation3], 1 }
 0xa5a   :  { %2568 = vsyncpa [#allocation5], 1 }

// kernel: tpu_custom_call.1
= control target key start
LH: loop header
LB: loop body
LE: loop exit
PB: predicated region body
PF: predicated region fallthrough
CT: control target
= control target key end

     0   :  { %18 = vsyncpa [#allocation3], 0  ;;  %v2967_v1 = vmov 0.0   ;;  %vm2968_vm0 = vmmov 0   ;;  %vm75_vm1 = vcmask 261120   ;;  %s3564_s0 = inlined_call_operand.vmem [shape: bf16[2,8,32], index: 0, kind: input, shape index: {}]   ;;  %s3565_s1 = inlined_call_operand.vmem [shape: bf16[2,8,32], index: 1, kind: input, shape index: {}]   ;;  %s3566_s2 = inlined_call_operand.vmem [shape: f32[2,1,8], index: 2, kind: input, shape index: {}]   ;;  %s3567_s3 = inlined_call_operand.vmem [shape: bf16[32,32], index: 3, kind: input, shape index: {}]   ;;  %s3568_s4 = inlined_call_operand.vmem [shape: bf16[32,64], index: 4, kind: input, shape index: {}]   ;;  %s3569_s5 = inlined_call_operand.vmem [shape: bf16[32,32], index: 5, kind: input, shape index: {}]   ;;  %s3570_s6 = inlined_call_operand.vmem [shape: bf16[32,128], index: 6, kind: input, shape index: {}]   ;;  %s3571_s7 = inlined_call_operand.vmem [shape: bf16[128,32], index: 7, kind: input, shape index: {}]   ;;  %s3572_s8 = inlined_call_operand.vmem [shape: f32[8,32], index: 8, kind: input, shape index: {}]   ;;  %s3573_s9 = inlined_call_operand.vmem [shape: f32[1,64], index: 9, kind: input, shape index: {}]   ;;  %s3574_s10 = inlined_call_operand.vmem [shape: f32[1,128], index: 10, kind: input, shape index: {}]   ;;  %s3575_s11 = inlined_call_operand.hbm [shape: f32[2,8,32], index: 11, kind: output, shape index: {0}]   ;;  %s3576_s12 = inlined_call_operand.hbm [shape: f32[2,8,8], index: 12, kind: output, shape index: {1}]  }
   0x1   :  { %v2858_v0 = vld [vmem:[%s3567_s3] sm:$0xff]   ;;  %2680 = vmatprep.subr.bf16.mxu1 %v2967_v1  ;;  %v2859_v2 = vld [vmem:[%s3567_s3 + $0x8] sm:$0xff]   ;;  %2708 = vmatprep.subr.bf16.mxu0 %v2967_v1 }
   0x2   :  { %2681 = vmatpush3.bf16.msra.mxu1 %v2858_v0  ;;  %2684 = vmatprep.mubr.msk.bf16.mxu1 %vm2968_vm0, %v2967_v1  ;;  %v43_v3 = vld [vmem:[%s3564_s0] sm:$0xff]   ;;  %v2862_v5 = vld [vmem:[%s3568_s4 + $0x8] sm:$0xff]  }
   0x3   :  { %2682 = vmatprep.subr.bf16.mxu1 %v2967_v1  ;;  %2710 = vmatprep.mubr.msk.bf16.mxu0 %vm2968_vm0, %v2967_v1  ;;  %v2861_v4 = vld [vmem:[%s3568_s4] sm:$0xff]  }
   0x4   :  { %v2863_v6 = vld [vmem:[%s3565_s1] sm:$0xff]  }
   0x6   :  { %2683 = vmatpush3.bf16.msra.mxu1 %v2859_v2 }
   0x7   :  { %2688 = vmatprep.subr.bf16.mxu1 %v2967_v1 }
   0x9   :  { %2685 = vmatmul.mubr.msk.bf16.vlgmr.msra.gmra.mrb[0].mxu1 %vm75_vm1, %v43_v3 }
   0xa   :  { %2689 = vmatpush3.bf16.msra.mxu1 %v2861_v4  ;;  %2692 = vmatprep.mubr.msk.bf16.mxu1 %vm2968_vm0, %v2967_v1 }
   0xb   :  { %2690 = vmatprep.subr.bf16.mxu1 %v2967_v1 }
   0xc   :  { %19 = vsyncpa [#allocation5], 0  ;;  %v54_v7 = vlaneseq  ;;  %v47_v10 = vld [vmem:[%s3572_s8] sm:$0xff]  ;;  %s2969_s16 = smov 104   ;;  %s2970_s17 = smov 120   ;;  %v2974_v41 = vmov 0  }
   0xd   :  { %v2573_v19 = vld [vmem:[%s3573_s9] ss:$0 sm:$0xff]  ;;  %s2971_s18 = smov 112   ;;  %v2972_v27 = vmov 1983009808   ;;  %v3115_v42 = vpack.i.b16 %v2974_v41, %v2974_v41  ;;  %vm1051_vm2 = vcmask 64512  }
   0xe   :  { %2691 = vmatpush3.bf16.msra.mxu1 %v2862_v5  ;;  %v3081_v8 = vshrl.u32 %v54_v7, 7  ;;  %v223_v28 = vunpack.c.l.s4 %v2972_v27  ;;  %v2973_v32 = vmov 1934713408   ;;  %vm1519_vm3 = vcmask 1043456   ;;  %s2976_s26 = smov 16   ;;  %s2977_s27 = smov 8  }
   0xf   :  { %2696 = vmatprep.subr.bf16.mxu1 %v2967_v1  ;;  %v254_v33 = vunpack.c.l.s4 %v2973_v32  ;;  %s2978_s28 = smov 24   ;;  %vm2183_vm4 = vcmask 130048   ;;  %vm2186_vm5 = vcmask 195584  }
  0x10   :  { %v56_v9 = vsub.s32 0, %v3081_v8  ;;  %v224_v29 = vunpack.c.0.s8 %v223_v28 }
  0x11   :  { %2693 = vmatmul.mubr.msk.bf16.vlgmr.msra.gmra.mrb[4].mxu1 %vm75_vm1, %v2863_v6  ;;  %v255_v40 = vunpack.c.0.s8 %v254_v33 }
  0x12   :  { %2698 = vmatprep.mubr.msk.bf16.mxu1 %vm2968_vm0, %v2967_v1  ;;  %v57_v11 = vrot.slane %v47_v10, %v56_v9  ;;  %v3107_v36 = vsub.s32 %v224_v29, %v3081_v8 }
  0x13   :  { %v3125_v53 = vsub.s32 %v255_v40, %v3081_v8 }
  0xdc   :  { %v113_v12 = vpop.f32.mrb[0].mxu1 }
  0xdd   :  { %v2686_v13 = vpop.f32.mrb[1].mxu1  ;;  %v114_v15 = vadd.f32 %v113_v12, %v57_v11 }
  0xde   :  { %v116_v14 = vpop.f32.mrb[2].mxu1 }
  0xdf   :  { %v117_v16 = vadd.f32 %v116_v14, %v57_v11  ;;  %v2687_v17 = vpop.f32.mrb[3].mxu1 }
  0xe1   :  { %v3087_v18 = vpack.c.bf16 %v117_v16, %v114_v15 }
  0xe3   :  { %v203_v2 = vshrl.u32 %v3087_v18, 16 }
  0xe4   :  { %v184_v20 = vpop.f32.mrb[4].mxu1 }
  0xe5   :  { %v2694_v21 = vpop.f32.mrb[5].mxu1  ;;  %v185_v23 = vadd.f32 %v2573_v19, %v184_v20 }
  0xe6   :  { %v187_v22 = vpop.f32.mrb[6].mxu1 }
  0xe7   :  { %v188_v24 = vadd.f32 %v2573_v19, %v187_v22  ;;  %v2695_v25 = vpop.f32.mrb[7].mxu1 }
  0xe9   :  { %v3092_v26 = vpack.c.bf16 %v188_v24, %v185_v23 }
  0xeb   :  { %483 = vrot.lane.b32.xlu1 %v3092_v26, %s2969_s16  ;;  %479 = vrot.lane.b32.xlu0 %v3092_v26, %s2970_s17  ;;  %v489_v35 = vshrl.u32 %v3092_v26, 16 }
  0xef   :  { %193 = vrot.lane.b32.xlu1 %v3087_v18, %s2970_s17  ;;  %481 = vrot.lane.b32.xlu0 %v3092_v26, %s2971_s18 }
  0xf3   :  { %197 = vrot.lane.b32.xlu1 %v3087_v18, %s2969_s16  ;;  %195 = vrot.lane.b32.xlu0 %v3087_v18, %s2971_s18 }
 0x15d   :  { %v3100_v30 = vpop.permute.xlu1 %483  ;;  %v3102_v31 = vpop.permute.xlu0 %479 }
 0x15e   :  { %v490_v34 = vshrl.u32 %v3102_v31, 16  ;;  %v487_v37 = vpack.i.b16 %v3102_v31, %v3092_v26  ;;  %v498_v44 = vshrl.u32 %v3100_v30, 16 }
 0x160   :  { %v491_v43 = vpack.i.b16 %v490_v34, %v489_v35  ;;  %v508_v47 = vrot.slane %v487_v37, %v3107_v36  ;;  %v501_v54 = vcombine.high %v487_v37, %v3115_v42 }
 0x161   :  { %v194_v38 = vpop.permute.xlu1 %193  ;;  %v3111_v39 = vpop.permute.xlu0 %481 }
 0x162   :  { %v495_v45 = vpack.i.b16 %v3100_v30, %v3111_v39  ;;  %v497_v46 = vshrl.u32 %v3111_v39, 16  ;;  %v574_v55 = vrot.slane %v491_v43, %v3107_v36  ;;  %v204_v56 = vshrl.u32 %v194_v38, 16 }
 0x163   :  { %v567_v0 = vcombine.high %v491_v43, %v3115_v42  ;;  %v201_v3 = vpack.i.b16 %v194_v38, %v3087_v18  ;;  %v515_v10 = vrot.slane %v501_v54, %v3107_v36 }
 0x164   :  { %v499_v48 = vpack.i.b16 %v498_v44, %v497_v46  ;;  %v516_v49 = vcombine.high %v495_v45, %v3115_v42  ;;  %v523_v50 = vrot.slane %v495_v45, %v3107_v36  ;;  %v205_v11 = vpack.i.b16 %v204_v56, %v203_v2 }
 0x165   :  { %v198_v51 = vpop.permute.xlu1 %197  ;;  %v196_v52 = vpop.permute.xlu0 %195  ;;  %v581_v15 = vrot.slane %v567_v0, %v3107_v36  ;;  %v228_v16 = vrot.slane %v201_v3, %v3107_v36  ;;  %v221_v23 = vcombine.high %v201_v3, %v3115_v42 }
 0x166   :  { %v531_v57 = vcombine.low %v508_v47, %v523_v50  ;;  %v212_v58 = vshrl.u32 %v198_v51, 16  ;;  %v209_v59 = vpack.i.b16 %v198_v51, %v196_v52  ;;  %v532_v60 = vcombine.high %v508_v47, %v523_v50 }
 0x167   :  { %v582_v61 = vcombine.high %v499_v48, %v3115_v42  ;;  %v589_v62 = vrot.slane %v499_v48, %v3107_v36  ;;  %v211_v63 = vshrl.u32 %v196_v52, 16  ;;  %v530_v4 = vrot.slane %v516_v49, %v3107_v36 }
 0x168   :  { %v539_v5 = vrot.slane %v531_v57, %v3125_v53  ;;  %v546_v6 = vrot.slane %v532_v60, %v3125_v53  ;;  %v243_v12 = vrot.slane %v209_v59, %v3107_v36  ;;  %v287_v24 = vcombine.high %v205_v11, %v3115_v42 }
 0x169   :  { %v597_v7 = vcombine.low %v574_v55, %v589_v62  ;;  %v598_v9 = vcombine.high %v574_v55, %v589_v62  ;;  %v596_v13 = vrot.slane %v582_v61, %v3107_v36  ;;  %v213_v14 = vpack.i.b16 %v212_v58, %v211_v63 }
 0x16a   :  { %v547_v17 = vcombine.low %v515_v10, %v530_v4  ;;  %v548_v18 = vcombine.high %v515_v10, %v530_v4  ;;  %v633_v21 = vcombine.low %v539_v5, %v546_v6  ;;  %v2582_v22 = vcombine.high %v539_v5, %v546_v6 }
 0x16b   :  { %v605_v19 = vrot.slane %v597_v7, %v3125_v53  ;;  %v612_v20 = vrot.slane %v598_v9, %v3125_v53  ;;  %v251_v25 = vcombine.low %v228_v16, %v243_v12  ;;  %v613_v27 = vcombine.low %v581_v15, %v596_v13 }
 0x16c   :  { %v614_v28 = vcombine.high %v581_v15, %v596_v13  ;;  %v252_v29 = vcombine.high %v228_v16, %v243_v12  ;;  %v302_v32 = vcombine.high %v213_v14, %v3115_v42  ;;  %v294_v33 = vrot.slane %v205_v11, %v3107_v36 }
 0x16d   :  { %v555_v34 = vrot.slane %v547_v17, %v3125_v53  ;;  %v562_v35 = vrot.slane %v548_v18, %v3125_v53  ;;  %v309_v37 = vrot.slane %v213_v14, %v3107_v36  ;;  %v640_v38 = vrot.slane %v633_v21, %v3107_v36 }
 0x16e   :  { %v648_v40 = vrot.slane %v2582_v22, %v3107_v36  ;;  %v658_v43 = vcombine.low %v605_v19, %v612_v20  ;;  %v236_v44 = vcombine.high %v209_v59, %v3115_v42  ;;  %v259_v45 = vrot.slane %v251_v25, %v3125_v53 }
 0x16f   :  { %v266_v46 = vrot.slane %v252_v29, %v3125_v53  ;;  %v317_v47 = vcombine.low %v294_v33, %v309_v37  ;;  %v318_v48 = vcombine.high %v294_v33, %v309_v37  ;;  %v235_v49 = vrot.slane %v221_v23, %v3107_v36 }
 0x170   :  { %v621_v50 = vrot.slane %v613_v27, %v3125_v53  ;;  %v628_v51 = vrot.slane %v614_v28, %v3125_v53  ;;  %v316_v52 = vrot.slane %v302_v32, %v3107_v36  ;;  %v301_v54 = vrot.slane %v287_v24, %v3107_v36 }
 0x171   :  { %v2583_v55 = vcombine.high %v605_v19, %v612_v20  ;;  %v325_v56 = vrot.slane %v317_v47, %v3125_v53  ;;  %v332_v57 = vrot.slane %v318_v48, %v3125_v53  ;;  %v683_v58 = vcombine.low %v555_v34, %v562_v35 }
 0x172   :  { %v250_v59 = vrot.slane %v236_v44, %v3107_v36  ;;  %v649_v60 = vcombine.low %v640_v38, %v648_v40  ;;  %v665_v61 = vrot.slane %v658_v43, %v3107_v36  ;;  %v353_v62 = vcombine.low %v259_v45, %v266_v46 }
 0x173   :  { %v2578_v63 = vcombine.high %v259_v45, %v266_v46  ;;  %v378_v0 = vcombine.low %v325_v56, %v332_v57  ;;  %v2579_v2 = vcombine.high %v325_v56, %v332_v57  ;;  %v2584_v3 = vcombine.high %v555_v34, %v562_v35 }
 0x174   :  { %v708_v4 = vcombine.low %v621_v50, %v628_v51  ;;  %v333_v5 = vcombine.low %v301_v54, %v316_v52  ;;  %v334_v6 = vcombine.high %v301_v54, %v316_v52  ;;  %v2585_v7 = vcombine.high %v621_v50, %v628_v51 }
 0x175   :  { %v385_v9 = vrot.slane %v378_v0, %v3107_v36  ;;  %v393_v10 = vrot.slane %v2579_v2, %v3107_v36  ;;  %v673_v11 = vrot.slane %v2583_v55, %v3107_v36  ;;  %v267_v12 = vcombine.low %v235_v49, %v250_v59 }
 0x176   :  { %v268_v13 = vcombine.high %v235_v49, %v250_v59  ;;  %v360_v14 = vrot.slane %v353_v62, %v3107_v36  ;;  %v368_v15 = vrot.slane %v2578_v63, %v3107_v36  ;;  %v656_v16 = vrot.slane %v649_v60, %v3125_v53 }
 0x177   :  { %v674_v17 = vcombine.low %v665_v61, %v673_v11  ;;  %v341_v18 = vrot.slane %v333_v5, %v3125_v53  ;;  %v348_v19 = vrot.slane %v334_v6, %v3125_v53  ;;  %v394_v20 = vcombine.low %v385_v9, %v393_v10 }
 0x178   :  { %v690_v21 = vrot.slane %v683_v58, %v3107_v36  ;;  %v698_v23 = vrot.slane %v2584_v3, %v3107_v36  ;;  %v715_v24 = vrot.slane %v708_v4, %v3107_v36  ;;  %v723_v25 = vrot.slane %v2585_v7, %v3107_v36 }
 0x179   :  { %v681_v22 = vrot.slane %v674_v17, %v3125_v53  ;;  %v275_v27 = vrot.slane %v267_v12, %v3125_v53  ;;  %v282_v28 = vrot.slane %v268_v13, %v3125_v53  ;;  %v369_v29 = vcombine.low %v360_v14, %v368_v15 }
 0x17a   :  { %v657_v33 = vcombine.high %v656_v16, %v2974_v41  ;;  %v428_v35 = vcombine.low %v341_v18, %v348_v19  ;;  %v2581_v37 = vcombine.high %v341_v18, %v348_v19  ;;  %v401_v38 = vrot.slane %v394_v20, %v3125_v53 }
 0x17b   :  { %v735_v32 = vpack.i.b16 %v681_v22, %v656_v16  ;;  %v682_v34 = vcombine.high %v681_v22, %v2974_v41  ;;  %v724_v40 = vcombine.low %v715_v24, %v723_v25  ;;  %v737_v45 = vshrl.u32 %v681_v22, 16 }
 0x17c   :  { %v699_v46 = vcombine.low %v690_v21, %v698_v23  ;;  %v403_v47 = vcombine.low %v275_v27, %v282_v28  ;;  %v2580_v48 = vcombine.high %v275_v27, %v282_v28  ;;  %v376_v49 = vrot.slane %v369_v29, %v3125_v53 }
 0x17d   :  { %v1056_v43 = vsel %vm1051_vm2, %v735_v32, 0  ;;  %v741_v44 = vpack.i.b16 %v682_v34, %v657_v33  ;;  %v736_v51 = vshrl.u32 %v656_v16, 16  ;;  %v731_v52 = vrot.slane %v724_v40, %v3125_v53 }
 0x17e   :  { %2697 = vmatpush3.bf16.xpose.msra.mxu1 %v1056_v43  ;;  %v435_v54 = vrot.slane %v428_v35, %v3107_v36  ;;  %v443_v55 = vrot.slane %v2581_v37, %v3107_v36  ;;  %v402_v57 = vcombine.high %v401_v38, %v2974_v41  ;;  %v706_v58 = vrot.slane %v699_v46, %v3125_v53 }
 0x17f   :  { %v1148_v50 = vsel %vm1051_vm2, %v741_v44, 0  ;;  %2702 = vmatprep.subr.bf16.mxu1 %v2967_v1  ;;  %v738_v56 = vpack.i.b16 %v737_v45, %v736_v51  ;;  %v410_v59 = vrot.slane %v403_v47, %v3107_v36  ;;  %v418_v60 = vrot.slane %v2580_v48, %v3107_v36  ;;  %v2590_v48 = vld [vmem:[%s3566_s2] ss:$0 sm:$0xff] }
 0x180   :  { %2709 = vmatpush3.bf16.xpose.msra.mxu0 %v1148_v50  ;;  %v455_v61 = vpack.i.b16 %v401_v38, %v376_v49  ;;  %v377_v62 = vcombine.high %v376_v49, %v2974_v41  ;;  %v747_v63 = vpack.i.b16 %v731_v52, %v706_v58  ;;  %v444_v0 = vcombine.low %v435_v54, %v443_v55 }
 0x181   :  { %2720 = vmatprep.subr.bf16.mxu0 %v2967_v1  ;;  %v743_v2 = vshrl.u32 %v682_v34, 16  ;;  %v1102_v3 = vsel %vm1051_vm2, %v738_v56, 0  ;;  %v419_v5 = vcombine.low %v410_v59, %v418_v60  ;;  %v742_v6 = vshrl.u32 %v657_v33, 16 }
 0x182   :  { %v461_v4 = vpack.i.b16 %v402_v57, %v377_v62  ;;  %v1240_v7 = vsel %vm1051_vm2, %v747_v63, 0  ;;  %v457_v9 = vshrl.u32 %v401_v38, 16  ;;  %v732_v10 = vcombine.high %v731_v52, %v2974_v41  ;;  %v2591_v63 = vld [vmem:[%s3566_s2 + $0x1] ss:$0 sm:$0xff]  ;;  %s2975_s2 = smov 96  }
 0x183   :  { %v456_v11 = vshrl.u32 %v376_v49, 16  ;;  %v744_v12 = vpack.i.b16 %v743_v2, %v742_v6  ;;  %v451_v13 = vrot.slane %v444_v0, %v3125_v53  ;;  %v707_v14 = vcombine.high %v706_v58, %v2974_v41 }
 0x184   :  { %v426_v16 = vrot.slane %v419_v5, %v3125_v53  ;;  %v749_v20 = vshrl.u32 %v731_v52, 16  ;;  %v463_v21 = vshrl.u32 %v402_v57, 16  ;;  %v748_v23 = vshrl.u32 %v706_v58, 16 }
 0x185   :  { %2699 = vmatmul.mubr.msk.bf16.vlgmr.msra.gmra.mrb[8].mxu1 %vm1051_vm2, %v455_v61  ;;  %v458_v15 = vpack.i.b16 %v457_v9, %v456_v11  ;;  %v753_v17 = vpack.i.b16 %v732_v10, %v707_v14  ;;  %v1194_v18 = vsel %vm1051_vm2, %v744_v12, 0  ;;  %v462_v24 = vshrl.u32 %v377_v62, 16 }
 0x186   :  { %2703 = vmatpush3.bf16.xpose.msra.mxu1 %v1102_v3  ;;  %2704 = vmatprep.mubr.msk.bf16.mxu1 %vm2968_vm0, %v2967_v1  ;;  %v467_v19 = vpack.i.b16 %v451_v13, %v426_v16  ;;  %v750_v25 = vpack.i.b16 %v749_v20, %v748_v23  ;;  %v452_v27 = vcombine.high %v451_v13, %v2974_v41  ;;  %v755_v34 = vshrl.u32 %v732_v10, 16 }
 0x187   :  { %2711 = vmatmul.mubr.msk.bf16.vlgmr.msra.gmra.mrb[0].mxu0 %vm1051_vm2, %v461_v4  ;;  %2714 = vmatprep.subr.bf16.mxu1 %v2967_v1  ;;  %v1332_v22 = vsel %vm1051_vm2, %v753_v17, 0  ;;  %v464_v28 = vpack.i.b16 %v463_v21, %v462_v24  ;;  %v427_v29 = vcombine.high %v426_v16, %v2974_v41  ;;  %v469_v35 = vshrl.u32 %v451_v13, 16 }
 0x188   :  { %2721 = vmatpush3.bf16.xpose.msra.mxu0 %v1240_v7  ;;  %2722 = vmatprep.mubr.msk.bf16.mxu0 %vm2968_vm0, %v2967_v1  ;;  %v1286_v32 = vsel %vm1051_vm2, %v750_v25, 0  ;;  %v754_v37 = vshrl.u32 %v707_v14, 16  ;;  %v468_v38 = vshrl.u32 %v426_v16, 16  ;;  %v475_v45 = vshrl.u32 %v452_v27, 16 }
 0x189   :  { %2732 = vmatprep.subr.bf16.mxu0 %v2967_v1  ;;  %v473_v33 = vpack.i.b16 %v452_v27, %v427_v29  ;;  %v474_v46 = vshrl.u32 %v427_v29, 16 }
 0x18a   :  { %v756_v40 = vpack.i.b16 %v755_v34, %v754_v37  ;;  %v470_v43 = vpack.i.b16 %v469_v35, %v468_v38 }
 0x18b   :  { %v476_v47 = vpack.i.b16 %v475_v45, %v474_v46 }
 0x18c   :  { %v1378_v44 = vsel %vm1051_vm2, %v756_v40, 0 }
 0x18d   :  { %2705 = vmatmul.mubr.msk.bf16.vlgmr.msra.gmra.mrb[12].mxu1 %vm1051_vm2, %v458_v15 }
 0x18e   :  { %2715 = vmatpush3.bf16.xpose.msra.mxu1 %v1194_v18  ;;  %2716 = vmatprep.mubr.msk.bf16.mxu1 %vm2968_vm0, %v2967_v1 }
 0x18f   :  { %2723 = vmatmul.mubr.msk.bf16.vlgmr.msra.gmra.mrb[4].mxu0 %vm1051_vm2, %v467_v19  ;;  %2726 = vmatprep.subr.bf16.mxu1 %v2967_v1 }
 0x190   :  { %2733 = vmatpush3.bf16.xpose.msra.mxu0 %v1332_v22  ;;  %2734 = vmatprep.mubr.msk.bf16.mxu0 %vm2968_vm0, %v2967_v1 }
 0x191   :  { %2744 = vmatprep.subr.bf16.mxu0 %v2967_v1 }
 0x195   :  { %2717 = vmatmul.mubr.msk.bf16.vlgmr.msra.gmra.mrb[16].mxu1 %vm1051_vm2, %v464_v28 }
 0x196   :  { %2727 = vmatpush3.bf16.xpose.msra.mxu1 %v1286_v32  ;;  %2728 = vmatprep.mubr.msk.bf16.mxu1 %vm2968_vm0, %v2967_v1 }
 0x197   :  { %2735 = vmatmul.mubr.msk.bf16.vlgmr.msra.gmra.mrb[8].mxu0 %vm1051_vm2, %v473_v33  ;;  %2738 = vmatprep.subr.bf16.mxu1 %v2967_v1 }
 0x198   :  { %2746 = vmatprep.mubr.msk.bf16.mxu0 %vm2968_vm0, %v2967_v1 }
 0x19d   :  { %2729 = vmatmul.mubr.msk.bf16.vlgmr.msra.gmra.mrb[20].mxu1 %vm1051_vm2, %v470_v43 }
 0x19e   :  { %2739 = vmatpush3.bf16.xpose.msra.mxu1 %v1378_v44  ;;  %2740 = vmatprep.mubr.msk.bf16.mxu1 %vm2968_vm0, %v2967_v1 }
 0x19f   :  { %2750 = vmatprep.subr.bf16.mxu1 %v2967_v1 }
 0x1a5   :  { %2741 = vmatmul.mubr.msk.bf16.vlgmr.msra.gmra.mrb[24].mxu1 %vm1051_vm2, %v476_v47 }
 0x1a6   :  { %2752 = vmatprep.mubr.msk.bf16.mxu1 %vm2968_vm0, %v2967_v1 }
 0x258   :  { %v1092_v49 = vpop.f32.mrb[8].mxu1 }
 0x259   :  { %v1093_v50 = vadd.f32 %v2590_v48, %v1092_v49  ;;  %v2700_v51 = vpop.f32.mrb[9].mxu1 }
 0x25a   :  { %v1095_v52 = vpop.f32.mrb[10].mxu1  ;;  %v1184_v54 = vpop.f32.mrb[0].mxu0 }
 0x25b   :  { %v3241_v55 = vadd.f32 %v2590_v48, %v1184_v54  ;;  %v2701_v56 = vpop.f32.mrb[11].mxu1  ;;  %v2712_v57 = vpop.f32.mrb[1].mxu0  ;;  %v1420_v58 = vsel %vm1051_vm2, %v1093_v50, -inf }
 0x25c   :  { %v1187_v59 = vpop.f32.mrb[2].mxu0  ;;  %1421 = vmax.xlane.f32.xlu0 %v1420_v58 }
 0x25d   :  { %v2713_v60 = vpop.f32.mrb[3].mxu0  ;;  %v1426_v61 = vsel %vm1051_vm2, %v3241_v55, -inf }
 0x260   :  { %1427 = vmax.xlane.f32.xlu0 %v1426_v61  ;;  %v1138_v62 = vpop.f32.mrb[12].mxu1 }
 0x261   :  { %v1139_v0 = vadd.f32 %v2590_v48, %v1138_v62  ;;  %v2706_v2 = vpop.f32.mrb[13].mxu1 }
 0x262   :  { %v1141_v3 = vpop.f32.mrb[14].mxu1  ;;  %v1276_v4 = vpop.f32.mrb[4].mxu0 }
 0x263   :  { %v3249_v5 = vadd.f32 %v2591_v63, %v1276_v4  ;;  %v2707_v6 = vpop.f32.mrb[15].mxu1  ;;  %v2724_v7 = vpop.f32.mrb[5].mxu0  ;;  %v1423_v9 = vsel %vm1051_vm2, %v1139_v0, -inf }
 0x264   :  { %v1279_v10 = vpop.f32.mrb[6].mxu0  ;;  %1424 = vmax.xlane.f32.xlu1 %v1423_v9 }
 0x265   :  { %v2725_v11 = vpop.f32.mrb[7].mxu0  ;;  %v1432_v12 = vsel %vm1051_vm2, %v3249_v5, -inf }
 0x268   :  { %1433 = vmax.xlane.f32.xlu1 %v1432_v12  ;;  %v1230_v13 = vpop.f32.mrb[16].mxu1 }
 0x269   :  { %v1231_v14 = vadd.f32 %v2590_v48, %v1230_v13  ;;  %v2718_v15 = vpop.f32.mrb[17].mxu1 }
 0x26a   :  { %v1233_v16 = vpop.f32.mrb[18].mxu1  ;;  %v1368_v17 = vpop.f32.mrb[8].mxu0 }
 0x26b   :  { %v1369_v18 = vadd.f32 %v2591_v63, %v1368_v17  ;;  %v2719_v19 = vpop.f32.mrb[19].mxu1  ;;  %v2736_v20 = vpop.f32.mrb[9].mxu0  ;;  %v1429_v21 = vsel %vm1051_vm2, %v1231_v14, -inf }
 0x26c   :  { %v1371_v22 = vpop.f32.mrb[10].mxu0  ;;  %1430 = vmax.xlane.f32.xlu0 %v1429_v21 }
 0x26d   :  { %v2737_v23 = vpop.f32.mrb[11].mxu0  ;;  %v1438_v24 = vsel %vm1051_vm2, %v1369_v18, -inf }
 0x26e   :  { %1439 = vmax.xlane.f32.xlu1 %v1438_v24 }
 0x270   :  { %v1322_v25 = vpop.f32.mrb[20].mxu1 }
 0x271   :  { %v1323_v27 = vadd.f32 %v2591_v63, %v1322_v25  ;;  %v2730_v28 = vpop.f32.mrb[21].mxu1 }
 0x272   :  { %v1325_v29 = vpop.f32.mrb[22].mxu1 }
 0x273   :  { %v2731_v32 = vpop.f32.mrb[23].mxu1  ;;  %v1435_v33 = vsel %vm1051_vm2, %v1323_v27, -inf }
 0x274   :  { %1436 = vmax.xlane.f32.xlu0 %v1435_v33 }
 0x278   :  { %v1414_v34 = vpop.f32.mrb[24].mxu1 }
 0x279   :  { %v1415_v35 = vadd.f32 %v2591_v63, %v1414_v34  ;;  %v2742_v37 = vpop.f32.mrb[25].mxu1 }
 0x27a   :  { %v1417_v38 = vpop.f32.mrb[26].mxu1 }
 0x27b   :  { %v2743_v40 = vpop.f32.mrb[27].mxu1  ;;  %v1441_v43 = vsel %vm1051_vm2, %v1415_v35, -inf }
 0x27c   :  { %1442 = vmax.xlane.f32.xlu0 %v1441_v43 }
 0x27f   :  { %757 = vrot.lane.b32.xlu1 %v3092_v26, %s2975_s2 }
 0x2e9   :  { %v1422_v44 = vpop.xlane.xlu0 %1421 }
 0x2ea   :  { %v1444_v45 = vsub.f32 %v1093_v50, %v1422_v44 }
 0x2ec   :  { %v1452_v46 = vmul.f32 1.442695, %v1444_v45 }
 0x2ed   :  { %v1428_v26 = vpop.xlane.xlu0 %1427 }
 0x2ee   :  { %2877 = vpow2.f32 %v1452_v46  ;;  %v1446_v60 = vsub.f32 %v3241_v55, %v1428_v26 }
 0x2f0   :  { %v1456_v63 = vmul.f32 1.442695, %v1446_v60 }
 0x2f1   :  { %v1425_v47 = vpop.xlane.xlu1 %1424 }
 0x2f2   :  { %v1445_v48 = vsub.f32 %v1139_v0, %v1425_v47 }
 0x2f4   :  { %v1454_v49 = vmul.f32 1.442695, %v1445_v48 }
 0x2f5   :  { %v1434_v50 = vpop.xlane.xlu1 %1433 }
 0x2f6   :  { %2879 = vpow2.f32 %v1454_v49  ;;  %v1448_v0 = vsub.f32 %v3249_v5, %v1434_v50 }
 0x2f8   :  { %v3259_v51 = vpop.eup %2877 }
 0x2f9   :  { %v1468_v52 = vsel %vm1051_vm2, %v3259_v51, 0.0  ;;  %v1431_v57 = vpop.xlane.xlu0 %1430 }
 0x2fa   :  { %1469 = vadd.xlane.f32.xlu1 %v1468_v52  ;;  %v1447_v58 = vsub.f32 %v1231_v14, %v1431_v57 }
 0x2fb   :  { %v1440_v59 = vpop.xlane.xlu1 %1439 }
 0x2fc   :  { %v1458_v61 = vmul.f32 1.442695, %v1447_v58  ;;  %v1450_v62 = vsub.f32 %v1369_v18, %v1440_v59 }
 0x2fe   :  { %2881 = vpow2.f32 %v1458_v61  ;;  %v1464_v2 = vmul.f32 1.442695, %v1450_v62 }
 0x2ff   :  { %2883 = vpow2.f32 %v1456_v63  ;;  %v758_v19 = vpop.permute.xlu1 %757 }
 0x300   :  { %v3263_v54 = vpop.eup %2879  ;;  %2885 = vpow2.f32 %v1464_v2  ;;  %v769_v32 = vshrl.u32 %v758_v19, 16 }
 0x301   :  { %v1471_v56 = vsel %vm1051_vm2, %v3263_v54, 0.0  ;;  %v1437_v3 = vpop.xlane.xlu0 %1436 }
 0x302   :  { %1472 = vadd.xlane.f32.xlu0 %v1471_v56 }
 0x308   :  { %v3272_v7 = vpop.eup %2881 }
 0x309   :  { %v1443_v4 = vpop.xlane.xlu0 %1442  ;;  %v3274_v9 = vpop.eup %2883  ;;  %v1477_v5 = vsel %vm1051_vm2, %v3272_v7, 0.0 }
 0x30a   :  { %v1451_v6 = vsub.f32 %v1415_v35, %v1443_v4  ;;  %v3278_v10 = vpop.eup %2885  ;;  %v1474_v12 = vsel %vm1051_vm2, %v3274_v9, 0.0 }
 0x30b   :  { %761 = vrot.lane.b32.xlu1 %v3111_v39, %s2975_s2  ;;  %v1460_v39 = vmul.f32 1.442695, %v1448_v0  ;;  %v1486_v11 = vsel %vm1051_vm2, %v3278_v10, 0.0 }
 0x30c   :  { %v1466_v55 = vmul.f32 1.442695, %v1451_v6 }
 0x30d   :  { %2887 = vpow2.f32 %v1460_v39 }
 0x30f   :  { %763 = vrot.lane.b32.xlu1 %v3100_v30, %s2975_s2  ;;  %v1449_v30 = vsub.f32 %v1323_v27, %v1437_v3 }
 0x317   :  { %v3284_v13 = vpop.eup %2887 }
 0x318   :  { %759 = vrot.lane.b32.xlu0 %v3102_v31, %s2975_s2  ;;  %v1462_v31 = vmul.f32 1.442695, %v1449_v30  ;;  %v1480_v14 = vsel %vm1051_vm2, %v3284_v13, 0.0 }
 0x31a   :  { %2889 = vpow2.f32 %v1462_v31 }
 0x31b   :  { %2891 = vpow2.f32 %v1466_v55 }
 0x324   :  { %v3288_v15 = vpop.eup %2889 }
 0x325   :  { %v1483_v16 = vsel %vm1051_vm2, %v3288_v15, 0.0  ;;  %v3292_v17 = vpop.eup %2891 }
 0x326   :  { %v1489_v18 = vsel %vm1051_vm2, %v3292_v17, 0.0 }
 0x333   :  { %1478 = vadd.xlane.f32.xlu1 %v1477_v5 }
 0x337   :  { %1487 = vadd.xlane.f32.xlu1 %v1486_v11  ;;  %1475 = vadd.xlane.f32.xlu0 %v1474_v12 }
 0x33b   :  { %1481 = vadd.xlane.f32.xlu0 %v1480_v14 }
 0x33f   :  { %1484 = vadd.xlane.f32.xlu0 %v1483_v16 }
 0x343   :  { %1490 = vadd.xlane.f32.xlu0 %v1489_v18 }
 0x387   :  { %v1470_v20 = vpop.xlane.xlu1 %1469 }
 0x388   :  { %2893 = vrcp.f32 %v1470_v20 }
 0x38b   :  { %v762_v21 = vpop.permute.xlu1 %761 }
 0x38c   :  { %v777_v27 = vshrl.u32 %v762_v21, 16 }
 0x38f   :  { %v764_v22 = vpop.permute.xlu1 %763  ;;  %v1473_v23 = vpop.xlane.xlu0 %1472 }
 0x390   :  { %v778_v24 = vshrl.u32 %v764_v22, 16  ;;  %v3296_v25 = vpack.i.b16 %v764_v22, %v762_v21  ;;  %2895 = vrcp.f32 %v1473_v23 }
 0x392   :  { %v779_v33 = vpack.i.b16 %v778_v24, %v777_v27  ;;  %v803_v35 = vrot.slane %v3296_v25, %v3107_v36  ;;  %v2894_v2 = vpop.eup %2893  ;;  %v796_v27 = vcombine.high %v3296_v25, %v3115_v42 }
 0x393   :  { %v760_v28 = vpop.permute.xlu0 %759  ;;  %v3318_v31 = vmul.f32 %v2894_v2, %v3259_v51 }
 0x394   :  { %v3298_v29 = vpack.i.b16 %v760_v28, %v758_v19  ;;  %v770_v34 = vshrl.u32 %v760_v28, 16  ;;  %v869_v44 = vrot.slane %v779_v33, %v3107_v36  ;;  %v862_v51 = vcombine.high %v779_v33, %v3115_v42 }
 0x395   :  { %v810_v25 = vrot.slane %v796_v27, %v3107_v36 }
 0x396   :  { %v788_v37 = vrot.slane %v3298_v29, %v3107_v36  ;;  %v771_v38 = vpack.i.b16 %v770_v34, %v769_v32  ;;  %v781_v22 = vcombine.high %v3298_v29, %v3115_v42  ;;  %v876_v33 = vrot.slane %v862_v51, %v3107_v36 }
 0x398   :  { %v811_v40 = vcombine.low %v788_v37, %v803_v35  ;;  %v812_v43 = vcombine.high %v788_v37, %v803_v35  ;;  %v854_v45 = vrot.slane %v771_v38, %v3107_v36  ;;  %v847_v14 = vcombine.high %v771_v38, %v3115_v42 }
 0x399   :  { %v795_v34 = vrot.slane %v781_v22, %v3107_v36 }
 0x39a   :  { %v819_v46 = vrot.slane %v811_v40, %v3125_v53  ;;  %v826_v47 = vrot.slane %v812_v43, %v3125_v53  ;;  %v877_v48 = vcombine.low %v854_v45, %v869_v44  ;;  %v878_v49 = vcombine.high %v854_v45, %v869_v44  ;;  %v2896_v30 = vpop.eup %2895 }
 0x39b   :  { %v3322_v12 = vmul.f32 %v2896_v30, %v3263_v54  ;;  %v1508_v54 = vpack.c.bf16 %v3318_v31, %v3318_v31  ;;  %v861_v28 = vrot.slane %v847_v14, %v3107_v36  ;;  %v827_v38 = vcombine.low %v795_v34, %v810_v25 }
 0x39c   :  { %v913_v52 = vcombine.low %v819_v46, %v826_v47  ;;  %v2586_v56 = vcombine.high %v819_v46, %v826_v47  ;;  %v885_v26 = vrot.slane %v877_v48, %v3125_v53  ;;  %v892_v50 = vrot.slane %v878_v49, %v3125_v53 }
 0x39d   :  { %v1509_v29 = vpack.c.bf16 %v3322_v12, %v3322_v12  ;;  %v893_v35 = vcombine.low %v861_v28, %v876_v33  ;;  %v894_v37 = vcombine.high %v861_v28, %v876_v33  ;;  %v828_v40 = vcombine.high %v795_v34, %v810_v25 }
 0x39e   :  { %v920_v57 = vrot.slane %v913_v52, %v3107_v36  ;;  %v928_v58 = vrot.slane %v2586_v56, %v3107_v36  ;;  %v938_v59 = vcombine.low %v885_v26, %v892_v50  ;;  %v2587_v60 = vcombine.high %v885_v26, %v892_v50 }
 0x39f   :  { %v901_v43 = vrot.slane %v893_v35, %v3125_v53  ;;  %v908_v44 = vrot.slane %v894_v37, %v3125_v53  ;;  %v835_v45 = vrot.slane %v827_v38, %v3125_v53  ;;  %v842_v46 = vrot.slane %v828_v40, %v3125_v53 }
 0x3a0   :  { %v929_v61 = vcombine.low %v920_v57, %v928_v58  ;;  %v945_v62 = vrot.slane %v938_v59, %v3107_v36  ;;  %v953_v63 = vrot.slane %v2587_v60, %v3107_v36 }
 0x3a1   :  { %v988_v47 = vcombine.low %v901_v43, %v908_v44  ;;  %v2589_v48 = vcombine.high %v901_v43, %v908_v44  ;;  %v963_v49 = vcombine.low %v835_v45, %v842_v46  ;;  %v2588_v52 = vcombine.high %v835_v45, %v842_v46 }
 0x3a2   :  { %v936_v0 = vrot.slane %v929_v61, %v3125_v53  ;;  %v954_v3 = vcombine.low %v945_v62, %v953_v63 }
 0x3a3   :  { %v995_v56 = vrot.slane %v988_v47, %v3107_v36  ;;  %v1003_v26 = vrot.slane %v2589_v48, %v3107_v36  ;;  %v970_v50 = vrot.slane %v963_v49, %v3107_v36  ;;  %v978_v57 = vrot.slane %v2588_v52, %v3107_v36 }
 0x3a4   :  { %v937_v39 = vcombine.high %v936_v0, %v2974_v41  ;;  %v961_v4 = vrot.slane %v954_v3, %v3125_v53  ;;  %v1016_v55 = vshrl.u32 %v936_v0, 16 }
 0x3a5   :  { %v1004_v59 = vcombine.low %v995_v56, %v1003_v26  ;;  %v979_v60 = vcombine.low %v970_v50, %v978_v57 }
 0x3a6   :  { %v1015_v6 = vpack.i.b16 %v961_v4, %v936_v0  ;;  %v1017_v5 = vshrl.u32 %v961_v4, 16  ;;  %v962_v11 = vcombine.high %v961_v4, %v2974_v41  ;;  %v1022_v16 = vshrl.u32 %v937_v39, 16 }
 0x3a7   :  { %v1011_v62 = vrot.slane %v1004_v59, %v3125_v53  ;;  %v986_v63 = vrot.slane %v979_v60, %v3125_v53 }
 0x3a8   :  { %v1521_v18 = vsel %vm1519_vm3, %v1015_v6, 0  ;;  %v1018_v19 = vpack.i.b16 %v1017_v5, %v1016_v55  ;;  %v1021_v20 = vpack.i.b16 %v962_v11, %v937_v39  ;;  %v1023_v21 = vshrl.u32 %v962_v11, 16 }
 0x3a9   :  { %2745 = vmatpush3.bf16.msra.mxu0 %v1521_v18  ;;  %v1029_v3 = vshrl.u32 %v1011_v62, 16  ;;  %v1028_v39 = vshrl.u32 %v986_v63, 16  ;;  %v2519_v11 = vsel %vm1051_vm2, %v3322_v12, 0.0  ;;  %v987_v51 = vcombine.high %v986_v63, %v2974_v41 }
 0x3aa   :  { %v1567_v23 = vsel %vm1519_vm3, %v1018_v19, 0  ;;  %2756 = vmatprep.subr.bf16.mxu0 %v2967_v1  ;;  %v1024_v24 = vpack.i.b16 %v1023_v21, %v1022_v16  ;;  %v1613_v32 = vsel %vm1519_vm3, %v1021_v20, 0  ;;  %v1012_v19 = vcombine.high %v1011_v62, %v2974_v41 }
 0x3ab   :  { %2751 = vmatpush3.bf16.msra.mxu1 %v1567_v23  ;;  %v1030_v55 = vpack.i.b16 %v1029_v3, %v1028_v39  ;;  %v2518_v20 = vsel %vm1051_vm2, %v3318_v31, 0.0  ;;  %v1027_v21 = vpack.i.b16 %v1011_v62, %v986_v63  ;;  %v1034_v41 = vshrl.u32 %v987_v51, 16 }
 0x3ac   :  { %2747 = vmatmul.mubr.msk.bf16.vlgmr.msra.gmra.mrb[12].mxu0 %vm1051_vm2, %v1508_v54  ;;  %2762 = vmatprep.subr.bf16.mxu1 %v2967_v1  ;;  %v1659_v42 = vsel %vm1519_vm3, %v1024_v24, 0  ;;  %v2520_v12 = vadd.f32 %v2519_v11, %v2518_v20  ;;  %v1035_v24 = vshrl.u32 %v1012_v19, 16  ;;  %v1033_v37 = vpack.i.b16 %v1012_v19, %v987_v51 }
 0x3ad   :  { %2757 = vmatpush3.bf16.msra.mxu0 %v1613_v32  ;;  %2758 = vmatprep.mubr.msk.bf16.mxu0 %vm2968_vm0, %v2967_v1  ;;  %v1751_v16 = vsel %vm1519_vm3, %v1030_v55, 0 }
 0x3ae   :  { %2753 = vmatmul.mubr.msk.bf16.vlgmr.msra.gmra.mrb[28].mxu1 %vm1051_vm2, %v1509_v29  ;;  %2768 = vmatprep.subr.bf16.mxu0 %v2967_v1  ;;  %v1036_v25 = vpack.i.b16 %v1035_v24, %v1034_v41 }
 0x3af   :  { %2763 = vmatpush3.bf16.msra.mxu1 %v1659_v42  ;;  %2764 = vmatprep.mubr.msk.bf16.mxu1 %vm2968_vm0, %v2967_v1 }
 0x3b0   :  { %2774 = vmatprep.subr.bf16.mxu1 %v2967_v1 }
 0x3c0   :  { %v1479_v58 = vpop.xlane.xlu1 %1478 }
 0x3c1   :  { %2897 = vrcp.f32 %v1479_v58 }
 0x3c4   :  { %v1476_v61 = vpop.xlane.xlu0 %1475  ;;  %v1488_v0 = vpop.xlane.xlu1 %1487 }
 0x3c5   :  { %2899 = vrcp.f32 %v1476_v61 }
 0x3c8   :  { %v1482_v2 = vpop.xlane.xlu0 %1481 }
 0x3c9   :  { %2901 = vrcp.f32 %v1482_v2 }
 0x3ca   :  { %2903 = vrcp.f32 %v1488_v0 }
 0x3cb   :  { %v2898_v30 = vpop.eup %2897 }
 0x3cc   :  { %v1503_v4 = vmul.f32 %v2898_v30, %v3272_v7  ;;  %v1485_v6 = vpop.xlane.xlu0 %1484 }
 0x3cd   :  { %2905 = vrcp.f32 %v1485_v6 }
 0x3ce   :  { %v1511_v5 = vpack.c.bf16 %v1503_v4, %v1503_v4  ;;  %v2523_v28 = vsel %vm1051_vm2, %v1503_v4, 0.0 }
 0x3cf   :  { %v2900_v14 = vpop.eup %2899 }
 0x3d0   :  { %2765 = vmatmul.mubr.msk.bf16.vlgmr.msra.gmra.mrb[32].mxu1 %vm1051_vm2, %v1511_v5  ;;  %v1491_v18 = vpop.xlane.xlu0 %1490  ;;  %v1502_v7 = vmul.f32 %v2900_v14, %v3274_v9  ;;  %v1705_v9 = vsel %vm1519_vm3, %v1027_v21, 0 }
 0x3d1   :  { %2775 = vmatpush3.bf16.msra.mxu1 %v1751_v16  ;;  %2907 = vrcp.f32 %v1491_v18  ;;  %2776 = vmatprep.mubr.msk.bf16.mxu1 %vm2968_vm0, %v2967_v1 }
 0x3d2   :  { %2786 = vmatprep.subr.bf16.mxu1 %v2967_v1  ;;  %v2521_v23 = vsel %vm1051_vm2, %v1502_v7, 0.0  ;;  %v1510_v54 = vpack.c.bf16 %v1502_v7, %v1502_v7 }
 0x3d3   :  { %v2902_v22 = vpop.eup %2901  ;;  %v2522_v27 = vadd.f32 %v2521_v23, %v2520_v12 }
 0x3d4   :  { %v2904_v31 = vpop.eup %2903  ;;  %2759 = vmatmul.mubr.msk.bf16.vlgmr.msra.gmra.mrb[16].mxu0 %vm1051_vm2, %v1510_v54  ;;  %v1504_v32 = vmul.f32 %v2902_v22, %v3284_v13 }
 0x3d5   :  { %2769 = vmatpush3.bf16.msra.mxu0 %v1705_v9  ;;  %2770 = vmatprep.mubr.msk.bf16.mxu0 %vm2968_vm0, %v2967_v1  ;;  %v2524_v29 = vadd.f32 %v2523_v28, %v2522_v27  ;;  %v1506_v34 = vmul.f32 %v2904_v31, %v3278_v10  ;;  %v1843_v10 = vsel %vm1519_vm3, %v1036_v25, 0 }
 0x3d6   :  { %2780 = vmatprep.subr.bf16.mxu0 %v2967_v1  ;;  %v2525_v38 = vsel %vm1051_vm2, %v1504_v32, 0.0  ;;  %v1512_v45 = vpack.c.bf16 %v1504_v32, %v1504_v32 }
 0x3d7   :  { %v2906_v33 = vpop.eup %2905  ;;  %v2533_v35 = vmul.f32 0.25, %v2524_v29  ;;  %v2528_v46 = vsel %vm1051_vm2, %v1506_v34, 0.0  ;;  %v1514_v26 = vpack.c.bf16 %v1506_v34, %v1506_v34 }
 0x3d8   :  { %v1505_v42 = vmul.f32 %v2906_v33, %v3288_v15  ;;  %v1797_v15 = vsel %vm1519_vm3, %v1033_v37, 0 }
 0x3d9   :  { %2535 = vst.msk [vmem:[#allocation4] sm:$0xff] %vm1051_vm2, %v2533_v35 }
 0x3da   :  { %v2526_v13 = vsel %vm1051_vm2, %v1505_v42, 0.0  ;;  %v1513_v40 = vpack.c.bf16 %v1505_v42, %v1505_v42 }
 0x3db   :  { %v2908_v43 = vpop.eup %2907  ;;  %v2527_v44 = vadd.f32 %v2526_v13, %v2525_v38 }
 0x3dc   :  { %v1507_v47 = vmul.f32 %v2908_v43, %v3292_v17  ;;  %2777 = vmatmul.mubr.msk.bf16.vlgmr.msra.gmra.mrb[36].mxu1 %vm1051_vm2, %v1513_v40  ;;  %2771 = vmatmul.mubr.msk.bf16.vlgmr.msra.gmra.mrb[20].mxu0 %vm1051_vm2, %v1512_v45 }
 0x3dd   :  { %2787 = vmatpush3.bf16.msra.mxu1 %v1843_v10  ;;  %v2529_v48 = vadd.f32 %v2528_v46, %v2527_v44  ;;  %2781 = vmatpush3.bf16.msra.mxu0 %v1797_v15 }
 0x3de   :  { %2782 = vmatprep.mubr.msk.bf16.mxu0 %vm2968_vm0, %v2967_v1  ;;  %v2530_v49 = vsel %vm1051_vm2, %v1507_v47, 0.0  ;;  %2788 = vmatprep.mubr.msk.bf16.mxu1 %vm2968_vm0, %v2967_v1  ;;  %v1515_v56 = vpack.c.bf16 %v1507_v47, %v1507_v47 }
 0x3df   :  { %2792 = vmatprep.subr.bf16.mxu0 %v2967_v1  ;;  %v2531_v17 = vadd.f32 %v2530_v49, %v2529_v48  ;;  %2800 = vmatprep.subr.bf16.mxu1 %v2967_v1 }
 0x3e1   :  { %v2534_v52 = vmul.f32 0.25, %v2531_v17 }
 0x3e3   :  { %2536 = vst.msk [vmem:[#allocation4 + $0x8] sm:$0xff] %vm1051_vm2, %v2534_v52 }
 0x3e4   :  { %2789 = vmatmul.mubr.msk.bf16.vlgmr.msra.gmra.mrb[40].mxu1 %vm1051_vm2, %v1515_v56  ;;  %2783 = vmatmul.mubr.msk.bf16.vlgmr.msra.gmra.mrb[24].mxu0 %vm1051_vm2, %v1514_v26 }
 0x3e5   :  { %2804 = vmatprep.mubr.msk.bf16.mxu1 %vm2968_vm0, %v2967_v1  ;;  %2796 = vmatprep.mubr.msk.bf16.mxu0 %vm2968_vm0, %v2967_v1 }
 0x47f   :  { %v1557_v50 = vpop.f32.mrb[12].mxu0 }
 0x480   :  { %v2748_v57 = vpop.f32.mrb[13].mxu0 }
 0x481   :  { %v1560_v58 = vpop.f32.mrb[14].mxu0  ;;  %v1603_v59 = vpop.f32.mrb[28].mxu1 }
 0x482   :  { %v2749_v60 = vpop.f32.mrb[15].mxu0  ;;  %v2754_v61 = vpop.f32.mrb[29].mxu1 }
 0x483   :  { %v1606_v62 = vpop.f32.mrb[30].mxu1 }
 0x484   :  { %v2755_v63 = vpop.f32.mrb[31].mxu1 }
 0x4a3   :  { %v1695_v0 = vpop.f32.mrb[32].mxu1 }
 0x4a4   :  { %v1901_v2 = vcombine.low %v1603_v59, %v1695_v0  ;;  %v1902_v3 = vcombine.high %v1603_v59, %v1695_v0  ;;  %v2766_v39 = vpop.f32.mrb[33].mxu1 }
 0x4a5   :  { %v1698_v30 = vpop.f32.mrb[34].mxu1 }
 0x4a6   :  { %v2767_v4 = vpop.f32.mrb[35].mxu1  ;;  %v1909_v16 = vrot.slane %v1901_v2, %v3107_v36  ;;  %v1916_v18 = vrot.slane %v1902_v3, %v3107_v36 }
 0x4a7   :  { %v1649_v6 = vpop.f32.mrb[16].mxu0 }
 0x4a8   :  { %v1885_v55 = vcombine.low %v1557_v50, %v1649_v6  ;;  %v1886_v5 = vcombine.high %v1557_v50, %v1649_v6  ;;  %v2760_v11 = vpop.f32.mrb[17].mxu0 }
 0x4a9   :  { %v1652_v14 = vpop.f32.mrb[18].mxu0 }
 0x4aa   :  { %v1893_v19 = vrot.slane %v1885_v55, %v3107_v36  ;;  %v1900_v20 = vrot.slane %v1886_v5, %v3107_v36  ;;  %v2761_v7 = vpop.f32.mrb[19].mxu0 }
 0x4ac   :  { %v1917_v21 = vcombine.low %v1893_v19, %v1909_v16  ;;  %v1918_v12 = vcombine.high %v1893_v19, %v1909_v16  ;;  %v1933_v51 = vcombine.low %v1900_v20, %v1916_v18  ;;  %v1934_v22 = vcombine.high %v1900_v20, %v1916_v18 }
 0x4ae   :  { %v1925_v23 = vrot.slane %v1917_v21, %v3125_v53  ;;  %v1932_v54 = vrot.slane %v1918_v12, %v3125_v53  ;;  %v1941_v24 = vrot.slane %v1933_v51, %v3125_v53  ;;  %v1948_v27 = vrot.slane %v1934_v22, %v3125_v53 }
 0x4af   :  { %v1787_v31 = vpop.f32.mrb[36].mxu1  ;;  %v1741_v9 = vpop.f32.mrb[20].mxu0 }
 0x4b0   :  { %v2778_v28 = vpop.f32.mrb[37].mxu1  ;;  %v2021_v32 = vcombine.low %v1925_v23, %v1932_v54  ;;  %v2608_v41 = vcombine.high %v1925_v23, %v1932_v54  ;;  %v2037_v29 = vcombine.low %v1941_v24, %v1948_v27  ;;  %v2609_v33 = vcombine.high %v1941_v24, %v1948_v27  ;;  %v2772_v34 = vpop.f32.mrb[21].mxu0  ;;  %v2864_v23 = vld [vmem:[%s3569_s5] sm:$0xff]  }
 0x4b1   :  { %v1790_v42 = vpop.f32.mrb[38].mxu1  ;;  %v1744_v25 = vpop.f32.mrb[22].mxu0  ;;  %2793 = vmatpush3.bf16.msra.mxu0 %v2864_v23 }
 0x4b2   :  { %v2779_v35 = vpop.f32.mrb[39].mxu1  ;;  %v2028_v37 = vrot.slane %v2021_v32, %v3107_v36  ;;  %v2036_v38 = vrot.slane %v2608_v41, %v3107_v36  ;;  %v2044_v13 = vrot.slane %v2037_v29, %v3107_v36  ;;  %v2052_v40 = vrot.slane %v2609_v33, %v3107_v36  ;;  %v2773_v43 = vpop.f32.mrb[23].mxu0  ;;  %2794 = vmatprep.subr.bf16.mxu0 %v2967_v1  ;;  %v2865_v25 = vld [vmem:[%s3569_s5 + $0x8] sm:$0xff]  }
 0x4b4   :  { %v2054_v44 = vcombine.high %v2028_v37, %v2036_v38  ;;  %v2070_v45 = vcombine.high %v2044_v13, %v2052_v40  ;;  %v2053_v46 = vcombine.low %v2028_v37, %v2036_v38  ;;  %v2069_v47 = vcombine.low %v2044_v13, %v2052_v40 }
 0x4b5   :  { %2795 = vmatpush3.bf16.msra.mxu0 %v2865_v25 }
 0x4b6   :  { %v2068_v15 = vrot.slane %v2054_v44, %v3125_v53  ;;  %v2084_v48 = vrot.slane %v2070_v45, %v3125_v53  ;;  %v3423_v49 = vrot.slane %v2053_v46, %v3125_v53  ;;  %v3426_v17 = vrot.slane %v2069_v47, %v3125_v53  ;;  %2808 = vmatprep.subr.bf16.mxu0 %v2967_v1 }
 0x4b7   :  { %v1879_v10 = vpop.f32.mrb[40].mxu1  ;;  %v1833_v52 = vpop.f32.mrb[24].mxu0 }
 0x4b8   :  { %v1969_v56 = vcombine.low %v1787_v31, %v1879_v10  ;;  %v1970_v26 = vcombine.high %v1787_v31, %v1879_v10  ;;  %v2790_v50 = vpop.f32.mrb[41].mxu1  ;;  %v1953_v57 = vcombine.low %v1741_v9, %v1833_v52  ;;  %v1954_v58 = vcombine.high %v1741_v9, %v1833_v52  ;;  %v2784_v59 = vpop.f32.mrb[25].mxu0 }
 0x4b9   :  { %v1882_v60 = vpop.f32.mrb[42].mxu1  ;;  %v2087_v61 = vcombine.low %v2068_v15, %v2084_v48  ;;  %v2085_v62 = vcombine.low %v3423_v49, %v3426_v17  ;;  %v1836_v2 = vpop.f32.mrb[26].mxu0  ;;  %v2086_v39 = vcombine.high %v3423_v49, %v3426_v17  ;;  %v2088_v30 = vcombine.high %v2068_v15, %v2084_v48 }
 0x4ba   :  { %v1977_v63 = vrot.slane %v1969_v56, %v3107_v36  ;;  %v1984_v0 = vrot.slane %v1970_v26, %v3107_v36  ;;  %v2791_v3 = vpop.f32.mrb[43].mxu1  ;;  %v1961_v4 = vrot.slane %v1953_v57, %v3107_v36  ;;  %v1968_v6 = vrot.slane %v1954_v58, %v3107_v36  ;;  %v2785_v55 = vpop.f32.mrb[27].mxu0  ;;  %v3466_v60 = vld [vmem:[%s3572_s8] sm:$0xff] }
 0x4bb   :  { %v2196_v59 = vsub.s32 1, %v3081_v8 }
 0x4bc   :  { %v1985_v5 = vcombine.low %v1961_v4, %v1977_v63  ;;  %v1986_v11 = vcombine.high %v1961_v4, %v1977_v63  ;;  %v2001_v14 = vcombine.low %v1968_v6, %v1984_v0  ;;  %v2002_v16 = vcombine.high %v1968_v6, %v1984_v0 }
 0x4be   :  { %v1993_v18 = vrot.slane %v1985_v5, %v3125_v53  ;;  %v2000_v19 = vrot.slane %v1986_v11, %v3125_v53  ;;  %v2009_v20 = vrot.slane %v2001_v14, %v3125_v53  ;;  %v2016_v7 = vrot.slane %v2002_v16, %v3125_v53 }
 0x4c0   :  { %v2089_v21 = vcombine.low %v1993_v18, %v2000_v19  ;;  %v2610_v12 = vcombine.high %v1993_v18, %v2000_v19  ;;  %v2105_v51 = vcombine.low %v2009_v20, %v2016_v7  ;;  %v2611_v22 = vcombine.high %v2009_v20, %v2016_v7 }
 0x4c2   :  { %v2096_v54 = vrot.slane %v2089_v21, %v3107_v36  ;;  %v2104_v24 = vrot.slane %v2610_v12, %v3107_v36  ;;  %v2112_v27 = vrot.slane %v2105_v51, %v3107_v36  ;;  %v2120_v31 = vrot.slane %v2611_v22, %v3107_v36 }
 0x4c4   :  { %v2122_v9 = vcombine.high %v2096_v54, %v2104_v24  ;;  %v2138_v28 = vcombine.high %v2112_v27, %v2120_v31  ;;  %v2121_v32 = vcombine.low %v2096_v54, %v2104_v24  ;;  %v2137_v41 = vcombine.low %v2112_v27, %v2120_v31  ;;  %v2866_v54 = vld [vmem:[%s3570_s6] sm:$0xff]   ;;  %v2867_v24 = vld [vmem:[%s3570_s6 + $0x8] sm:$0xff]  }
 0x4c5   :  { %2801 = vmatpush3.bf16.msra.mxu1 %v2866_v54  ;;  %v2868_v27 = vld [vmem:[%s3571_s7] sm:$0xff]   ;;  %v2869_v31 = vld [vmem:[%s3571_s7 + $0x8] sm:$0xff]  }
 0x4c6   :  { %v2136_v29 = vrot.slane %v2122_v9, %v3125_v53  ;;  %v2152_v33 = vrot.slane %v2138_v28, %v3125_v53  ;;  %v2129_v34 = vrot.slane %v2121_v32, %v3125_v53  ;;  %v2145_v42 = vrot.slane %v2137_v41, %v3125_v53  ;;  %2802 = vmatprep.subr.bf16.mxu1 %v2967_v1  ;;  %v2870_v9 = vld [vmem:[%s3571_s7 + $0x10] sm:$0xff]   ;;  %v2871_v28 = vld [vmem:[%s3571_s7 + $0x18] sm:$0xff]   ;;  %v2872_v32 = vld [vmem:[%s3571_s7 + $0x20] sm:$0xff]  }
 0x4c7   :  { %v2873_v41 = vld [vmem:[%s3571_s7 + $0x28] sm:$0xff]  }
 0x4c8   :  { %v2155_v36 = vcombine.low %v2136_v29, %v2152_v33  ;;  %v2154_v35 = vcombine.high %v2129_v34, %v2145_v42  ;;  %v2153_v37 = vcombine.low %v2129_v34, %v2145_v42  ;;  %v2156_v38 = vcombine.high %v2136_v29, %v2152_v33 }
 0x4c9   :  { %2803 = vmatpush3.bf16.msra.mxu1 %v2867_v24 }
 0x4ca   :  { %v2848_v13 = vpack.i.bf16 %v2155_v36, %v2087_v61  ;;  %v2843_v40 = vpack.i.bf16 %v2154_v35, %v2086_v39  ;;  %v2853_v43 = vpack.i.bf16 %v2156_v38, %v2088_v30  ;;  %v2197_v61 = vrot.slane %v3466_v60, %v2196_v59 }
 0x4cb   :  { %v2287_v35 = vsub.s32 2, %v3081_v8  ;;  %v2293_v38 = vsub.s32 3, %v3081_v8 }
 0x4cc   :  { %2849 = vrot.lane.b32.xlu0 %v2848_v13, %s2976_s26  ;;  %2844 = vrot.lane.b32.xlu1 %v2843_v40, %s2977_s27 }
 0x4d0   :  { %2854 = vrot.lane.b32.xlu1 %v2853_v43, %s2978_s28 }
 0x53e   :  { %v2850_v53 = vpop.permute.xlu0 %2849  ;;  %v2845_v44 = vpop.permute.xlu1 %2844 }
 0x53f   :  { %v2847_v45 = vunpack.i.h.bf16 %v2845_v44  ;;  %v2846_v46 = vunpack.i.l.bf16 %v2845_v44  ;;  %v2852_v47 = vunpack.i.h.bf16 %v2850_v53  ;;  %v2851_v10 = vunpack.i.l.bf16 %v2850_v53 }
 0x541   :  { %v2181_v15 = vsel %vm1051_vm2, %v2085_v62, %v2846_v46  ;;  %v2182_v48 = vsel %vm1051_vm2, %v2153_v37, %v2847_v45  ;;  %v2918_v62 = vld [vmem:[%s3564_s0] sm:$0xff]   ;;  %v2288_v37 = vrot.slane %v3466_v60, %v2287_v35  ;;  %v2294_v45 = vrot.slane %v3466_v60, %v2293_v38 }
 0x542   :  { %v2855_v49 = vpop.permute.xlu1 %2854  ;;  %v2184_v56 = vsel %vm2183_vm4, %v2181_v15, %v2851_v10  ;;  %v2185_v26 = vsel %vm2183_vm4, %v2182_v48, %v2852_v47  ;;  %v2254_v63 = vunpack.c.l.bf16 %v2918_v62  ;;  %v2255_v39 = vunpack.c.h.bf16 %v2918_v62  ;;  %v2874_v48 = vld [vmem:[%s3571_s7 + $0x30] sm:$0xff]  }
 0x543   :  { %v2857_v17 = vunpack.i.h.bf16 %v2855_v49  ;;  %v2856_v52 = vunpack.i.l.bf16 %v2855_v49  ;;  %v2875_v49 = vld [vmem:[%s3571_s7 + $0x38] sm:$0xff]   ;;  %s2979_s7 = smov [#allocation4]  }
 0x545   :  { %v2187_v50 = vsel %vm2186_vm5, %v2184_v56, %v2856_v52  ;;  %v2188_v57 = vsel %vm2186_vm5, %v2185_v26, %v2857_v17  ;;  %v2615_v17 = vld [vmem:[%s3574_s10] ss:$0 sm:$0xff]  ;;  %s2554_s10 = sshll.u32 %s2979_s7, 4  ;;  %s2555_s10 = int_to_ptr.vmem [resolvable:$true] %s2554_s10 }
 0x546   :  { %v2189_v58 = vpack.c.bf16 %v2188_v57, %v2187_v50  ;;  %s2919_s5 = scalar_lea.vmem %s2555_s10, 256  ;;  %p2924_p1 = scmp.lt.s32.totalorder %s2555_s10, %s2555_s10 }
 0x547   :  { %p2920_p0 = scmp.ne.s32.totalorder %s2555_s10, %s2919_s5  ;;  %p2925_p2 = scmp.lt.s32.totalorder %s2919_s5, %s2919_s5 }
 0x548   :  { %2797 = vmatmul.mubr.msk.bf16.vlgmr.msra.gmra.mrb[28].mxu0 %vm75_vm1, %v2189_v58 }
 0x549   :  { %2824 = vmatprep.mubr.msk.bf16.mxu0 %vm2968_vm0, %v2967_v1  ;;  %2809 = vmatpush3.bf16.msra.mxu0 %v2868_v27  ;;  %p2926_p3 = por %p2925_p2, %p2924_p1 }
 0x54a   :  { %2810 = vmatprep.subr.bf16.mxu0 %v2967_v1 }
 0x54b   :  { %p2927_p4 = pnand %p2926_p3, %p2920_p0 }
 0x54d   :  { %2811 = vmatpush3.bf16.msra.mxu0 %v2869_v31 }
 0x54e   :  { %2812 = vmatprep.subr.bf16.mxu0 %v2967_v1 }
 0x551   :  { %2813 = vmatpush3.bf16.msra.mxu0 %v2870_v9 }
 0x552   :  { %2814 = vmatprep.subr.bf16.mxu0 %v2967_v1 }
 0x555   :  { %2815 = vmatpush3.bf16.msra.mxu0 %v2871_v28 }
 0x556   :  { %2816 = vmatprep.subr.bf16.mxu0 %v2967_v1 }
 0x559   :  { %2817 = vmatpush3.bf16.msra.mxu0 %v2872_v32 }
 0x55a   :  { %2818 = vmatprep.subr.bf16.mxu0 %v2967_v1 }
 0x55d   :  { %2819 = vmatpush3.bf16.msra.mxu0 %v2873_v41 }
 0x55e   :  { %2820 = vmatprep.subr.bf16.mxu0 %v2967_v1 }
 0x561   :  { %2821 = vmatpush3.bf16.msra.mxu0 %v2874_v48 }
 0x562   :  { %2822 = vmatprep.subr.bf16.mxu0 %v2967_v1 }
 0x565   :  { %2823 = vmatpush3.bf16.msra.mxu0 %v2875_v49 }
 0x61b   :  { %v2247_v0 = vpop.f32.mrb[28].mxu0 }
 0x61c   :  { %v2248_v2 = vadd.f32 %v2247_v0, %v2197_v61  ;;  %v2798_v3 = vpop.f32.mrb[29].mxu0 }
 0x61d   :  { %v2250_v30 = vpop.f32.mrb[30].mxu0 }
 0x61e   :  { %v2251_v4 = vadd.f32 %v2250_v30, %v2197_v61  ;;  %v2799_v6 = vpop.f32.mrb[31].mxu0  ;;  %v2256_v55 = vadd.f32 %v2254_v63, %v2248_v2  ;;  %v2385_v63 = vsub.s32 4, %v3081_v8 }
 0x620   :  { %v2258_v5 = vsel %vm75_vm1, %v2256_v55, 0.0  ;;  %v2257_v11 = vadd.f32 %v2255_v39, %v2251_v4  ;;  %v2386_v0 = vrot.slane %v3466_v60, %v2385_v63 }
 0x621   :  { %2259 = vadd.xlane.f32.xlu1 %v2258_v5 }
 0x622   :  { %v2261_v14 = vsel %vm75_vm1, %v2257_v11, 0.0 }
 0x623   :  { %2262 = vadd.xlane.f32.xlu0 %v2261_v14 }
 0x6ae   :  { %v2260_v16 = vpop.xlane.xlu1 %2259 }
 0x6af   :  { %v2265_v18 = vmul.f32 0.03125, %v2260_v16 }
 0x6b0   :  { %v2263_v19 = vpop.xlane.xlu0 %2262 }
 0x6b1   :  { %v2267_v20 = vsub.f32 %v2256_v55, %v2265_v18  ;;  %v2266_v7 = vmul.f32 0.03125, %v2263_v19 }
 0x6b3   :  { %v2268_v21 = vsub.f32 %v2257_v11, %v2266_v7  ;;  %v2269_v12 = vmul.f32 %v2267_v20, %v2267_v20 }
 0x6b5   :  { %v2271_v51 = vsel %vm75_vm1, %v2269_v12, 0.0  ;;  %v2270_v22 = vmul.f32 %v2268_v21, %v2268_v21 }
 0x6b6   :  { %2272 = vadd.xlane.f32.xlu0 %v2271_v51 }
 0x6b7   :  { %v2274_v23 = vsel %vm75_vm1, %v2270_v22, 0.0 }
 0x6b8   :  { %2275 = vadd.xlane.f32.xlu1 %v2274_v23 }
 0x743   :  { %v2273_v29 = vpop.xlane.xlu0 %2272 }
 0x744   :  { %v2277_v33 = vmul.f32 0.03125, %v2273_v29 }
 0x745   :  { %v2276_v34 = vpop.xlane.xlu1 %2275 }
 0x746   :  { %v2279_v42 = vadd.f32 1e-05, %v2277_v33  ;;  %v2278_v25 = vmul.f32 0.03125, %v2276_v34 }
 0x748   :  { %2909 = vrsqrt.f32 %v2279_v42  ;;  %v2280_v36 = vadd.f32 1e-05, %v2278_v25 }
 0x74a   :  { %2911 = vrsqrt.f32 %v2280_v36 }
 0x752   :  { %v2910_v13 = vpop.eup %2909 }
 0x753   :  { %v2283_v40 = vmul.f32 %v2910_v13, %v2267_v20 }
 0x754   :  { %v2912_v43 = vpop.eup %2911 }
 0x755   :  { %v2289_v53 = vmul.f32 %v2288_v37, %v2283_v40  ;;  %v2284_v44 = vmul.f32 %v2912_v43, %v2268_v21 }
 0x757   :  { %v2290_v46 = vmul.f32 %v2288_v37, %v2284_v44  ;;  %v2295_v47 = vadd.f32 %v2294_v45, %v2289_v53 }
 0x759   :  { %v2296_v10 = vadd.f32 %v2294_v45, %v2290_v46 }
 0x75b   :  { %v2297_v15 = vpack.c.bf16 %v2296_v10, %v2295_v47 }
 0x75d   :  { %2805 = vmatmul.mubr.msk.bf16.vlgmr.msra.gmra.mrb[44].mxu1 %vm75_vm1, %v2297_v15 }
 0x830   :  { %v2357_v52 = vpop.f32.mrb[44].mxu1 }
 0x831   :  { %v2358_v56 = vadd.f32 %v2615_v17, %v2357_v52  ;;  %v2806_v26 = vpop.f32.mrb[45].mxu1 }
 0x832   :  { %v2360_v50 = vpop.f32.mrb[46].mxu1 }
 0x833   :  { %v2361_v57 = vadd.f32 %v2615_v17, %v2360_v50  ;;  %v2807_v58 = vpop.f32.mrb[47].mxu1  ;;  %v2364_v59 = vmax.f32 %v2358_v56, 0.0 }
 0x835   :  { %v2365_v61 = vmax.f32 %v2361_v57, 0.0 }
 0x837   :  { %v2366_v62 = vpack.c.bf16 %v2365_v61, %v2364_v59 }
 0x839   :  { %2825 = vmatmul.mubr.bf16.vlgmr.msra.gmra.mrb[32].mxu0 %v2366_v62 }
 0x90c   :  { %v2469_v1 = vpop.f32.mrb[32].mxu0 }
 0x90d   :  { %v2470_v2 = vadd.f32 %v2469_v1, %v2386_v0  ;;  %v2826_v3 = vpop.f32.mrb[33].mxu0 }
 0x90e   :  { %v2472_v39 = vpop.f32.mrb[34].mxu0 }
 0x90f   :  { %v2473_v30 = vadd.f32 %v2472_v39, %v2386_v0  ;;  %v2827_v4 = vpop.f32.mrb[35].mxu0  ;;  %v2476_v6 = vadd.f32 %v2470_v2, %v2295_v47 }
 0x911   :  { %v2478_v55 = vsel %vm75_vm1, %v2476_v6, 0.0  ;;  %v2477_v5 = vadd.f32 %v2473_v30, %v2296_v10 }
 0x912   :  { %2479 = vadd.xlane.f32.xlu0 %v2478_v55 }
 0x913   :  { %v2481_v11 = vsel %vm75_vm1, %v2477_v5, 0.0 }
 0x914   :  { %2482 = vadd.xlane.f32.xlu1 %v2481_v11 }
 0x99f   :  { %v2480_v14 = vpop.xlane.xlu0 %2479 }
 0x9a0   :  { %v2484_v16 = vmul.f32 0.03125, %v2480_v14 }
 0x9a1   :  { %v2483_v18 = vpop.xlane.xlu1 %2482 }
 0x9a2   :  { %v2486_v19 = vsub.f32 %v2476_v6, %v2484_v16  ;;  %v2485_v20 = vmul.f32 0.03125, %v2483_v18 }
 0x9a4   :  { %v2487_v7 = vsub.f32 %v2477_v5, %v2485_v20  ;;  %v2488_v21 = vmul.f32 %v2486_v19, %v2486_v19 }
 0x9a6   :  { %v2490_v12 = vsel %vm75_vm1, %v2488_v21, 0.0  ;;  %v2489_v51 = vmul.f32 %v2487_v7, %v2487_v7 }
 0x9a7   :  { %2491 = vadd.xlane.f32.xlu0 %v2490_v12 }
 0x9a8   :  { %v2493_v22 = vsel %vm75_vm1, %v2489_v51, 0.0 }
 0x9a9   :  { %2494 = vadd.xlane.f32.xlu1 %v2493_v22 }
 0x9aa   :  { %2930 = shalt.err (!%p2927_p4)
}
 0x9ab   :  { %s2931_s30 = scalar_lea.hbm %s3576_s12, 256 }
 0x9ac   :  { %p2932_p5 = scmp.ne.s32.totalorder %s3576_s12, %s2931_s30  ;;  %p2935_p6 = scmp.lt.u32.totalorder %s2931_s30, %s3576_s12 }
 0x9ae   :  { %p2937_p7 = pnand %p2935_p6, %p2932_p5 }
 0x9b0   :  { %2940 = shalt.err (!%p2937_p7)
}
 0x9b1   :  { %s2980_s14 = smov 128   ;;  %v2506_v28 = vsub.s32 5, %v3081_v8  ;;  %v2512_v32 = vsub.s32 6, %v3081_v8 }
 0x9b2   :  { %2560 = dma.vmem_to_hbm [thread:$0]  %s2555_s10, 256, %s3576_s12, [#allocation5], %s2980_s14, %s2980_s14, %s2977_s27  }
 0x9b3   :  { %v2507_v41 = vrot.slane %v3466_v60, %v2506_v28  ;;  %v2513_v34 = vrot.slane %v3466_v60, %v2512_v32  ;;  %s2981_s12 = smov [#allocation2]  }
 0x9b4   :  { %s2542_s16 = sshll.u32 %s2981_s12, 4  ;;  %s2543_s16 = int_to_ptr.vmem [resolvable:$true] %s2542_s16 }
 0x9b5   :  { %s2941_s17 = scalar_lea.vmem %s2543_s16, 256  ;;  %p2946_p9 = scmp.lt.s32.totalorder %s2543_s16, %s2543_s16 }
 0x9b6   :  { %p2942_p8 = scmp.ne.s32.totalorder %s2543_s16, %s2941_s17  ;;  %p2947_p10 = scmp.lt.s32.totalorder %s2941_s17, %s2941_s17 }
 0x9b8   :  { %p2948_p11 = por %p2947_p10, %p2946_p9 }
 0x9ba   :  { %p2949_p12 = pnand %p2948_p11, %p2942_p8 }
 0xa34   :  { %v2492_v23 = vpop.xlane.xlu0 %2491 }
 0xa35   :  { %v2496_v54 = vmul.f32 0.03125, %v2492_v23 }
 0xa36   :  { %v2495_v24 = vpop.xlane.xlu1 %2494 }
 0xa37   :  { %v2498_v27 = vadd.f32 1e-05, %v2496_v54  ;;  %v2497_v31 = vmul.f32 0.03125, %v2495_v24 }
 0xa39   :  { %2913 = vrsqrt.f32 %v2498_v27  ;;  %v2499_v9 = vadd.f32 1e-05, %v2497_v31 }
 0xa3b   :  { %2915 = vrsqrt.f32 %v2499_v9 }
 0xa43   :  { %v2914_v29 = vpop.eup %2913 }
 0xa44   :  { %v2502_v33 = vmul.f32 %v2914_v29, %v2486_v19 }
 0xa45   :  { %v2916_v42 = vpop.eup %2915 }
 0xa46   :  { %v2503_v25 = vmul.f32 %v2916_v42, %v2487_v7  ;;  %v2508_v36 = vmul.f32 %v2507_v41, %v2502_v33 }
 0xa48   :  { %v2509_v35 = vmul.f32 %v2507_v41, %v2503_v25  ;;  %v2514_v37 = vadd.f32 %v2513_v34, %v2508_v36 }
 0xa4a   :  { %v2515_v38 = vadd.f32 %v2513_v34, %v2509_v35  ;;  %2516 = vst.msk [vmem:[#allocation2] sm:$0xff] %vm75_vm1, %v2514_v37 }
 0xa4c   :  { %2517 = vst.msk [vmem:[#allocation2 + $0x8] sm:$0xff] %vm75_vm1, %v2515_v38 }
 0xa4d   :  { %2952 = shalt.err (!%p2949_p12)
}
 0xa4e   :  { %s2953_s9 = scalar_lea.hbm %s3575_s11, 256 }
 0xa4f   :  { %p2954_p13 = scmp.ne.s32.totalorder %s3575_s11, %s2953_s9  ;;  %p2957_p0 = scmp.lt.u32.totalorder %s2953_s9, %s3575_s11 }
 0xa51   :  { %p2959_p1 = pnand %p2957_p0, %p2954_p13 }
 0xa53   :  { %2962 = shalt.err (!%p2959_p1)
}
 0xa54   :  { %2548 = dma.vmem_to_hbm [thread:$0]  %s2543_s16, 256, %s3575_s11, [#allocation3], %s2980_s14, %s2980_s14, %s2977_s27  }
 0xa55   :  { %2963 = dma.done.wait [#allocation3], 256  }
 0xa56   :  { %2964 = vsyncadd [#allocation3], 4294967040 }
 0xa57   :  { %2965 = dma.done.wait [#allocation5], 256  }
 0xa58   :  { %2966 = vsyncadd [#allocation5], 4294967040 }
 0xa59   :  { %2567 = vsyncpa [#allocation3], 1 }
 0xa5a   :  { %2568 = vsyncpa [#allocation5], 1 }

// kernel: tpu_custom_call.1
= control target key start
LH: loop header
LB: loop body
LE: loop exit
PB: predicated region body
PF: predicated region fallthrough
CT: control target
= control target key end

     0   :  { %18 = vsyncpa [#allocation3], 0  ;;  %v1875_v1 = vmov 0.0   ;;  %vm1876_vm0 = vmmov 0   ;;  %vm75_vm1 = vcmask 261120   ;;  %s2303_s0 = inlined_call_operand.vmem [shape: bf16[2,8,32], index: 0, kind: input, shape index: {}]   ;;  %s2304_s1 = inlined_call_operand.vmem [shape: bf16[2,8,32], index: 1, kind: input, shape index: {}]   ;;  %s2305_s2 = inlined_call_operand.vmem [shape: f32[2,1,8], index: 2, kind: input, shape index: {}]   ;;  %s2306_s3 = inlined_call_operand.vmem [shape: bf16[32,32], index: 3, kind: input, shape index: {}]   ;;  %s2307_s4 = inlined_call_operand.vmem [shape: bf16[32,64], index: 4, kind: input, shape index: {}]   ;;  %s2308_s5 = inlined_call_operand.vmem [shape: bf16[32,32], index: 5, kind: input, shape index: {}]   ;;  %s2309_s6 = inlined_call_operand.vmem [shape: bf16[32,128], index: 6, kind: input, shape index: {}]   ;;  %s2310_s7 = inlined_call_operand.vmem [shape: bf16[128,32], index: 7, kind: input, shape index: {}]   ;;  %s2311_s8 = inlined_call_operand.vmem [shape: f32[8,32], index: 8, kind: input, shape index: {}]   ;;  %s2312_s9 = inlined_call_operand.vmem [shape: f32[1,64], index: 9, kind: input, shape index: {}]   ;;  %s2313_s10 = inlined_call_operand.vmem [shape: f32[1,128], index: 10, kind: input, shape index: {}]   ;;  %s2314_s11 = inlined_call_operand.hbm [shape: f32[2,8,32], index: 11, kind: output, shape index: {0}]   ;;  %s2315_s12 = inlined_call_operand.hbm [shape: f32[2,8,8], index: 12, kind: output, shape index: {1}]  }
   0x1   :  { %v1767_v0 = vld [vmem:[%s2306_s3] sm:$0xff]   ;;  %1592 = vmatprep.subr.bf16.mxu1 %v1875_v1  ;;  %v1768_v2 = vld [vmem:[%s2306_s3 + $0x8] sm:$0xff]   ;;  %1620 = vmatprep.subr.bf16.mxu0 %v1875_v1 }
   0x2   :  { %1593 = vmatpush3.bf16.msra.mxu1 %v1767_v0  ;;  %1596 = vmatprep.mubr.msk.bf16.mxu1 %vm1876_vm0, %v1875_v1  ;;  %v1965_v3 = vld [vmem:[%s2303_s0] sm:$0xff]   ;;  %v1771_v5 = vld [vmem:[%s2307_s4 + $0x8] sm:$0xff]  }
   0x3   :  { %1594 = vmatprep.subr.bf16.mxu1 %v1875_v1  ;;  %1622 = vmatprep.mubr.msk.bf16.mxu0 %vm1876_vm0, %v1875_v1  ;;  %v1770_v4 = vld [vmem:[%s2307_s4] sm:$0xff]  }
   0x4   :  { %v1772_v6 = vld [vmem:[%s2304_s1] sm:$0xff]  }
   0x6   :  { %1595 = vmatpush3.bf16.msra.mxu1 %v1768_v2 }
   0x7   :  { %1600 = vmatprep.subr.bf16.mxu1 %v1875_v1 }
   0x9   :  { %1597 = vmatmul.mubr.msk.bf16.vlgmr.msra.gmra.mrb[0].mxu1 %vm75_vm1, %v1965_v3 }
   0xa   :  { %1601 = vmatpush3.bf16.msra.mxu1 %v1770_v4  ;;  %1604 = vmatprep.mubr.msk.bf16.mxu1 %vm1876_vm0, %v1875_v1 }
   0xb   :  { %1602 = vmatprep.subr.bf16.mxu1 %v1875_v1 }
   0xc   :  { %19 = vsyncpa [#allocation5], 0  ;;  %v54_v7 = vlaneseq  ;;  %v1995_v10 = vld [vmem:[%s2311_s8] sm:$0xff]  ;;  %s1877_s1 = smov 120   ;;  %vm235_vm2 = vcmask 64512   ;;  %s1878_s16 = smov 104  }
   0xd   :  { %v1501_v19 = vld [vmem:[%s2312_s9] ss:$0 sm:$0xff]  ;;  %s1879_s17 = smov 112   ;;  %s1880_s9 = smov 96   ;;  %vm705_vm3 = vcmask 1043456   ;;  %vm1098_vm4 = vcmask 130048  }
   0xe   :  { %1603 = vmatpush3.bf16.msra.mxu1 %v1771_v5  ;;  %v1989_v8 = vshrl.u32 %v54_v7, 7  ;;  %v1506_v51 = vld [vmem:[%s2305_s2] ss:$0 sm:$0xff]  ;;  %s1881_s25 = smov 8   ;;  %s1882_s26 = smov 16   ;;  %vm1100_vm5 = vcmask 195584  }
   0xf   :  { %1608 = vmatprep.subr.bf16.mxu1 %v1875_v1 }
  0x10   :  { %v56_v9 = vsub.s32 0, %v1989_v8 }
  0x11   :  { %1605 = vmatmul.mubr.msk.bf16.vlgmr.msra.gmra.mrb[4].mxu1 %vm75_vm1, %v1772_v6 }
  0x12   :  { %1610 = vmatprep.mubr.msk.bf16.mxu1 %vm1876_vm0, %v1875_v1  ;;  %v57_v11 = vrot.slane %v1995_v10, %v56_v9 }
  0xdc   :  { %v113_v12 = vpop.f32.mrb[0].mxu1 }
  0xdd   :  { %v1598_v13 = vpop.f32.mrb[1].mxu1  ;;  %v114_v15 = vadd.f32 %v113_v12, %v57_v11 }
  0xde   :  { %v116_v14 = vpop.f32.mrb[2].mxu1 }
  0xdf   :  { %v117_v16 = vadd.f32 %v116_v14, %v57_v11  ;;  %v1599_v17 = vpop.f32.mrb[3].mxu1  ;;  %v1507_v14 = vld [vmem:[%s2305_s2 + $0x1] ss:$0 sm:$0xff] }
  0xe1   :  { %v191_v18 = vpack.c.bf16 %v117_v16, %v114_v15 }
  0xe3   :  { %193 = vrot.lane.b32.xlu1 %v191_v18, %s1877_s1  ;;  %v199_v29 = vrot.slane %v191_v18, 4 }
  0xe4   :  { %v184_v20 = vpop.f32.mrb[4].mxu1 }
  0xe5   :  { %v1606_v21 = vpop.f32.mrb[5].mxu1  ;;  %v185_v23 = vadd.f32 %v1501_v19, %v184_v20 }
  0xe6   :  { %v187_v22 = vpop.f32.mrb[6].mxu1 }
  0xe7   :  { %v188_v24 = vadd.f32 %v1501_v19, %v187_v22  ;;  %v1607_v25 = vpop.f32.mrb[7].mxu1 }
  0xe9   :  { %v206_v26 = vpack.c.bf16 %v188_v24, %v185_v23 }
  0xeb   :  { %212 = vrot.lane.b32.xlu1 %v206_v26, %s1878_s16  ;;  %208 = vrot.lane.b32.xlu0 %v206_v26, %s1877_s1  ;;  %v240_v27 = vsel %vm235_vm2, %v206_v26, 0  ;;  %v2003_v28 = vrot.slane %v206_v26, 4 }
  0xec   :  { %1609 = vmatpush3.bf16.xpose.msra.mxu1 %v240_v27 }
  0xed   :  { %1614 = vmatprep.subr.bf16.mxu1 %v1875_v1  ;;  %v424_v40 = vsel %vm235_vm2, %v2003_v28, 0 }
  0xef   :  { %197 = vrot.lane.b32.xlu1 %v191_v18, %s1878_s16  ;;  %210 = vrot.lane.b32.xlu0 %v206_v26, %s1879_s17 }
  0xf3   :  { %195 = vrot.lane.b32.xlu0 %v191_v18, %s1879_s17  ;;  %1611 = vmatmul.mubr.msk.bf16.vlgmr.msra.gmra.mrb[8].mxu1 %vm235_vm2, %v191_v18 }
  0xf4   :  { %217 = vrot.lane.b32.xlu1 %v2003_v28, %s1879_s17  ;;  %1616 = vmatprep.mubr.msk.bf16.mxu1 %vm1876_vm0, %v1875_v1 }
  0xf7   :  { %215 = vrot.lane.b32.xlu0 %v2003_v28, %s1877_s1 }
  0xf8   :  { %219 = vrot.lane.b32.xlu1 %v2003_v28, %s1878_s16 }
  0xfb   :  { %200 = vrot.lane.b32.xlu0 %v199_v29, %s1877_s1 }
  0xfc   :  { %204 = vrot.lane.b32.xlu1 %v199_v29, %s1878_s16 }
  0xff   :  { %202 = vrot.lane.b32.xlu0 %v199_v29, %s1879_s17 }
 0x100   :  { %700 = vrot.lane.b32.xlu1 %v206_v26, %s1880_s9 }
 0x155   :  { %v194_v30 = vpop.permute.xlu1 %193 }
 0x15d   :  { %v2012_v31 = vpop.permute.xlu1 %212  ;;  %v2014_v32 = vpop.permute.xlu0 %208 }
 0x15e   :  { %v286_v33 = vsel %vm235_vm2, %v2014_v32, 0  ;;  %v378_v38 = vsel %vm235_vm2, %v2012_v31, 0 }
 0x15f   :  { %1615 = vmatpush3.bf16.xpose.msra.mxu1 %v286_v33 }
 0x160   :  { %1626 = vmatprep.subr.bf16.mxu1 %v1875_v1 }
 0x161   :  { %v198_v34 = vpop.permute.xlu1 %197  ;;  %v2019_v35 = vpop.permute.xlu0 %210 }
 0x162   :  { %v332_v36 = vsel %vm235_vm2, %v2019_v35, 0 }
 0x163   :  { %1621 = vmatpush3.bf16.xpose.msra.mxu0 %v332_v36 }
 0x164   :  { %1632 = vmatprep.subr.bf16.mxu0 %v1875_v1 }
 0x165   :  { %v196_v37 = vpop.permute.xlu0 %195 }
 0x166   :  { %v2026_v39 = vpop.permute.xlu1 %217  ;;  %1617 = vmatmul.mubr.msk.bf16.vlgmr.msra.gmra.mrb[12].mxu1 %vm235_vm2, %v194_v30 }
 0x167   :  { %1627 = vmatpush3.bf16.xpose.msra.mxu1 %v378_v38  ;;  %1628 = vmatprep.mubr.msk.bf16.mxu1 %vm1876_vm0, %v1875_v1  ;;  %v516_v45 = vsel %vm235_vm2, %v2026_v39, 0 }
 0x168   :  { %1638 = vmatprep.subr.bf16.mxu1 %v1875_v1 }
 0x169   :  { %v2037_v42 = vpop.permute.xlu0 %215 }
 0x16a   :  { %1623 = vmatmul.mubr.msk.bf16.vlgmr.msra.gmra.mrb[0].mxu0 %vm235_vm2, %v196_v37  ;;  %v2035_v41 = vpop.permute.xlu1 %219  ;;  %v470_v43 = vsel %vm235_vm2, %v2037_v42, 0 }
 0x16b   :  { %1633 = vmatpush3.bf16.xpose.msra.mxu0 %v424_v40  ;;  %1634 = vmatprep.mubr.msk.bf16.mxu0 %vm1876_vm0, %v1875_v1  ;;  %v562_v47 = vsel %vm235_vm2, %v2035_v41, 0 }
 0x16c   :  { %1644 = vmatprep.subr.bf16.mxu0 %v1875_v1 }
 0x16d   :  { %v201_v46 = vpop.permute.xlu0 %200 }
 0x16e   :  { %1629 = vmatmul.mubr.msk.bf16.vlgmr.msra.gmra.mrb[16].mxu1 %vm235_vm2, %v198_v34  ;;  %v205_v44 = vpop.permute.xlu1 %204 }
 0x16f   :  { %1639 = vmatpush3.bf16.xpose.msra.mxu1 %v470_v43  ;;  %1640 = vmatprep.mubr.msk.bf16.mxu1 %vm1876_vm0, %v1875_v1 }
 0x170   :  { %1650 = vmatprep.subr.bf16.mxu1 %v1875_v1 }
 0x171   :  { %v203_v49 = vpop.permute.xlu0 %202 }
 0x172   :  { %1635 = vmatmul.mubr.msk.bf16.vlgmr.msra.gmra.mrb[4].mxu0 %vm235_vm2, %v199_v29  ;;  %v701_v48 = vpop.permute.xlu1 %700 }
 0x173   :  { %1645 = vmatpush3.bf16.xpose.msra.mxu0 %v516_v45  ;;  %1646 = vmatprep.mubr.msk.bf16.mxu0 %vm1876_vm0, %v1875_v1  ;;  %v707_v50 = vsel %vm705_vm3, %v701_v48, 0 }
 0x174   :  { %1656 = vmatprep.subr.bf16.mxu0 %v1875_v1 }
 0x176   :  { %1641 = vmatmul.mubr.msk.bf16.vlgmr.msra.gmra.mrb[20].mxu1 %vm235_vm2, %v201_v46 }
 0x177   :  { %1651 = vmatpush3.bf16.xpose.msra.mxu1 %v562_v47  ;;  %1652 = vmatprep.mubr.msk.bf16.mxu1 %vm1876_vm0, %v1875_v1 }
 0x178   :  { %1662 = vmatprep.subr.bf16.mxu1 %v1875_v1 }
 0x17a   :  { %1647 = vmatmul.mubr.msk.bf16.vlgmr.msra.gmra.mrb[8].mxu0 %vm235_vm2, %v203_v49 }
 0x17b   :  { %1657 = vmatpush3.bf16.msra.mxu0 %v707_v50  ;;  %1658 = vmatprep.mubr.msk.bf16.mxu0 %vm1876_vm0, %v1875_v1 }
 0x17c   :  { %1668 = vmatprep.subr.bf16.mxu0 %v1875_v1 }
 0x17e   :  { %1653 = vmatmul.mubr.msk.bf16.vlgmr.msra.gmra.mrb[24].mxu1 %vm235_vm2, %v205_v44 }
 0x17f   :  { %1664 = vmatprep.mubr.msk.bf16.mxu1 %vm1876_vm0, %v1875_v1 }
 0x1c6   :  { %v276_v52 = vpop.f32.mrb[8].mxu1 }
 0x1c7   :  { %v277_v53 = vadd.f32 %v1506_v51, %v276_v52  ;;  %v1612_v54 = vpop.f32.mrb[9].mxu1 }
 0x1c8   :  { %v279_v55 = vpop.f32.mrb[10].mxu1 }
 0x1c9   :  { %v1613_v56 = vpop.f32.mrb[11].mxu1  ;;  %v604_v57 = vsel %vm235_vm2, %v277_v53, -inf }
 0x1ca   :  { %605 = vmax.xlane.f32.xlu0 %v604_v57 }
 0x239   :  { %v322_v58 = vpop.f32.mrb[12].mxu1 }
 0x23a   :  { %v323_v59 = vadd.f32 %v1506_v51, %v322_v58  ;;  %v1618_v60 = vpop.f32.mrb[13].mxu1 }
 0x23b   :  { %v325_v61 = vpop.f32.mrb[14].mxu1 }
 0x23c   :  { %v1619_v62 = vpop.f32.mrb[15].mxu1  ;;  %v607_v63 = vsel %vm235_vm2, %v323_v59, -inf }
 0x23d   :  { %v368_v0 = vpop.f32.mrb[0].mxu0  ;;  %608 = vmax.xlane.f32.xlu1 %v607_v63 }
 0x23e   :  { %v369_v2 = vadd.f32 %v1506_v51, %v368_v0  ;;  %v1624_v4 = vpop.f32.mrb[1].mxu0 }
 0x23f   :  { %v371_v5 = vpop.f32.mrb[2].mxu0 }
 0x240   :  { %v1625_v6 = vpop.f32.mrb[3].mxu0  ;;  %v610_v7 = vsel %vm235_vm2, %v369_v2, -inf }
 0x241   :  { %611 = vmax.xlane.f32.xlu0 %v610_v7  ;;  %v414_v9 = vpop.f32.mrb[16].mxu1 }
 0x242   :  { %v415_v11 = vadd.f32 %v1506_v51, %v414_v9  ;;  %v1630_v12 = vpop.f32.mrb[17].mxu1 }
 0x243   :  { %v417_v13 = vpop.f32.mrb[18].mxu1 }
 0x244   :  { %v1631_v15 = vpop.f32.mrb[19].mxu1  ;;  %v613_v16 = vsel %vm235_vm2, %v415_v11, -inf }
 0x245   :  { %v460_v17 = vpop.f32.mrb[4].mxu0  ;;  %614 = vmax.xlane.f32.xlu0 %v613_v16 }
 0x246   :  { %v2078_v18 = vadd.f32 %v1507_v14, %v460_v17  ;;  %v1636_v19 = vpop.f32.mrb[5].mxu0 }
 0x247   :  { %v463_v20 = vpop.f32.mrb[6].mxu0 }
 0x248   :  { %v1637_v21 = vpop.f32.mrb[7].mxu0  ;;  %v616_v22 = vsel %vm235_vm2, %v2078_v18, -inf }
 0x249   :  { %617 = vmax.xlane.f32.xlu1 %v616_v22  ;;  %v506_v23 = vpop.f32.mrb[20].mxu1 }
 0x24a   :  { %v2082_v24 = vadd.f32 %v1507_v14, %v506_v23  ;;  %v1642_v25 = vpop.f32.mrb[21].mxu1 }
 0x24b   :  { %v509_v26 = vpop.f32.mrb[22].mxu1 }
 0x24c   :  { %v1643_v27 = vpop.f32.mrb[23].mxu1  ;;  %v619_v29 = vsel %vm235_vm2, %v2082_v24, -inf }
 0x24d   :  { %v552_v30 = vpop.f32.mrb[8].mxu0  ;;  %620 = vmax.xlane.f32.xlu0 %v619_v29 }
 0x24e   :  { %v553_v33 = vadd.f32 %v1507_v14, %v552_v30  ;;  %v1648_v34 = vpop.f32.mrb[9].mxu0 }
 0x24f   :  { %v555_v36 = vpop.f32.mrb[10].mxu0 }
 0x250   :  { %v1649_v37 = vpop.f32.mrb[11].mxu0  ;;  %v622_v38 = vsel %vm235_vm2, %v553_v33, -inf }
 0x251   :  { %623 = vmax.xlane.f32.xlu1 %v622_v38  ;;  %v598_v40 = vpop.f32.mrb[24].mxu1 }
 0x252   :  { %v599_v43 = vadd.f32 %v1507_v14, %v598_v40  ;;  %v1654_v44 = vpop.f32.mrb[25].mxu1 }
 0x253   :  { %v601_v45 = vpop.f32.mrb[26].mxu1 }
 0x254   :  { %v1655_v46 = vpop.f32.mrb[27].mxu1  ;;  %v625_v47 = vsel %vm235_vm2, %v599_v43, -inf }
 0x255   :  { %626 = vmax.xlane.f32.xlu0 %v625_v47 }
 0x257   :  { %v606_v48 = vpop.xlane.xlu0 %605 }
 0x258   :  { %v628_v49 = vsub.f32 %v277_v53, %v606_v48 }
 0x25a   :  { %v636_v50 = vmul.f32 1.442695, %v628_v49 }
 0x25c   :  { %1786 = vpow2.f32 %v636_v50 }
 0x262   :  { %797 = vrot.lane.b32.xlu1 %v2019_v35, %s1880_s9 }
 0x266   :  { %845 = vrot.lane.b32.xlu1 %v2012_v31, %s1880_s9  ;;  %v2094_v51 = vpop.eup %1786 }
 0x267   :  { %v652_v52 = vsel %vm235_vm2, %v2094_v51, 0.0 }
 0x26b   :  { %749 = vrot.lane.b32.xlu0 %v2014_v32, %s1880_s9 }
 0x28a   :  { %653 = vadd.xlane.f32.xlu1 %v652_v52 }
 0x2ca   :  { %v609_v54 = vpop.xlane.xlu1 %608 }
 0x2cb   :  { %v629_v55 = vsub.f32 %v323_v59, %v609_v54 }
 0x2cd   :  { %v638_v56 = vmul.f32 1.442695, %v629_v55 }
 0x2ce   :  { %v612_v35 = vpop.xlane.xlu0 %611 }
 0x2cf   :  { %1788 = vpow2.f32 %v638_v56  ;;  %v630_v57 = vsub.f32 %v369_v2, %v612_v35 }
 0x2d1   :  { %v640_v31 = vmul.f32 1.442695, %v630_v57 }
 0x2d2   :  { %v615_v58 = vpop.xlane.xlu0 %614 }
 0x2d3   :  { %1790 = vpow2.f32 %v640_v31  ;;  %v631_v32 = vsub.f32 %v415_v11, %v615_v58 }
 0x2d5   :  { %v642_v60 = vmul.f32 1.442695, %v631_v32 }
 0x2d6   :  { %v618_v7 = vpop.xlane.xlu1 %617 }
 0x2d7   :  { %1792 = vpow2.f32 %v642_v60  ;;  %v632_v9 = vsub.f32 %v2078_v18, %v618_v7 }
 0x2d9   :  { %v2098_v53 = vpop.eup %1788  ;;  %v644_v13 = vmul.f32 1.442695, %v632_v9 }
 0x2da   :  { %v655_v61 = vsel %vm235_vm2, %v2098_v53, 0.0  ;;  %v621_v63 = vpop.xlane.xlu0 %620 }
 0x2db   :  { %656 = vadd.xlane.f32.xlu0 %v655_v61  ;;  %v633_v12 = vsub.f32 %v2082_v24, %v621_v63  ;;  %1794 = vpow2.f32 %v644_v13 }
 0x2dd   :  { %v2102_v62 = vpop.eup %1790  ;;  %v646_v15 = vmul.f32 1.442695, %v633_v12 }
 0x2de   :  { %v658_v59 = vsel %vm235_vm2, %v2102_v62, 0.0  ;;  %v624_v11 = vpop.xlane.xlu1 %623 }
 0x2df   :  { %659 = vadd.xlane.f32.xlu1 %v658_v59  ;;  %v634_v14 = vsub.f32 %v553_v33, %v624_v11  ;;  %1796 = vpow2.f32 %v646_v15 }
 0x2e1   :  { %v2106_v0 = vpop.eup %1792  ;;  %v648_v16 = vmul.f32 1.442695, %v634_v14 }
 0x2e2   :  { %v627_v2 = vpop.xlane.xlu0 %626  ;;  %v661_v4 = vsel %vm235_vm2, %v2106_v0, 0.0  ;;  %v798_v20 = vpop.permute.xlu1 %797 }
 0x2e3   :  { %662 = vadd.xlane.f32.xlu0 %v661_v4  ;;  %v635_v17 = vsub.f32 %v599_v43, %v627_v2  ;;  %1798 = vpow2.f32 %v648_v16  ;;  %v803_v34 = vsel %vm705_vm3, %v798_v20, 0 }
 0x2e5   :  { %v650_v19 = vmul.f32 1.442695, %v635_v17 }
 0x2e6   :  { %v750_v5 = vpop.permute.xlu0 %749  ;;  %v846_v21 = vpop.permute.xlu1 %845 }
 0x2e7   :  { %v755_v6 = vsel %vm705_vm3, %v750_v5, 0  ;;  %1800 = vpow2.f32 %v650_v19  ;;  %v851_v46 = vsel %vm705_vm3, %v846_v21, 0 }
 0x2e8   :  { %1663 = vmatpush3.bf16.msra.mxu1 %v755_v6 }
 0x2e9   :  { %1674 = vmatprep.subr.bf16.mxu1 %v1875_v1 }
 0x2f0   :  { %941 = vrot.lane.b32.xlu1 %v2037_v42, %s1880_s9  ;;  %v2118_v42 = vpop.eup %1794 }
 0x2f1   :  { %v664_v18 = vsel %vm235_vm2, %v2118_v42, 0.0 }
 0x2f9   :  { %893 = vrot.lane.b32.xlu0 %v2003_v28, %s1880_s9  ;;  %v2120_v28 = vpop.eup %1796 }
 0x2fa   :  { %v2124_v22 = vpop.eup %1798  ;;  %v667_v25 = vsel %vm235_vm2, %v2120_v28, 0.0 }
 0x2fb   :  { %v670_v24 = vsel %vm235_vm2, %v2124_v22, 0.0  ;;  %v2130_v26 = vpop.eup %1800 }
 0x2fc   :  { %v673_v27 = vsel %vm235_vm2, %v2130_v26, 0.0 }
 0x314   :  { %665 = vadd.xlane.f32.xlu1 %v664_v18 }
 0x317   :  { %v654_v23 = vpop.xlane.xlu1 %653 }
 0x318   :  { %1802 = vrcp.f32 %v654_v23  ;;  %671 = vadd.xlane.f32.xlu1 %v670_v24  ;;  %668 = vadd.xlane.f32.xlu0 %v667_v25 }
 0x31c   :  { %674 = vadd.xlane.f32.xlu0 %v673_v27 }
 0x322   :  { %v1803_v29 = vpop.eup %1802 }
 0x323   :  { %v684_v30 = vmul.f32 %v1803_v29, %v2094_v51 }
 0x325   :  { %v692_v33 = vpack.c.bf16 %v684_v30, %v684_v30  ;;  %v1446_v48 = vsel %vm235_vm2, %v684_v30, 0.0 }
 0x327   :  { %1659 = vmatmul.mubr.msk.bf16.vlgmr.msra.gmra.mrb[12].mxu0 %vm235_vm2, %v692_v33 }
 0x328   :  { %1669 = vmatpush3.bf16.msra.mxu0 %v803_v34  ;;  %1670 = vmatprep.mubr.msk.bf16.mxu0 %vm1876_vm0, %v1875_v1 }
 0x329   :  { %1037 = vrot.lane.b32.xlu1 %v2035_v41, %s1880_s9  ;;  %1680 = vmatprep.subr.bf16.mxu0 %v1875_v1 }
 0x332   :  { %989 = vrot.lane.b32.xlu0 %v2026_v39, %s1880_s9 }
 0x368   :  { %v657_v36 = vpop.xlane.xlu0 %656 }
 0x369   :  { %1804 = vrcp.f32 %v657_v36 }
 0x36c   :  { %v660_v37 = vpop.xlane.xlu1 %659 }
 0x36d   :  { %1806 = vrcp.f32 %v660_v37 }
 0x370   :  { %v663_v38 = vpop.xlane.xlu0 %662  ;;  %v942_v56 = vpop.permute.xlu1 %941 }
 0x371   :  { %1808 = vrcp.f32 %v663_v38  ;;  %v947_v32 = vsel %vm705_vm3, %v942_v56, 0 }
 0x373   :  { %v1805_v40 = vpop.eup %1804 }
 0x374   :  { %v685_v43 = vmul.f32 %v1805_v40, %v2098_v53  ;;  %v894_v39 = vpop.permute.xlu0 %893 }
 0x375   :  { %v899_v55 = vsel %vm705_vm3, %v894_v39, 0  ;;  %v1773_v39 = vld [vmem:[%s2308_s5] sm:$0xff]  }
 0x376   :  { %v693_v44 = vpack.c.bf16 %v685_v43, %v685_v43  ;;  %v1447_v41 = vsel %vm235_vm2, %v685_v43, 0.0 }
 0x377   :  { %v1807_v45 = vpop.eup %1806  ;;  %v1448_v52 = vadd.f32 %v1447_v41, %v1446_v48 }
 0x378   :  { %v686_v47 = vmul.f32 %v1807_v45, %v2102_v62  ;;  %1665 = vmatmul.mubr.msk.bf16.vlgmr.msra.gmra.mrb[28].mxu1 %vm235_vm2, %v693_v44 }
 0x379   :  { %1675 = vmatpush3.bf16.msra.mxu1 %v851_v46  ;;  %1676 = vmatprep.mubr.msk.bf16.mxu1 %vm1876_vm0, %v1875_v1 }
 0x37a   :  { %v1449_v49 = vsel %vm235_vm2, %v686_v47, 0.0  ;;  %v694_v50 = vpack.c.bf16 %v686_v47, %v686_v47  ;;  %1686 = vmatprep.subr.bf16.mxu1 %v1875_v1 }
 0x37b   :  { %v1809_v51 = vpop.eup %1808  ;;  %v1450_v35 = vadd.f32 %v1449_v49, %v1448_v52 }
 0x37c   :  { %v687_v54 = vmul.f32 %v1809_v51, %v2106_v0  ;;  %1671 = vmatmul.mubr.msk.bf16.vlgmr.msra.gmra.mrb[16].mxu0 %vm235_vm2, %v694_v50  ;;  %v1774_v51 = vld [vmem:[%s2308_s5 + $0x8] sm:$0xff]   ;;  %s1883_s5 = smov 24  }
 0x37d   :  { %1681 = vmatpush3.bf16.msra.mxu0 %v899_v55  ;;  %1682 = vmatprep.mubr.msk.bf16.mxu0 %vm1876_vm0, %v1875_v1 }
 0x37e   :  { %v695_v57 = vpack.c.bf16 %v687_v54, %v687_v54  ;;  %1692 = vmatprep.subr.bf16.mxu0 %v1875_v1  ;;  %v1451_v31 = vsel %vm235_vm2, %v687_v54, 0.0 }
 0x37f   :  { %v1452_v58 = vadd.f32 %v1451_v31, %v1450_v35 }
 0x380   :  { %1677 = vmatmul.mubr.msk.bf16.vlgmr.msra.gmra.mrb[32].mxu1 %vm235_vm2, %v695_v57 }
 0x381   :  { %1687 = vmatpush3.bf16.msra.mxu1 %v947_v32  ;;  %1688 = vmatprep.mubr.msk.bf16.mxu1 %vm1876_vm0, %v1875_v1  ;;  %v1461_v60 = vmul.f32 0.25, %v1452_v58 }
 0x382   :  { %1698 = vmatprep.subr.bf16.mxu1 %v1875_v1 }
 0x383   :  { %1463 = vst.msk [vmem:[#allocation4] sm:$0xff] %vm235_vm2, %v1461_v60 }
 0x3a1   :  { %v666_v53 = vpop.xlane.xlu1 %665 }
 0x3a2   :  { %1810 = vrcp.f32 %v666_v53 }
 0x3a5   :  { %v672_v61 = vpop.xlane.xlu1 %671  ;;  %v669_v62 = vpop.xlane.xlu0 %668 }
 0x3a6   :  { %1812 = vrcp.f32 %v672_v61 }
 0x3a7   :  { %1814 = vrcp.f32 %v669_v62 }
 0x3a9   :  { %v675_v63 = vpop.xlane.xlu0 %674  ;;  %v1038_v12 = vpop.permute.xlu1 %1037 }
 0x3aa   :  { %1816 = vrcp.f32 %v675_v63 }
 0x3ac   :  { %v1811_v59 = vpop.eup %1810 }
 0x3ad   :  { %v688_v0 = vmul.f32 %v1811_v59, %v2118_v42  ;;  %v990_v2 = vpop.permute.xlu0 %989  ;;  %v1043_v42 = vsel %vm705_vm3, %v1038_v12, 0 }
 0x3ae   :  { %v995_v7 = vsel %vm705_vm3, %v990_v2, 0 }
 0x3af   :  { %v696_v4 = vpack.c.bf16 %v688_v0, %v688_v0  ;;  %v1453_v14 = vsel %vm235_vm2, %v688_v0, 0.0 }
 0x3b0   :  { %v1813_v5 = vpop.eup %1812 }
 0x3b1   :  { %v1815_v6 = vpop.eup %1814  ;;  %1683 = vmatmul.mubr.msk.bf16.vlgmr.msra.gmra.mrb[20].mxu0 %vm235_vm2, %v696_v4  ;;  %v690_v9 = vmul.f32 %v1813_v5, %v2124_v22 }
 0x3b2   :  { %v689_v11 = vmul.f32 %v1815_v6, %v2120_v28  ;;  %1693 = vmatpush3.bf16.msra.mxu0 %v995_v7  ;;  %1694 = vmatprep.mubr.msk.bf16.mxu0 %vm1876_vm0, %v1875_v1 }
 0x3b3   :  { %1704 = vmatprep.subr.bf16.mxu0 %v1875_v1  ;;  %v1456_v20 = vsel %vm235_vm2, %v690_v9, 0.0  ;;  %v698_v28 = vpack.c.bf16 %v690_v9, %v690_v9 }
 0x3b4   :  { %v1817_v13 = vpop.eup %1816  ;;  %v1454_v15 = vsel %vm235_vm2, %v689_v11, 0.0  ;;  %v697_v16 = vpack.c.bf16 %v689_v11, %v689_v11 }
 0x3b5   :  { %v1455_v17 = vadd.f32 %v1454_v15, %v1453_v14  ;;  %v691_v19 = vmul.f32 %v1817_v13, %v2130_v26 }
 0x3b6   :  { %1689 = vmatmul.mubr.msk.bf16.vlgmr.msra.gmra.mrb[36].mxu1 %vm235_vm2, %v697_v16 }
 0x3b7   :  { %1699 = vmatpush3.bf16.msra.mxu1 %v1043_v42  ;;  %1700 = vmatprep.mubr.msk.bf16.mxu1 %vm1876_vm0, %v1875_v1  ;;  %v1457_v21 = vadd.f32 %v1456_v20, %v1455_v17  ;;  %v1458_v18 = vsel %vm235_vm2, %v691_v19, 0.0  ;;  %v699_v24 = vpack.c.bf16 %v691_v19, %v691_v19  ;;  %v1124_v42 = vsub.s32 1, %v1989_v8 }
 0x3b8   :  { %1712 = vmatprep.subr.bf16.mxu1 %v1875_v1 }
 0x3b9   :  { %1695 = vmatmul.mubr.msk.bf16.vlgmr.msra.gmra.mrb[24].mxu0 %vm235_vm2, %v698_v28  ;;  %v1459_v22 = vadd.f32 %v1458_v18, %v1457_v21  ;;  %v1125_v28 = vrot.slane %v1995_v10, %v1124_v42  ;;  %v1182_v21 = vunpack.c.l.bf16 %v1965_v3 }
 0x3ba   :  { %1708 = vmatprep.mubr.msk.bf16.mxu0 %vm1876_vm0, %v1875_v1  ;;  %1705 = vmatpush3.bf16.msra.mxu0 %v1773_v39  ;;  %v1776_v39 = vld [vmem:[%s2309_s6 + $0x8] sm:$0xff]  }
 0x3bb   :  { %v1462_v23 = vmul.f32 0.25, %v1459_v22  ;;  %1706 = vmatprep.subr.bf16.mxu0 %v1875_v1 }
 0x3bd   :  { %1464 = vst.msk [vmem:[#allocation4 + $0x8] sm:$0xff] %vm235_vm2, %v1462_v23 }
 0x3be   :  { %1701 = vmatmul.mubr.msk.bf16.vlgmr.msra.gmra.mrb[40].mxu1 %vm235_vm2, %v699_v24  ;;  %1707 = vmatpush3.bf16.msra.mxu0 %v1774_v51  ;;  %v1183_v24 = vunpack.c.h.bf16 %v1965_v3  ;;  %v1780_v51 = vld [vmem:[%s2310_s7 + $0x18] sm:$0xff]  }
 0x3bf   :  { %1716 = vmatprep.mubr.msk.bf16.mxu1 %vm1876_vm0, %v1875_v1  ;;  %1720 = vmatprep.subr.bf16.mxu0 %v1875_v1 }
 0x3fa   :  { %v743_v25 = vpop.f32.mrb[12].mxu0 }
 0x3fb   :  { %v1660_v26 = vpop.f32.mrb[13].mxu0 }
 0x3fc   :  { %v746_v27 = vpop.f32.mrb[14].mxu0 }
 0x3fd   :  { %v1661_v29 = vpop.f32.mrb[15].mxu0 }
 0x44b   :  { %v791_v30 = vpop.f32.mrb[28].mxu1 }
 0x44c   :  { %v1666_v33 = vpop.f32.mrb[29].mxu1 }
 0x44d   :  { %v794_v34 = vpop.f32.mrb[30].mxu1 }
 0x44e   :  { %v1667_v36 = vpop.f32.mrb[31].mxu1 }
 0x44f   :  { %v839_v37 = vpop.f32.mrb[16].mxu0 }
 0x450   :  { %v1672_v38 = vpop.f32.mrb[17].mxu0 }
 0x451   :  { %v842_v40 = vpop.f32.mrb[18].mxu0 }
 0x452   :  { %v1673_v43 = vpop.f32.mrb[19].mxu0 }
 0x453   :  { %v887_v44 = vpop.f32.mrb[32].mxu1 }
 0x454   :  { %v1678_v45 = vpop.f32.mrb[33].mxu1 }
 0x455   :  { %v890_v46 = vpop.f32.mrb[34].mxu1 }
 0x456   :  { %v1679_v41 = vpop.f32.mrb[35].mxu1 }
 0x484   :  { %v935_v47 = vpop.f32.mrb[20].mxu0 }
 0x485   :  { %v1684_v48 = vpop.f32.mrb[21].mxu0 }
 0x486   :  { %v938_v49 = vpop.f32.mrb[22].mxu0  ;;  %v1777_v48 = vld [vmem:[%s2310_s7] sm:$0xff]  }
 0x487   :  { %v1685_v50 = vpop.f32.mrb[23].mxu0  ;;  %v1778_v49 = vld [vmem:[%s2310_s7 + $0x8] sm:$0xff]  }
 0x488   :  { %v1779_v50 = vld [vmem:[%s2310_s7 + $0x10] sm:$0xff]  }
 0x489   :  { %v983_v52 = vpop.f32.mrb[36].mxu1 }
 0x48a   :  { %v1752_v54 = vpack.i.bf16 %v983_v52, %v791_v30  ;;  %v1690_v55 = vpop.f32.mrb[37].mxu1  ;;  %v1781_v52 = vld [vmem:[%s2310_s7 + $0x20] sm:$0xff]  }
 0x48b   :  { %v986_v56 = vpop.f32.mrb[38].mxu1 }
 0x48c   :  { %1753 = vrot.lane.b32.xlu0 %v1752_v54, %s1881_s25  ;;  %v1691_v35 = vpop.f32.mrb[39].mxu1  ;;  %v1031_v57 = vpop.f32.mrb[24].mxu0  ;;  %v1782_v54 = vld [vmem:[%s2310_s7 + $0x28] sm:$0xff]  }
 0x48d   :  { %v1757_v31 = vpack.i.bf16 %v1031_v57, %v839_v37  ;;  %v1696_v58 = vpop.f32.mrb[25].mxu0 }
 0x48e   :  { %v1034_v32 = vpop.f32.mrb[26].mxu0 }
 0x48f   :  { %1758 = vrot.lane.b32.xlu1 %v1757_v31, %s1882_s26  ;;  %v1697_v60 = vpop.f32.mrb[27].mxu0  ;;  %v1215_v32 = vsub.s32 2, %v1989_v8 }
 0x491   :  { %v1079_v53 = vpop.f32.mrb[40].mxu1  ;;  %v1216_v60 = vrot.slane %v1995_v10, %v1215_v32 }
 0x492   :  { %v1762_v61 = vpack.i.bf16 %v1079_v53, %v887_v44  ;;  %v1702_v62 = vpop.f32.mrb[41].mxu1  ;;  %v1221_v53 = vsub.s32 3, %v1989_v8 }
 0x493   :  { %v1082_v63 = vpop.f32.mrb[42].mxu1 }
 0x494   :  { %1763 = vrot.lane.b32.xlu0 %v1762_v61, %s1883_s5  ;;  %v1703_v59 = vpop.f32.mrb[43].mxu1 }
 0x4fe   :  { %v1754_v0 = vpop.permute.xlu0 %1753 }
 0x4ff   :  { %v1756_v4 = vunpack.i.h.bf16 %v1754_v0  ;;  %v1755_v5 = vunpack.i.l.bf16 %v1754_v0 }
 0x501   :  { %v1759_v2 = vpop.permute.xlu1 %1758  ;;  %v1114_v11 = vsel %vm235_vm2, %v935_v47, %v1756_v4  ;;  %v1097_v12 = vsel %vm235_vm2, %v743_v25, %v1755_v5  ;;  %v1775_v47 = vld [vmem:[%s2309_s6] sm:$0xff]  }
 0x502   :  { %v1761_v6 = vunpack.i.h.bf16 %v1759_v2  ;;  %v1760_v7 = vunpack.i.l.bf16 %v1759_v2  ;;  %1713 = vmatpush3.bf16.msra.mxu1 %v1775_v47  ;;  %v1222_v2 = vrot.slane %v1995_v10, %v1221_v53 }
 0x503   :  { %1714 = vmatprep.subr.bf16.mxu1 %v1875_v1 }
 0x504   :  { %v1099_v15 = vsel %vm1098_vm4, %v1097_v12, %v1760_v7  ;;  %v1115_v16 = vsel %vm1098_vm4, %v1114_v11, %v1761_v6  ;;  %v1784_v11 = vld [vmem:[%s2310_s7 + $0x38] sm:$0xff]   ;;  %v1527_v12 = vld [vmem:[%s2313_s10] ss:$0 sm:$0xff] }
 0x506   :  { %v1764_v9 = vpop.permute.xlu0 %1763  ;;  %1715 = vmatpush3.bf16.msra.mxu1 %v1776_v39 }
 0x507   :  { %v1766_v13 = vunpack.i.h.bf16 %v1764_v9  ;;  %v1765_v14 = vunpack.i.l.bf16 %v1764_v9  ;;  %v1783_v9 = vld [vmem:[%s2310_s7 + $0x30] sm:$0xff]   ;;  %s1884_s7 = smov [#allocation4]  }
 0x508   :  { %s1482_s10 = sshll.u32 %s1884_s7, 4  ;;  %s1483_s10 = int_to_ptr.vmem [resolvable:$true] %s1482_s10 }
 0x509   :  { %v1116_v17 = vsel %vm1100_vm5, %v1115_v16, %v1766_v13  ;;  %v1101_v19 = vsel %vm1100_vm5, %v1099_v15, %v1765_v14  ;;  %s1827_s24 = scalar_lea.vmem %s1483_s10, 256  ;;  %p1832_p1 = scmp.lt.s32.totalorder %s1483_s10, %s1483_s10 }
 0x50a   :  { %v1117_v20 = vpack.c.bf16 %v1116_v17, %v1101_v19  ;;  %p1828_p0 = scmp.ne.s32.totalorder %s1483_s10, %s1827_s24  ;;  %p1833_p2 = scmp.lt.s32.totalorder %s1827_s24, %s1827_s24 }
 0x50c   :  { %1709 = vmatmul.mubr.msk.bf16.vlgmr.msra.gmra.mrb[28].mxu0 %vm75_vm1, %v1117_v20  ;;  %p1834_p3 = por %p1833_p2, %p1832_p1 }
 0x50d   :  { %1736 = vmatprep.mubr.msk.bf16.mxu0 %vm1876_vm0, %v1875_v1  ;;  %1721 = vmatpush3.bf16.msra.mxu0 %v1777_v48 }
 0x50e   :  { %1722 = vmatprep.subr.bf16.mxu0 %v1875_v1  ;;  %p1835_p4 = pnand %p1834_p3, %p1828_p0 }
 0x511   :  { %1723 = vmatpush3.bf16.msra.mxu0 %v1778_v49 }
 0x512   :  { %1724 = vmatprep.subr.bf16.mxu0 %v1875_v1 }
 0x515   :  { %1725 = vmatpush3.bf16.msra.mxu0 %v1779_v50 }
 0x516   :  { %1726 = vmatprep.subr.bf16.mxu0 %v1875_v1 }
 0x519   :  { %1727 = vmatpush3.bf16.msra.mxu0 %v1780_v51 }
 0x51a   :  { %1728 = vmatprep.subr.bf16.mxu0 %v1875_v1 }
 0x51d   :  { %1729 = vmatpush3.bf16.msra.mxu0 %v1781_v52 }
 0x51e   :  { %1730 = vmatprep.subr.bf16.mxu0 %v1875_v1 }
 0x521   :  { %1731 = vmatpush3.bf16.msra.mxu0 %v1782_v54 }
 0x522   :  { %1732 = vmatprep.subr.bf16.mxu0 %v1875_v1 }
 0x525   :  { %1733 = vmatpush3.bf16.msra.mxu0 %v1783_v9 }
 0x526   :  { %1734 = vmatprep.subr.bf16.mxu0 %v1875_v1  ;;  %v1313_v1 = vsub.s32 4, %v1989_v8 }
 0x529   :  { %1735 = vmatpush3.bf16.msra.mxu0 %v1784_v11 }
 0x5df   :  { %v1175_v18 = vpop.f32.mrb[28].mxu0 }
 0x5e0   :  { %v1176_v22 = vadd.f32 %v1175_v18, %v1125_v28  ;;  %v1710_v23 = vpop.f32.mrb[29].mxu0 }
 0x5e1   :  { %v1178_v25 = vpop.f32.mrb[30].mxu0 }
 0x5e2   :  { %v1179_v26 = vadd.f32 %v1178_v25, %v1125_v28  ;;  %v1711_v27 = vpop.f32.mrb[31].mxu0  ;;  %v1184_v29 = vadd.f32 %v1182_v21, %v1176_v22  ;;  %v1314_v21 = vrot.slane %v1995_v10, %v1313_v1 }
 0x5e4   :  { %v1186_v30 = vsel %vm75_vm1, %v1184_v29, 0.0  ;;  %v1185_v33 = vadd.f32 %v1183_v24, %v1179_v26 }
 0x5e5   :  { %1187 = vadd.xlane.f32.xlu1 %v1186_v30 }
 0x5e6   :  { %v1189_v34 = vsel %vm75_vm1, %v1185_v33, 0.0 }
 0x5e7   :  { %1190 = vadd.xlane.f32.xlu0 %v1189_v34 }
 0x672   :  { %v1188_v36 = vpop.xlane.xlu1 %1187 }
 0x673   :  { %v1193_v37 = vmul.f32 0.03125, %v1188_v36 }
 0x674   :  { %v1191_v38 = vpop.xlane.xlu0 %1190 }
 0x675   :  { %v1195_v40 = vsub.f32 %v1184_v29, %v1193_v37  ;;  %v1194_v43 = vmul.f32 0.03125, %v1191_v38 }
 0x677   :  { %v1196_v44 = vsub.f32 %v1185_v33, %v1194_v43  ;;  %v1197_v45 = vmul.f32 %v1195_v40, %v1195_v40 }
 0x679   :  { %v1199_v3 = vsel %vm75_vm1, %v1197_v45, 0.0  ;;  %v1198_v46 = vmul.f32 %v1196_v44, %v1196_v44 }
 0x67a   :  { %1200 = vadd.xlane.f32.xlu0 %v1199_v3 }
 0x67b   :  { %v1202_v41 = vsel %vm75_vm1, %v1198_v46, 0.0 }
 0x67c   :  { %1203 = vadd.xlane.f32.xlu1 %v1202_v41 }
 0x707   :  { %v1201_v55 = vpop.xlane.xlu0 %1200 }
 0x708   :  { %v1205_v56 = vmul.f32 0.03125, %v1201_v55 }
 0x709   :  { %v1204_v35 = vpop.xlane.xlu1 %1203 }
 0x70a   :  { %v1207_v57 = vadd.f32 1e-05, %v1205_v56  ;;  %v1206_v31 = vmul.f32 0.03125, %v1204_v35 }
 0x70c   :  { %1818 = vrsqrt.f32 %v1207_v57  ;;  %v1208_v58 = vadd.f32 1e-05, %v1206_v31 }
 0x70e   :  { %1820 = vrsqrt.f32 %v1208_v58 }
 0x716   :  { %v1819_v61 = vpop.eup %1818 }
 0x717   :  { %v1211_v62 = vmul.f32 %v1819_v61, %v1195_v40 }
 0x718   :  { %v1821_v63 = vpop.eup %1820 }
 0x719   :  { %v1217_v59 = vmul.f32 %v1216_v60, %v1211_v62  ;;  %v1212_v0 = vmul.f32 %v1821_v63, %v1196_v44 }
 0x71b   :  { %v1218_v4 = vmul.f32 %v1216_v60, %v1212_v0  ;;  %v1223_v5 = vadd.f32 %v1222_v2, %v1217_v59 }
 0x71d   :  { %v1224_v6 = vadd.f32 %v1222_v2, %v1218_v4 }
 0x71f   :  { %v1225_v7 = vpack.c.bf16 %v1224_v6, %v1223_v5 }
 0x721   :  { %1717 = vmatmul.mubr.msk.bf16.vlgmr.msra.gmra.mrb[44].mxu1 %vm75_vm1, %v1225_v7 }
 0x7f4   :  { %v1285_v13 = vpop.f32.mrb[44].mxu1 }
 0x7f5   :  { %v1286_v14 = vadd.f32 %v1527_v12, %v1285_v13  ;;  %v1718_v15 = vpop.f32.mrb[45].mxu1 }
 0x7f6   :  { %v1288_v16 = vpop.f32.mrb[46].mxu1 }
 0x7f7   :  { %v1289_v17 = vadd.f32 %v1527_v12, %v1288_v16  ;;  %v1719_v19 = vpop.f32.mrb[47].mxu1  ;;  %v1292_v20 = vmax.f32 %v1286_v14, 0.0 }
 0x7f9   :  { %v1293_v42 = vmax.f32 %v1289_v17, 0.0 }
 0x7fb   :  { %v1294_v28 = vpack.c.bf16 %v1293_v42, %v1292_v20 }
 0x7fd   :  { %1737 = vmatmul.mubr.bf16.vlgmr.msra.gmra.mrb[32].mxu0 %v1294_v28 }
 0x8d0   :  { %v1397_v18 = vpop.f32.mrb[32].mxu0 }
 0x8d1   :  { %v1398_v22 = vadd.f32 %v1397_v18, %v1314_v21  ;;  %v1738_v23 = vpop.f32.mrb[33].mxu0 }
 0x8d2   :  { %v1400_v24 = vpop.f32.mrb[34].mxu0 }
 0x8d3   :  { %v1401_v25 = vadd.f32 %v1400_v24, %v1314_v21  ;;  %v1739_v26 = vpop.f32.mrb[35].mxu0  ;;  %v1404_v27 = vadd.f32 %v1398_v22, %v1223_v5 }
 0x8d5   :  { %v1406_v29 = vsel %vm75_vm1, %v1404_v27, 0.0  ;;  %v1405_v30 = vadd.f32 %v1401_v25, %v1224_v6 }
 0x8d6   :  { %1407 = vadd.xlane.f32.xlu0 %v1406_v29 }
 0x8d7   :  { %v1409_v33 = vsel %vm75_vm1, %v1405_v30, 0.0 }
 0x8d8   :  { %1410 = vadd.xlane.f32.xlu1 %v1409_v33 }
 0x963   :  { %v1408_v34 = vpop.xlane.xlu0 %1407 }
 0x964   :  { %v1412_v36 = vmul.f32 0.03125, %v1408_v34 }
 0x965   :  { %v1411_v37 = vpop.xlane.xlu1 %1410 }
 0x966   :  { %v1414_v38 = vsub.f32 %v1404_v27, %v1412_v36  ;;  %v1413_v40 = vmul.f32 0.03125, %v1411_v37 }
 0x968   :  { %v1415_v10 = vsub.f32 %v1405_v30, %v1413_v40  ;;  %v1416_v43 = vmul.f32 %v1414_v38, %v1414_v38 }
 0x96a   :  { %v1418_v44 = vsel %vm75_vm1, %v1416_v43, 0.0  ;;  %v1417_v45 = vmul.f32 %v1415_v10, %v1415_v10 }
 0x96b   :  { %1419 = vadd.xlane.f32.xlu0 %v1418_v44 }
 0x96c   :  { %v1421_v3 = vsel %vm75_vm1, %v1417_v45, 0.0 }
 0x96d   :  { %1422 = vadd.xlane.f32.xlu1 %v1421_v3 }
 0x96e   :  { %1838 = shalt.err (!%p1835_p4)
}
 0x96f   :  { %s1839_s27 = scalar_lea.hbm %s2315_s12, 256 }
 0x970   :  { %p1840_p5 = scmp.ne.s32.totalorder %s2315_s12, %s1839_s27  ;;  %p1843_p6 = scmp.lt.u32.totalorder %s1839_s27, %s2315_s12 }
 0x972   :  { %p1845_p7 = pnand %p1843_p6, %p1840_p5 }
 0x974   :  { %1848 = shalt.err (!%p1845_p7)
}
 0x975   :  { %s1885_s30 = smov 128   ;;  %v1434_v50 = vsub.s32 5, %v1989_v8  ;;  %v1440_v51 = vsub.s32 6, %v1989_v8  ;;  %v1826_v52 = vld [vmem:[%s2311_s8] sm:$0xff] }
 0x976   :  { %1488 = dma.vmem_to_hbm [thread:$0]  %s1483_s10, 256, %s2315_s12, [#allocation5], %s1885_s30, %s1885_s30, %s1881_s25  }
 0x977   :  { %v1435_v54 = vrot.slane %v1826_v52, %v1434_v50  ;;  %v1441_v35 = vrot.slane %v1826_v52, %v1440_v51  ;;  %s1886_s12 = smov [#allocation2]  }
 0x978   :  { %s1470_s6 = sshll.u32 %s1886_s12, 4  ;;  %s1471_s6 = int_to_ptr.vmem [resolvable:$true] %s1470_s6 }
 0x979   :  { %s1849_s15 = scalar_lea.vmem %s1471_s6, 256  ;;  %p1854_p9 = scmp.lt.s32.totalorder %s1471_s6, %s1471_s6 }
 0x97a   :  { %p1850_p8 = scmp.ne.s32.totalorder %s1471_s6, %s1849_s15  ;;  %p1855_p10 = scmp.lt.s32.totalorder %s1849_s15, %s1849_s15 }
 0x97c   :  { %p1856_p11 = por %p1855_p10, %p1854_p9 }
 0x97e   :  { %p1857_p12 = pnand %p1856_p11, %p1850_p8 }
 0x9f8   :  { %v1420_v46 = vpop.xlane.xlu0 %1419 }
 0x9f9   :  { %v1424_v41 = vmul.f32 0.03125, %v1420_v46 }
 0x9fa   :  { %v1423_v47 = vpop.xlane.xlu1 %1422 }
 0x9fb   :  { %v1426_v39 = vadd.f32 1e-05, %v1424_v41  ;;  %v1425_v48 = vmul.f32 0.03125, %v1423_v47 }
 0x9fd   :  { %1822 = vrsqrt.f32 %v1426_v39  ;;  %v1427_v49 = vadd.f32 1e-05, %v1425_v48 }
 0x9ff   :  { %1824 = vrsqrt.f32 %v1427_v49 }
 0xa07   :  { %v1823_v55 = vpop.eup %1822 }
 0xa08   :  { %v1430_v56 = vmul.f32 %v1823_v55, %v1414_v38 }
 0xa09   :  { %v1825_v57 = vpop.eup %1824 }
 0xa0a   :  { %v1431_v31 = vmul.f32 %v1825_v57, %v1415_v10  ;;  %v1436_v58 = vmul.f32 %v1435_v54, %v1430_v56 }
 0xa0c   :  { %v1437_v32 = vmul.f32 %v1435_v54, %v1431_v31  ;;  %v1442_v60 = vadd.f32 %v1441_v35, %v1436_v58 }
 0xa0e   :  { %v1443_v53 = vadd.f32 %v1441_v35, %v1437_v32  ;;  %1444 = vst.msk [vmem:[#allocation2] sm:$0xff] %vm75_vm1, %v1442_v60 }
 0xa10   :  { %1445 = vst.msk [vmem:[#allocation2 + $0x8] sm:$0xff] %vm75_vm1, %v1443_v53 }
 0xa11   :  { %1860 = shalt.err (!%p1857_p12)
}
 0xa12   :  { %s1861_s17 = scalar_lea.hbm %s2314_s11, 256 }
 0xa13   :  { %p1862_p13 = scmp.ne.s32.totalorder %s2314_s11, %s1861_s17  ;;  %p1865_p0 = scmp.lt.u32.totalorder %s1861_s17, %s2314_s11 }
 0xa15   :  { %p1867_p1 = pnand %p1865_p0, %p1862_p13 }
 0xa17   :  { %1870 = shalt.err (!%p1867_p1)
}
 0xa18   :  { %1476 = dma.vmem_to_hbm [thread:$0]  %s1471_s6, 256, %s2314_s11, [#allocation3], %s1885_s30, %s1885_s30, %s1881_s25  }
 0xa19   :  { %1871 = dma.done.wait [#allocation3], 256  }
 0xa1a   :  { %1872 = vsyncadd [#allocation3], 4294967040 }
 0xa1b   :  { %1873 = dma.done.wait [#allocation5], 256  }
 0xa1c   :  { %1874 = vsyncadd [#allocation5], 4294967040 }
 0xa1d   :  { %1495 = vsyncpa [#allocation3], 1 }
 0xa1e   :  { %1496 = vsyncpa [#allocation5], 1 }

</bundles_post_ra>
